<compile_context>
chip_gen: v6e
topology: v6e:2x2x1
jax: 0.10.0
libtpu: 0.0.40
codegen_flags: <defaults>
</compile_context>

<pallas_src>
import functools
import math

import jax
import jax.numpy as jnp
from jax.experimental import pallas as pl
from jax.experimental.pallas import tpu as pltpu

_MXU_DTYPE = jnp.bfloat16      # MXU operand dtype (f32 accumulation everywhere)
_LN_EPS = 1e-5                 # torch.nn.LayerNorm default
_VMEM_LIMIT_BYTES = 48 * 1024 * 1024   # explicit scoped-VMEM limit (headroom on v7x 64 MiB/TC)


def _cparams():
    return pltpu.CompilerParams(dimension_semantics=("parallel",),
                                vmem_limit_bytes=_VMEM_LIMIT_BYTES)


def _pick_row_block(M, cap=512):
    """Largest multiple-of-8 divisor of M (<= cap); prefer >=4 grid steps, then >=2, else full."""
    for min_steps in (4, 2):
        best = 0
        for c in range(8, min(M, cap) + 1, 8):
            if M % c == 0 and M // c >= min_steps:
                best = c
        if best:
            return best
    return M


def _layernorm_2d(x, gamma, beta):
    """In-kernel LayerNorm over last axis. x:(R,D) f32, gamma/beta:(1,D) f32."""
    mean = jnp.mean(x, axis=-1, keepdims=True)
    var = jnp.mean(jnp.square(x - mean), axis=-1, keepdims=True)
    return (x - mean) * jax.lax.rsqrt(var + _LN_EPS) * gamma + beta


# ----------------------------------------------------------------------------
# Fused kernels (one pallas_call per transformer sub-block)
# ----------------------------------------------------------------------------

def _fused_attn_kernel(x_ref, g_ref, b_ref, wqkv_ref, wout_ref, bout_ref,
                       o_ref, ctx_ref, *, heads, dim_head):
    """out = x + to_out(FSAttention(LayerNorm(x)))   — PreNorm + residual fused.

    x_ref: (N, D)  (leading batch dim is a squeezed grid dim)
    wqkv_ref: (D, 3*inner) bf16 with the softmax scale pre-folded into the Q columns.
    ctx_ref: VMEM scratch (N, inner) f32 — per-head contexts are lane-stacked here so the
             output projection is a single (N, inner) x (inner, D) matmul.
    """
    f32 = jnp.float32
    inner = heads * dim_head

    x = x_ref[...].astype(f32)                                     # (N, D)
    y = _layernorm_2d(x, g_ref[...], b_ref[...])
    qkv = jnp.dot(y.astype(_MXU_DTYPE), wqkv_ref[...],
                  preferred_element_type=f32)                      # (N, 3*inner)
    qkv_b = qkv.astype(_MXU_DTYPE)                                 # one cast, sliced below

    for h in range(heads):                                         # heads is small & static
        lo, hi = h * dim_head, (h + 1) * dim_head
        q_h = qkv_b[:, lo:hi]
        k_h = qkv_b[:, inner + lo:inner + hi]
        v_h = qkv_b[:, 2 * inner + lo:2 * inner + hi]
        # scores: contract last axes (no explicit k.T / XLU transpose); scale already folded.
        s = jax.lax.dot_general(q_h, k_h, (((1,), (1,)), ((), ())),
                                preferred_element_type=f32)        # (N, N)
        s = s - jnp.max(s, axis=-1, keepdims=True)
        e = jnp.exp(s)
        p = e * pl.reciprocal(jnp.sum(e, axis=-1, keepdims=True), approx=True)
        ctx_ref[:, lo:hi] = jnp.dot(p.astype(_MXU_DTYPE), v_h,
                                    preferred_element_type=f32)    # (N, dh)

    ctx = ctx_ref[...].astype(_MXU_DTYPE)                          # (N, inner)
    proj = jnp.dot(ctx, wout_ref[...], preferred_element_type=f32) + bout_ref[...]
    o_ref[...] = (x + proj).astype(o_ref.dtype)


def _prenorm_ffn_kernel(x_ref, g_ref, b_ref, w1_ref, b1_ref, w2_ref, b2_ref, o_ref):
    """out = x + W2(GELU(W1(LayerNorm(x)) + b1)) + b2   — PreNorm FFN + residual."""
    f32 = jnp.float32
    x = x_ref[...].astype(f32)                                     # (tm, D)
    y = _layernorm_2d(x, g_ref[...], b_ref[...])
    h = jnp.dot(y.astype(_MXU_DTYPE), w1_ref[...],
                preferred_element_type=f32) + b1_ref[...]
    h = 0.5 * h * (1.0 + jax.lax.erf(h * (1.0 / math.sqrt(2.0))))  # exact (erf) GELU
    out = jnp.dot(h.astype(_MXU_DTYPE), w2_ref[...],
                  preferred_element_type=f32) + b2_ref[...]
    o_ref[...] = (x + out).astype(o_ref.dtype)


def _postnorm_ffn_kernel(x_ref, w1_ref, b1_ref, w2_ref, b2_ref, g_ref, b_ref, o_ref):
    """out = LayerNorm(x + fc2(relu(fc1(x))))   — cross-attention FFN branch."""
    f32 = jnp.float32
    x = x_ref[...].astype(f32)                                     # (tm, D)
    h = jnp.dot(x.astype(_MXU_DTYPE), w1_ref[...],
                preferred_element_type=f32) + b1_ref[...]
    h = jnp.maximum(h, 0.0)
    out = jnp.dot(h.astype(_MXU_DTYPE), w2_ref[...],
                  preferred_element_type=f32) + b2_ref[...]
    o_ref[...] = _layernorm_2d(x + out, g_ref[...], b_ref[...]).astype(o_ref.dtype)


def _cross_attn_kernel(vid_ref, aud_ref, wq_ref, bq_ref, wkv_ref, bkv_ref,
                       wo_ref, bo_ref, g_ref, beta_ref, o_ref, ctx_ref, *, heads):
    """out = LayerNorm(video + MHA(video, audio, audio))   — attention branch fused.

    vid_ref: (Nq, D), aud_ref: (Na, D)  (batch is a squeezed grid dim).
    wq/bq carry the 1/sqrt(head_dim) scale; wkv = [wk|wv], bkv = [bk|bv] (pre-concatenated).
    """
    f32 = jnp.float32
    vid = vid_ref[...].astype(f32)                                 # (Nq, D)
    aud = aud_ref[...].astype(f32)                                 # (Na, D)
    D = vid.shape[1]
    dh = D // heads

    q = jnp.dot(vid.astype(_MXU_DTYPE), wq_ref[...],
                preferred_element_type=f32) + bq_ref[...]          # (Nq, D), pre-scaled
    kv = jnp.dot(aud.astype(_MXU_DTYPE), wkv_ref[...],
                 preferred_element_type=f32) + bkv_ref[...]        # (Na, 2D)
    q_b = q.astype(_MXU_DTYPE)
    kv_b = kv.astype(_MXU_DTYPE)

    for h in range(heads):
        lo, hi = h * dh, (h + 1) * dh
        q_h = q_b[:, lo:hi]
        k_h = kv_b[:, lo:hi]
        v_h = kv_b[:, D + lo:D + hi]
        s = jax.lax.dot_general(q_h, k_h, (((1,), (1,)), ((), ())),
                                preferred_element_type=f32)        # (Nq, Na)
        s = s - jnp.max(s, axis=-1, keepdims=True)
        e = jnp.exp(s)
        p = e * pl.reciprocal(jnp.sum(e, axis=-1, keepdims=True), approx=True)
        ctx_ref[:, lo:hi] = jnp.dot(p.astype(_MXU_DTYPE), v_h,
                                    preferred_element_type=f32)    # (Nq, dh)

    ctx = ctx_ref[...].astype(_MXU_DTYPE)                          # (Nq, D)
    proj = jnp.dot(ctx, wo_ref[...], preferred_element_type=f32) + bo_ref[...]
    y = vid + proj                                                 # residual (post-norm)
    o_ref[...] = _layernorm_2d(y, g_ref[...], beta_ref[...]).astype(o_ref.dtype)


# ----------------------------------------------------------------------------
# Pallas-call wrappers
# ----------------------------------------------------------------------------

def fused_prenorm_attention(x, p, heads, dim_head):
    """x:(B, N, D) -> x + FSAttention(LN(x)) in one pallas_call; grid over the batch dim."""
    B, N, D = x.shape
    inner = heads * dim_head
    kernel = functools.partial(_fused_attn_kernel, heads=heads, dim_head=dim_head)
    return pl.pallas_call(
        kernel,
        out_shape=jax.ShapeDtypeStruct((B, N, D), x.dtype),
        grid=(B,),
        in_specs=[
            pl.BlockSpec((None, N, D), lambda i: (i, 0, 0)),       # x (batch squeezed)
            pl.BlockSpec((1, D), lambda i: (0, 0)),                # ln gamma
            pl.BlockSpec((1, D), lambda i: (0, 0)),                # ln beta
            pl.BlockSpec((D, 3 * inner), lambda i: (0, 0)),        # w_qkv (bf16, scale folded)
            pl.BlockSpec((inner, D), lambda i: (0, 0)),            # w_out (bf16)
            pl.BlockSpec((1, D), lambda i: (0, 0)),                # b_out
        ],
        out_specs=pl.BlockSpec((None, N, D), lambda i: (i, 0, 0)),
        scratch_shapes=[pltpu.VMEM((N, inner), jnp.float32)],      # lane-stacked head contexts
        compiler_params=_cparams(),
    )(x, p["ln_g"], p["ln_b"], p["w_qkv"], p["w_out"], p["b_out"])


def fused_prenorm_ffn(x, p):
    """x:(B, N, D) -> x + FeedForward(LN(x)) in one pallas_call (2-D row-block slab)."""
    B, N, D = x.shape
    M = B * N
    H = p["w1"].shape[1]
    tm = _pick_row_block(M)
    out = pl.pallas_call(
        _prenorm_ffn_kernel,
        out_shape=jax.ShapeDtypeStruct((M, D), x.dtype),
        grid=(M // tm,),
        in_specs=[
            pl.BlockSpec((tm, D), lambda i: (i, 0)),
            pl.BlockSpec((1, D), lambda i: (0, 0)),
            pl.BlockSpec((1, D), lambda i: (0, 0)),
            pl.BlockSpec((D, H), lambda i: (0, 0)),                # w1 (bf16)
            pl.BlockSpec((1, H), lambda i: (0, 0)),
            pl.BlockSpec((H, D), lambda i: (0, 0)),                # w2 (bf16)
            pl.BlockSpec((1, D), lambda i: (0, 0)),
        ],
        out_specs=pl.BlockSpec((tm, D), lambda i: (i, 0)),
        compiler_params=_cparams(),
    )(x.reshape(M, D), p["ln_g"], p["ln_b"], p["w1"], p["b1"], p["w2"], p["b2"])
    return out.reshape(B, N, D)


def cross_attention_layer(p, video, audio, heads):
    """CrossAttentionLayer: video=query, audio=key/value. Two fused pallas_calls."""
    Bv, Nq, dim = video.shape
    Na = audio.shape[1]

    attn_kernel = functools.partial(_cross_attn_kernel, heads=heads)
    video = pl.pallas_call(
        attn_kernel,
        out_shape=jax.ShapeDtypeStruct((Bv, Nq, dim), video.dtype),
        grid=(Bv,),
        in_specs=[
            pl.BlockSpec((None, Nq, dim), lambda i: (i, 0, 0)),    # video (batch squeezed)
            pl.BlockSpec((None, Na, dim), lambda i: (i, 0, 0)),    # audio (batch squeezed)
            pl.BlockSpec((dim, dim), lambda i: (0, 0)),            # wq (bf16, pre-scaled)
            pl.BlockSpec((1, dim), lambda i: (0, 0)),              # bq (pre-scaled)
            pl.BlockSpec((dim, 2 * dim), lambda i: (0, 0)),        # wkv (bf16)
            pl.BlockSpec((1, 2 * dim), lambda i: (0, 0)),          # bkv
            pl.BlockSpec((dim, dim), lambda i: (0, 0)),            # wo (bf16)
            pl.BlockSpec((1, dim), lambda i: (0, 0)),              # bo
            pl.BlockSpec((1, dim), lambda i: (0, 0)),              # ln1 gamma
            pl.BlockSpec((1, dim), lambda i: (0, 0)),              # ln1 beta
        ],
        out_specs=pl.BlockSpec((None, Nq, dim), lambda i: (i, 0, 0)),
        scratch_shapes=[pltpu.VMEM((Nq, dim), jnp.float32)],
        compiler_params=_cparams(),
    )(video, audio, p["wq"], p["bq"], p["wkv"], p["bkv"],
      p["wo"], p["bo"], p["ln1_g"], p["ln1_b"])

    # fused post-norm ReLU FFN:  LN(video + fc2(relu(fc1(video))))
    M = Bv * Nq
    pf = p["f1_w"].shape[1]
    tm = _pick_row_block(M)
    out = pl.pallas_call(
        _postnorm_ffn_kernel,
        out_shape=jax.ShapeDtypeStruct((M, dim), video.dtype),
        grid=(M // tm,),
        in_specs=[
            pl.BlockSpec((tm, dim), lambda i: (i, 0)),
            pl.BlockSpec((dim, pf), lambda i: (0, 0)),             # f1_w (bf16)
            pl.BlockSpec((1, pf), lambda i: (0, 0)),
            pl.BlockSpec((pf, dim), lambda i: (0, 0)),             # f2_w (bf16)
            pl.BlockSpec((1, dim), lambda i: (0, 0)),
            pl.BlockSpec((1, dim), lambda i: (0, 0)),              # ln2 gamma
            pl.BlockSpec((1, dim), lambda i: (0, 0)),              # ln2 beta
        ],
        out_specs=pl.BlockSpec((tm, dim), lambda i: (i, 0)),
        compiler_params=_cparams(),
    )(video.reshape(M, dim), p["f1_w"], p["f1_b"], p["f2_w"], p["f2_b"],
      p["ln2_g"], p["ln2_b"])
    return out.reshape(Bv, Nq, dim)


# ----------------------------------------------------------------------------
# Encoder forward (reshape/transpose glue stays in plain JAX)
# ----------------------------------------------------------------------------

def fsa_transformer_encoder(params, x, audio, *, b, nt, n, dim, heads, dim_head,
                            fusion_layer):
    """x: (b, nt, n, dim), audio: (b*nt, n_audio, dim) -> (b, nt*n, dim)."""
    x = x.reshape(b * nt, n, dim)
    for i, lp in enumerate(params["layers"], start=1):
        if i == fusion_layer:
            x = cross_attention_layer(params["cross"], x, audio, heads)
        else:
            # spatial attention (PreNorm + attention + residual, one kernel)
            x = fused_prenorm_attention(x, lp["sp"], heads, dim_head)
            # (b*nt, n, d) -> (b*n, nt, d)
            x = x.reshape(b, nt, n, dim).transpose(0, 2, 1, 3).reshape(b * n, nt, dim)
            # temporal attention
            x = fused_prenorm_attention(x, lp["tp"], heads, dim_head)
            # feed-forward (PreNorm + FFN + residual, one kernel)
            x = fused_prenorm_ffn(x, lp["ff"])
            # (b*n, nt, d) -> (b*nt, n, d)
            x = x.reshape(b, n, nt, dim).transpose(0, 2, 1, 3).reshape(b * nt, n, dim)
    return x.reshape(b, nt * n, dim)


# ----------------------------------------------------------------------------
# Parameter init (torch-like f32) + one-time kernel-ready preparation
# ----------------------------------------------------------------------------

def _lin(key, fan_in, fan_out, bias=True):
    kw, kb = jax.random.split(key)
    w = 0.02 * jax.random.normal(kw, (fan_in, fan_out), jnp.float32)
    b = (0.02 * jax.random.normal(kb, (fan_out,), jnp.float32)
         if bias else jnp.zeros((fan_out,), jnp.float32))
    return w, b


def init_params(key, dim, depth, heads, dim_head, mlp_dim, pf_dim):
    inner = heads * dim_head
    layers = []
    for _ in range(depth):
        keys = jax.random.split(key, 8)
        key = keys[0]
        w_qkv_s, _ = _lin(keys[1], dim, 3 * inner, bias=False)
        w_out_s, b_out_s = _lin(keys[2], inner, dim)
        w_qkv_t, _ = _lin(keys[3], dim, 3 * inner, bias=False)
        w_out_t, b_out_t = _lin(keys[4], inner, dim)
        w1, b1 = _lin(keys[5], dim, mlp_dim)
        w2, b2 = _lin(keys[6], mlp_dim, dim)
        ones = jnp.ones((dim,), jnp.float32)
        zeros = jnp.zeros((dim,), jnp.float32)
        layers.append({
            "sp_ln_g": ones, "sp_ln_b": zeros,
            "sp_attn": {"w_qkv": w_qkv_s, "w_out": w_out_s, "b_out": b_out_s},
            "t_ln_g": ones, "t_ln_b": zeros,
            "t_attn": {"w_qkv": w_qkv_t, "w_out": w_out_t, "b_out": b_out_t},
            "ff_ln_g": ones, "ff_ln_b": zeros,
            "ff": {"w1": w1, "b1": b1, "w2": w2, "b2": b2},
        })
    keys = jax.random.split(key, 7)
    wq, bq = _lin(keys[0], dim, dim)
    wk, bk = _lin(keys[1], dim, dim)
    wv, bv = _lin(keys[2], dim, dim)
    wo, bo = _lin(keys[3], dim, dim)
    f1w, f1b = _lin(keys[4], dim, pf_dim)
    f2w, f2b = _lin(keys[5], pf_dim, dim)
    cross = {
        "wq": wq, "bq": bq, "wk": wk, "bk": bk, "wv": wv, "bv": bv,
        "wo": wo, "bo": bo,
        "f1_w": f1w, "f1_b": f1b, "f2_w": f2w, "f2_b": f2b,
        "ln1_g": jnp.ones((dim,), jnp.float32), "ln1_b": jnp.zeros((dim,), jnp.float32),
        "ln2_g": jnp.ones((dim,), jnp.float32), "ln2_b": jnp.zeros((dim,), jnp.float32),
    }
    return {"layers": layers, "cross": cross}


def prepare_params(raw, dim, heads, dim_head):
    """One-time prep: fold softmax scales into Q weights, fuse K|V weights, pre-cast matmul
    weights to bf16 and reshape biases/LN params to (1, D) lane layout."""
    inner = heads * dim_head
    scale = dim_head ** -0.5

    def prep_attn(a, g, b_):
        wqkv = jnp.concatenate([a["w_qkv"][:, :inner] * scale, a["w_qkv"][:, inner:]], axis=1)
        return {
            "ln_g": g.reshape(1, dim), "ln_b": b_.reshape(1, dim),
            "w_qkv": wqkv.astype(_MXU_DTYPE),
            "w_out": a["w_out"].astype(_MXU_DTYPE),
            "b_out": a["b_out"].reshape(1, dim),
        }

    layers = []
    for lp in raw["layers"]:
        H = lp["ff"]["w1"].shape[1]
        layers.append({
            "sp": prep_attn(lp["sp_attn"], lp["sp_ln_g"], lp["sp_ln_b"]),
            "tp": prep_attn(lp["t_attn"], lp["t_ln_g"], lp["t_ln_b"]),
            "ff": {
                "ln_g": lp["ff_ln_g"].reshape(1, dim), "ln_b": lp["ff_ln_b"].reshape(1, dim),
                "w1": lp["ff"]["w1"].astype(_MXU_DTYPE), "b1": lp["ff"]["b1"].reshape(1, H),
                "w2": lp["ff"]["w2"].astype(_MXU_DTYPE), "b2": lp["ff"]["b2"].reshape(1, dim),
            },
        })

    c = raw["cross"]
    cscale = 1.0 / math.sqrt(dim // heads)
    pf = c["f1_w"].shape[1]
    cross = {
        "wq": (c["wq"] * cscale).astype(_MXU_DTYPE),
        "bq": (c["bq"] * cscale).reshape(1, dim),
        "wkv": jnp.concatenate([c["wk"], c["wv"]], axis=1).astype(_MXU_DTYPE),
        "bkv": jnp.concatenate([c["bk"], c["bv"]]).reshape(1, 2 * dim),
        "wo": c["wo"].astype(_MXU_DTYPE), "bo": c["bo"].reshape(1, dim),
        "ln1_g": c["ln1_g"].reshape(1, dim), "ln1_b": c["ln1_b"].reshape(1, dim),
        "f1_w": c["f1_w"].astype(_MXU_DTYPE), "f1_b": c["f1_b"].reshape(1, pf),
        "f2_w": c["f2_w"].astype(_MXU_DTYPE), "f2_b": c["f2_b"].reshape(1, dim),
        "ln2_g": c["ln2_g"].reshape(1, dim), "ln2_b": c["ln2_b"].reshape(1, dim),
    }
    return {"layers": layers, "cross": cross}


# ----------------------------------------------------------------------------
# Main
# ----------------------------------------------------------------------------

if __name__ == "__main__":
    # small config
    dim, depth, heads, dim_head = 32, 3, 4, 8
    mlp_dim, pf_dim = 64, 64
    nt, nh, nw = 2, 2, 2
    n = nh * nw
    b = 2
    n_audio = 4
    fusion_layer = 2   # layer 2 of 3 runs cross-attention fusion

    key = jax.random.PRNGKey(0)
    k_par, k_x, k_a = jax.random.split(key, 3)

    raw_params = init_params(k_par, dim, depth, heads, dim_head, mlp_dim, pf_dim)
    params = prepare_params(raw_params, dim, heads, dim_head)   # bf16 weights, folded scales

    x = jax.random.normal(k_x, (b, nt, n, dim), jnp.float32)
    audio = jax.random.normal(k_a, (b * nt, n_audio, dim), jnp.float32)

    fwd = jax.jit(functools.partial(
        fsa_transformer_encoder,
        b=b, nt=nt, n=n, dim=dim, heads=heads, dim_head=dim_head,
        fusion_layer=fusion_layer))

    out = jax.block_until_ready(fwd(params, x, audio))
    assert out.shape == (b, nt * n, dim), out.shape
    assert bool(jnp.all(jnp.isfinite(out)))
    print("KERNEL_OK")
</pallas_src>

<mosaic_0001>
module attributes {stable_mosaic.version = 11 : i64} {
  func.func @_fused_attn_kernel(%arg0: i32, %arg1: memref<1x4x32xf32, #tpu.memory_space<vmem>>, %arg2: memref<1x32xf32, #tpu.memory_space<vmem>>, %arg3: memref<1x32xf32, #tpu.memory_space<vmem>>, %arg4: memref<32x96xbf16, #tpu.memory_space<vmem>>, %arg5: memref<32x32xbf16, #tpu.memory_space<vmem>>, %arg6: memref<1x32xf32, #tpu.memory_space<vmem>>, %arg7: memref<1x4x32xf32, #tpu.memory_space<vmem>>, %arg8: memref<4x32xf32, #tpu.memory_space<vmem>>) attributes {dimension_semantics = [#tpu.dimension_semantics<parallel>], iteration_bounds = array<i64: 4>, scalar_prefetch = 0 : i64, scratch_operands = 1 : i64, tpu.core_type = #tpu.core_type<tc>, window_params = [{transform_indices = @transform_0, window_bounds = array<i64: 1, 4, 32>}, {pipeline_mode = #tpu.pipeline_mode<synchronous>, transform_indices = @transform_1, window_bounds = array<i64: 1, 32>}, {pipeline_mode = #tpu.pipeline_mode<synchronous>, transform_indices = @transform_2, window_bounds = array<i64: 1, 32>}, {pipeline_mode = #tpu.pipeline_mode<synchronous>, transform_indices = @transform_3, window_bounds = array<i64: 32, 96>}, {pipeline_mode = #tpu.pipeline_mode<synchronous>, transform_indices = @transform_4, window_bounds = array<i64: 32, 32>}, {pipeline_mode = #tpu.pipeline_mode<synchronous>, transform_indices = @transform_5, window_bounds = array<i64: 1, 32>}, {transform_indices = @transform_6, window_bounds = array<i64: 1, 4, 32>}]} {
    %c0 = arith.constant 0 : index
    %c0_0 = arith.constant 0 : index
    %c0_1 = arith.constant 0 : index
    %0 = vector.load %arg1[%c0, %c0_0, %c0_1] : memref<1x4x32xf32, #tpu.memory_space<vmem>>, vector<1x4x32xf32>
    %1 = vector.shape_cast %0 : vector<1x4x32xf32> to vector<4x32xf32>
    %c0_2 = arith.constant 0 : index
    %c0_3 = arith.constant 0 : index
    %2 = vector.load %arg2[%c0_2, %c0_3] : memref<1x32xf32, #tpu.memory_space<vmem>>, vector<1x32xf32>
    %c0_4 = arith.constant 0 : index
    %c0_5 = arith.constant 0 : index
    %3 = vector.load %arg3[%c0_4, %c0_5] : memref<1x32xf32, #tpu.memory_space<vmem>>, vector<1x32xf32>
    %cst = arith.constant dense<0.000000e+00> : vector<4xf32>
    %4 = vector.multi_reduction <add>, %1, %cst [1] : vector<4x32xf32> to vector<4xf32>
    %5 = vector.shape_cast %4 : vector<4xf32> to vector<4x1xf32>
    %cst_6 = arith.constant 3.200000e+01 : f32
    %6 = vector.broadcast %cst_6 : f32 to vector<4x1xf32>
    %7 = arith.divf %5, %6 : vector<4x1xf32>
    %8 = vector.broadcast %7 : vector<4x1xf32> to vector<4x32xf32>
    %9 = arith.subf %1, %8 : vector<4x32xf32>
    %10 = arith.mulf %9, %9 : vector<4x32xf32>
    %cst_7 = arith.constant dense<0.000000e+00> : vector<4xf32>
    %11 = vector.multi_reduction <add>, %10, %cst_7 [1] : vector<4x32xf32> to vector<4xf32>
    %12 = vector.shape_cast %11 : vector<4xf32> to vector<4x1xf32>
    %cst_8 = arith.constant 3.200000e+01 : f32
    %13 = vector.broadcast %cst_8 : f32 to vector<4x1xf32>
    %14 = arith.divf %12, %13 : vector<4x1xf32>
    %15 = vector.broadcast %7 : vector<4x1xf32> to vector<4x32xf32>
    %16 = arith.subf %1, %15 : vector<4x32xf32>
    %cst_9 = arith.constant 9.99999974E-6 : f32
    %17 = vector.broadcast %cst_9 : f32 to vector<4x1xf32>
    %18 = arith.addf %14, %17 : vector<4x1xf32>
    %19 = math.rsqrt %18 : vector<4x1xf32>
    %20 = vector.broadcast %19 : vector<4x1xf32> to vector<4x32xf32>
    %21 = arith.mulf %16, %20 : vector<4x32xf32>
    %22 = vector.broadcast %2 : vector<1x32xf32> to vector<4x32xf32>
    %23 = arith.mulf %21, %22 : vector<4x32xf32>
    %24 = vector.broadcast %3 : vector<1x32xf32> to vector<4x32xf32>
    %25 = arith.addf %23, %24 : vector<4x32xf32>
    %26 = arith.truncf %25 : vector<4x32xf32> to vector<4x32xbf16>
    %c0_10 = arith.constant 0 : index
    %c0_11 = arith.constant 0 : index
    %27 = vector.load %arg4[%c0_10, %c0_11] : memref<32x96xbf16, #tpu.memory_space<vmem>>, vector<32x96xbf16>
    %cst_12 = arith.constant dense<0.000000e+00> : vector<4x96xf32>
    %28 = tpu.matmul %26, %27, %cst_12 {dimension_numbers = #tpu.dot_dimension_numbers<[1], [0], [0], [1], [0, 0, 1, 1], [], []>} : vector<4x32xbf16>, vector<32x96xbf16>, vector<4x96xf32> -> vector<4x96xf32>
    %29 = arith.truncf %28 : vector<4x96xf32> to vector<4x96xbf16>
    %30 = vector.extract_strided_slice %29 {offsets = [0, 0], sizes = [4, 8], strides = [1, 1]} : vector<4x96xbf16> to vector<4x8xbf16>
    %31 = vector.extract_strided_slice %29 {offsets = [0, 32], sizes = [4, 8], strides = [1, 1]} : vector<4x96xbf16> to vector<4x8xbf16>
    %32 = vector.extract_strided_slice %29 {offsets = [0, 64], sizes = [4, 8], strides = [1, 1]} : vector<4x96xbf16> to vector<4x8xbf16>
    %cst_13 = arith.constant dense<0.000000e+00> : vector<4x4xf32>
    %33 = tpu.matmul %30, %31, %cst_13 {dimension_numbers = #tpu.dot_dimension_numbers<[1], [1], [0], [0], [0, 0, 1, 0], [], []>} : vector<4x8xbf16>, vector<4x8xbf16>, vector<4x4xf32> -> vector<4x4xf32>
    %cst_14 = arith.constant dense<0xFF800000> : vector<4xf32>
    %34 = vector.multi_reduction <maximumf>, %33, %cst_14 [1] : vector<4x4xf32> to vector<4xf32>
    %35 = vector.shape_cast %34 : vector<4xf32> to vector<4x1xf32>
    %36 = vector.broadcast %35 : vector<4x1xf32> to vector<4x4xf32>
    %37 = arith.subf %33, %36 : vector<4x4xf32>
    %38 = math.exp %37 : vector<4x4xf32>
    %cst_15 = arith.constant dense<0.000000e+00> : vector<4xf32>
    %39 = vector.multi_reduction <add>, %38, %cst_15 [1] : vector<4x4xf32> to vector<4xf32>
    %40 = vector.shape_cast %39 : vector<4xf32> to vector<4x1xf32>
    %41 = tpu.reciprocal %40 {approx = true} : vector<4x1xf32> -> vector<4x1xf32>
    %42 = vector.broadcast %41 : vector<4x1xf32> to vector<4x4xf32>
    %43 = arith.mulf %38, %42 : vector<4x4xf32>
    %44 = arith.truncf %43 : vector<4x4xf32> to vector<4x4xbf16>
    %cst_16 = arith.constant dense<0.000000e+00> : vector<4x8xf32>
    %45 = tpu.matmul %44, %32, %cst_16 {dimension_numbers = #tpu.dot_dimension_numbers<[1], [0], [0], [1], [0, 0, 1, 1], [], []>} : vector<4x4xbf16>, vector<4x8xbf16>, vector<4x8xf32> -> vector<4x8xf32>
    %c0_17 = arith.constant 0 : index
    %c0_18 = arith.constant 0 : index
    %46 = vector.load %arg8[%c0_17, %c0_18] : memref<4x32xf32, #tpu.memory_space<vmem>>, vector<4x8xf32>
    tpu.vector_store %arg8[%c0_17, %c0_18], %45 {strides = array<i32>} : memref<4x32xf32, #tpu.memory_space<vmem>>, vector<4x8xf32>,
    %47 = vector.extract_strided_slice %29 {offsets = [0, 8], sizes = [4, 8], strides = [1, 1]} : vector<4x96xbf16> to vector<4x8xbf16>
    %48 = vector.extract_strided_slice %29 {offsets = [0, 40], sizes = [4, 8], strides = [1, 1]} : vector<4x96xbf16> to vector<4x8xbf16>
    %49 = vector.extract_strided_slice %29 {offsets = [0, 72], sizes = [4, 8], strides = [1, 1]} : vector<4x96xbf16> to vector<4x8xbf16>
    %cst_19 = arith.constant dense<0.000000e+00> : vector<4x4xf32>
    %50 = tpu.matmul %47, %48, %cst_19 {dimension_numbers = #tpu.dot_dimension_numbers<[1], [1], [0], [0], [0, 0, 1, 0], [], []>} : vector<4x8xbf16>, vector<4x8xbf16>, vector<4x4xf32> -> vector<4x4xf32>
    %cst_20 = arith.constant dense<0xFF800000> : vector<4xf32>
    %51 = vector.multi_reduction <maximumf>, %50, %cst_20 [1] : vector<4x4xf32> to vector<4xf32>
    %52 = vector.shape_cast %51 : vector<4xf32> to vector<4x1xf32>
    %53 = vector.broadcast %52 : vector<4x1xf32> to vector<4x4xf32>
    %54 = arith.subf %50, %53 : vector<4x4xf32>
    %55 = math.exp %54 : vector<4x4xf32>
    %cst_21 = arith.constant dense<0.000000e+00> : vector<4xf32>
    %56 = vector.multi_reduction <add>, %55, %cst_21 [1] : vector<4x4xf32> to vector<4xf32>
    %57 = vector.shape_cast %56 : vector<4xf32> to vector<4x1xf32>
    %58 = tpu.reciprocal %57 {approx = true} : vector<4x1xf32> -> vector<4x1xf32>
    %59 = vector.broadcast %58 : vector<4x1xf32> to vector<4x4xf32>
    %60 = arith.mulf %55, %59 : vector<4x4xf32>
    %61 = arith.truncf %60 : vector<4x4xf32> to vector<4x4xbf16>
    %cst_22 = arith.constant dense<0.000000e+00> : vector<4x8xf32>
    %62 = tpu.matmul %61, %49, %cst_22 {dimension_numbers = #tpu.dot_dimension_numbers<[1], [0], [0], [1], [0, 0, 1, 1], [], []>} : vector<4x4xbf16>, vector<4x8xbf16>, vector<4x8xf32> -> vector<4x8xf32>
    %c0_23 = arith.constant 0 : index
    %c8 = arith.constant 8 : index
    %63 = vector.load %arg8[%c0_23, %c8] : memref<4x32xf32, #tpu.memory_space<vmem>>, vector<4x8xf32>
    tpu.vector_store %arg8[%c0_23, %c8], %62 {strides = array<i32>} : memref<4x32xf32, #tpu.memory_space<vmem>>, vector<4x8xf32>,
    %64 = vector.extract_strided_slice %29 {offsets = [0, 16], sizes = [4, 8], strides = [1, 1]} : vector<4x96xbf16> to vector<4x8xbf16>
    %65 = vector.extract_strided_slice %29 {offsets = [0, 48], sizes = [4, 8], strides = [1, 1]} : vector<4x96xbf16> to vector<4x8xbf16>
    %66 = vector.extract_strided_slice %29 {offsets = [0, 80], sizes = [4, 8], strides = [1, 1]} : vector<4x96xbf16> to vector<4x8xbf16>
    %cst_24 = arith.constant dense<0.000000e+00> : vector<4x4xf32>
    %67 = tpu.matmul %64, %65, %cst_24 {dimension_numbers = #tpu.dot_dimension_numbers<[1], [1], [0], [0], [0, 0, 1, 0], [], []>} : vector<4x8xbf16>, vector<4x8xbf16>, vector<4x4xf32> -> vector<4x4xf32>
    %cst_25 = arith.constant dense<0xFF800000> : vector<4xf32>
    %68 = vector.multi_reduction <maximumf>, %67, %cst_25 [1] : vector<4x4xf32> to vector<4xf32>
    %69 = vector.shape_cast %68 : vector<4xf32> to vector<4x1xf32>
    %70 = vector.broadcast %69 : vector<4x1xf32> to vector<4x4xf32>
    %71 = arith.subf %67, %70 : vector<4x4xf32>
    %72 = math.exp %71 : vector<4x4xf32>
    %cst_26 = arith.constant dense<0.000000e+00> : vector<4xf32>
    %73 = vector.multi_reduction <add>, %72, %cst_26 [1] : vector<4x4xf32> to vector<4xf32>
    %74 = vector.shape_cast %73 : vector<4xf32> to vector<4x1xf32>
    %75 = tpu.reciprocal %74 {approx = true} : vector<4x1xf32> -> vector<4x1xf32>
    %76 = vector.broadcast %75 : vector<4x1xf32> to vector<4x4xf32>
    %77 = arith.mulf %72, %76 : vector<4x4xf32>
    %78 = arith.truncf %77 : vector<4x4xf32> to vector<4x4xbf16>
    %cst_27 = arith.constant dense<0.000000e+00> : vector<4x8xf32>
    %79 = tpu.matmul %78, %66, %cst_27 {dimension_numbers = #tpu.dot_dimension_numbers<[1], [0], [0], [1], [0, 0, 1, 1], [], []>} : vector<4x4xbf16>, vector<4x8xbf16>, vector<4x8xf32> -> vector<4x8xf32>
    %c0_28 = arith.constant 0 : index
    %c16 = arith.constant 16 : index
    %80 = vector.load %arg8[%c0_28, %c16] : memref<4x32xf32, #tpu.memory_space<vmem>>, vector<4x8xf32>
    tpu.vector_store %arg8[%c0_28, %c16], %79 {strides = array<i32>} : memref<4x32xf32, #tpu.memory_space<vmem>>, vector<4x8xf32>,
    %81 = vector.extract_strided_slice %29 {offsets = [0, 24], sizes = [4, 8], strides = [1, 1]} : vector<4x96xbf16> to vector<4x8xbf16>
    %82 = vector.extract_strided_slice %29 {offsets = [0, 56], sizes = [4, 8], strides = [1, 1]} : vector<4x96xbf16> to vector<4x8xbf16>
    %83 = vector.extract_strided_slice %29 {offsets = [0, 88], sizes = [4, 8], strides = [1, 1]} : vector<4x96xbf16> to vector<4x8xbf16>
    %cst_29 = arith.constant dense<0.000000e+00> : vector<4x4xf32>
    %84 = tpu.matmul %81, %82, %cst_29 {dimension_numbers = #tpu.dot_dimension_numbers<[1], [1], [0], [0], [0, 0, 1, 0], [], []>} : vector<4x8xbf16>, vector<4x8xbf16>, vector<4x4xf32> -> vector<4x4xf32>
    %cst_30 = arith.constant dense<0xFF800000> : vector<4xf32>
    %85 = vector.multi_reduction <maximumf>, %84, %cst_30 [1] : vector<4x4xf32> to vector<4xf32>
    %86 = vector.shape_cast %85 : vector<4xf32> to vector<4x1xf32>
    %87 = vector.broadcast %86 : vector<4x1xf32> to vector<4x4xf32>
    %88 = arith.subf %84, %87 : vector<4x4xf32>
    %89 = math.exp %88 : vector<4x4xf32>
    %cst_31 = arith.constant dense<0.000000e+00> : vector<4xf32>
    %90 = vector.multi_reduction <add>, %89, %cst_31 [1] : vector<4x4xf32> to vector<4xf32>
    %91 = vector.shape_cast %90 : vector<4xf32> to vector<4x1xf32>
    %92 = tpu.reciprocal %91 {approx = true} : vector<4x1xf32> -> vector<4x1xf32>
    %93 = vector.broadcast %92 : vector<4x1xf32> to vector<4x4xf32>
    %94 = arith.mulf %89, %93 : vector<4x4xf32>
    %95 = arith.truncf %94 : vector<4x4xf32> to vector<4x4xbf16>
    %cst_32 = arith.constant dense<0.000000e+00> : vector<4x8xf32>
    %96 = tpu.matmul %95, %83, %cst_32 {dimension_numbers = #tpu.dot_dimension_numbers<[1], [0], [0], [1], [0, 0, 1, 1], [], []>} : vector<4x4xbf16>, vector<4x8xbf16>, vector<4x8xf32> -> vector<4x8xf32>
    %c0_33 = arith.constant 0 : index
    %c24 = arith.constant 24 : index
    %97 = vector.load %arg8[%c0_33, %c24] : memref<4x32xf32, #tpu.memory_space<vmem>>, vector<4x8xf32>
    tpu.vector_store %arg8[%c0_33, %c24], %96 {strides = array<i32>} : memref<4x32xf32, #tpu.memory_space<vmem>>, vector<4x8xf32>,
    %c0_34 = arith.constant 0 : index
    %c0_35 = arith.constant 0 : index
    %98 = vector.load %arg8[%c0_34, %c0_35] : memref<4x32xf32, #tpu.memory_space<vmem>>, vector<4x32xf32>
    %99 = arith.truncf %98 : vector<4x32xf32> to vector<4x32xbf16>
    %c0_36 = arith.constant 0 : index
    %c0_37 = arith.constant 0 : index
    %100 = vector.load %arg5[%c0_36, %c0_37] : memref<32x32xbf16, #tpu.memory_space<vmem>>, vector<32x32xbf16>
    %cst_38 = arith.constant dense<0.000000e+00> : vector<4x32xf32>
    %101 = tpu.matmul %99, %100, %cst_38 {dimension_numbers = #tpu.dot_dimension_numbers<[1], [0], [0], [1], [0, 0, 1, 1], [], []>} : vector<4x32xbf16>, vector<32x32xbf16>, vector<4x32xf32> -> vector<4x32xf32>
    %c0_39 = arith.constant 0 : index
    %c0_40 = arith.constant 0 : index
    %102 = vector.load %arg6[%c0_39, %c0_40] : memref<1x32xf32, #tpu.memory_space<vmem>>, vector<1x32xf32>
    %103 = vector.broadcast %102 : vector<1x32xf32> to vector<4x32xf32>
    %104 = arith.addf %101, %103 : vector<4x32xf32>
    %105 = arith.addf %1, %104 : vector<4x32xf32>
    %c0_41 = arith.constant 0 : index
    %c0_42 = arith.constant 0 : index
    %c0_43 = arith.constant 0 : index
    %106 = vector.load %arg7[%c0_41, %c0_42, %c0_43] : memref<1x4x32xf32, #tpu.memory_space<vmem>>, vector<1x4x32xf32>
    %107 = vector.shape_cast %106 : vector<1x4x32xf32> to vector<4x32xf32>
    %108 = vector.shape_cast %105 : vector<4x32xf32> to vector<1x4x32xf32>
    tpu.vector_store %arg7[%c0_41, %c0_42, %c0_43], %108 {strides = array<i32>} : memref<1x4x32xf32, #tpu.memory_space<vmem>>, vector<1x4x32xf32>,
    return
  }
  func.func @transform_0(%arg0: i32) -> (i32, i32, i32) {
    %c0_i32 = arith.constant 0 : i32
    %c0_i32_0 = arith.constant 0 : i32
    %c0_i32_1 = arith.constant 0 : i32
    return %arg0, %c0_i32, %c0_i32_0 : i32, i32, i32
  }
  func.func @transform_1(%arg0: i32) -> (i32, i32) {
    %c0_i32 = arith.constant 0 : i32
    %c0_i32_0 = arith.constant 0 : i32
    %c0_i32_1 = arith.constant 0 : i32
    return %c0_i32, %c0_i32_0 : i32, i32
  }
  func.func @transform_2(%arg0: i32) -> (i32, i32) {
    %c0_i32 = arith.constant 0 : i32
    %c0_i32_0 = arith.constant 0 : i32
    %c0_i32_1 = arith.constant 0 : i32
    return %c0_i32, %c0_i32_0 : i32, i32
  }
  func.func @transform_3(%arg0: i32) -> (i32, i32) {
    %c0_i32 = arith.constant 0 : i32
    %c0_i32_0 = arith.constant 0 : i32
    %c0_i32_1 = arith.constant 0 : i32
    return %c0_i32, %c0_i32_0 : i32, i32
  }
  func.func @transform_4(%arg0: i32) -> (i32, i32) {
    %c0_i32 = arith.constant 0 : i32
    %c0_i32_0 = arith.constant 0 : i32
    %c0_i32_1 = arith.constant 0 : i32
    return %c0_i32, %c0_i32_0 : i32, i32
  }
  func.func @transform_5(%arg0: i32) -> (i32, i32) {
    %c0_i32 = arith.constant 0 : i32
    %c0_i32_0 = arith.constant 0 : i32
    %c0_i32_1 = arith.constant 0 : i32
    return %c0_i32, %c0_i32_0 : i32, i32
  }
  func.func @transform_6(%arg0: i32) -> (i32, i32, i32) {
    %c0_i32 = arith.constant 0 : i32
    %c0_i32_0 = arith.constant 0 : i32
    %c0_i32_1 = arith.constant 0 : i32
    return %arg0, %c0_i32, %c0_i32_0 : i32, i32, i32
  }
}

module attributes {stable_mosaic.version = 11 : i64} {
  func.func @_fused_attn_kernel(%arg0: i32, %arg1: memref<1x2x32xf32, #tpu.memory_space<vmem>>, %arg2: memref<1x32xf32, #tpu.memory_space<vmem>>, %arg3: memref<1x32xf32, #tpu.memory_space<vmem>>, %arg4: memref<32x96xbf16, #tpu.memory_space<vmem>>, %arg5: memref<32x32xbf16, #tpu.memory_space<vmem>>, %arg6: memref<1x32xf32, #tpu.memory_space<vmem>>, %arg7: memref<1x2x32xf32, #tpu.memory_space<vmem>>, %arg8: memref<2x32xf32, #tpu.memory_space<vmem>>) attributes {dimension_semantics = [#tpu.dimension_semantics<parallel>], iteration_bounds = array<i64: 8>, scalar_prefetch = 0 : i64, scratch_operands = 1 : i64, tpu.core_type = #tpu.core_type<tc>, window_params = [{transform_indices = @transform_0, window_bounds = array<i64: 1, 2, 32>}, {pipeline_mode = #tpu.pipeline_mode<synchronous>, transform_indices = @transform_1, window_bounds = array<i64: 1, 32>}, {pipeline_mode = #tpu.pipeline_mode<synchronous>, transform_indices = @transform_2, window_bounds = array<i64: 1, 32>}, {pipeline_mode = #tpu.pipeline_mode<synchronous>, transform_indices = @transform_3, window_bounds = array<i64: 32, 96>}, {pipeline_mode = #tpu.pipeline_mode<synchronous>, transform_indices = @transform_4, window_bounds = array<i64: 32, 32>}, {pipeline_mode = #tpu.pipeline_mode<synchronous>, transform_indices = @transform_5, window_bounds = array<i64: 1, 32>}, {transform_indices = @transform_6, window_bounds = array<i64: 1, 2, 32>}]} {
    %c0 = arith.constant 0 : index
    %c0_0 = arith.constant 0 : index
    %c0_1 = arith.constant 0 : index
    %0 = vector.load %arg1[%c0, %c0_0, %c0_1] : memref<1x2x32xf32, #tpu.memory_space<vmem>>, vector<1x2x32xf32>
    %1 = vector.shape_cast %0 : vector<1x2x32xf32> to vector<2x32xf32>
    %c0_2 = arith.constant 0 : index
    %c0_3 = arith.constant 0 : index
    %2 = vector.load %arg2[%c0_2, %c0_3] : memref<1x32xf32, #tpu.memory_space<vmem>>, vector<1x32xf32>
    %c0_4 = arith.constant 0 : index
    %c0_5 = arith.constant 0 : index
    %3 = vector.load %arg3[%c0_4, %c0_5] : memref<1x32xf32, #tpu.memory_space<vmem>>, vector<1x32xf32>
    %cst = arith.constant dense<0.000000e+00> : vector<2xf32>
    %4 = vector.multi_reduction <add>, %1, %cst [1] : vector<2x32xf32> to vector<2xf32>
    %5 = vector.shape_cast %4 : vector<2xf32> to vector<2x1xf32>
    %cst_6 = arith.constant 3.200000e+01 : f32
    %6 = vector.broadcast %cst_6 : f32 to vector<2x1xf32>
    %7 = arith.divf %5, %6 : vector<2x1xf32>
    %8 = vector.broadcast %7 : vector<2x1xf32> to vector<2x32xf32>
    %9 = arith.subf %1, %8 : vector<2x32xf32>
    %10 = arith.mulf %9, %9 : vector<2x32xf32>
    %cst_7 = arith.constant dense<0.000000e+00> : vector<2xf32>
    %11 = vector.multi_reduction <add>, %10, %cst_7 [1] : vector<2x32xf32> to vector<2xf32>
    %12 = vector.shape_cast %11 : vector<2xf32> to vector<2x1xf32>
    %cst_8 = arith.constant 3.200000e+01 : f32
    %13 = vector.broadcast %cst_8 : f32 to vector<2x1xf32>
    %14 = arith.divf %12, %13 : vector<2x1xf32>
    %15 = vector.broadcast %7 : vector<2x1xf32> to vector<2x32xf32>
    %16 = arith.subf %1, %15 : vector<2x32xf32>
    %cst_9 = arith.constant 9.99999974E-6 : f32
    %17 = vector.broadcast %cst_9 : f32 to vector<2x1xf32>
    %18 = arith.addf %14, %17 : vector<2x1xf32>
    %19 = math.rsqrt %18 : vector<2x1xf32>
    %20 = vector.broadcast %19 : vector<2x1xf32> to vector<2x32xf32>
    %21 = arith.mulf %16, %20 : vector<2x32xf32>
    %22 = vector.broadcast %2 : vector<1x32xf32> to vector<2x32xf32>
    %23 = arith.mulf %21, %22 : vector<2x32xf32>
    %24 = vector.broadcast %3 : vector<1x32xf32> to vector<2x32xf32>
    %25 = arith.addf %23, %24 : vector<2x32xf32>
    %26 = arith.truncf %25 : vector<2x32xf32> to vector<2x32xbf16>
    %c0_10 = arith.constant 0 : index
    %c0_11 = arith.constant 0 : index
    %27 = vector.load %arg4[%c0_10, %c0_11] : memref<32x96xbf16, #tpu.memory_space<vmem>>, vector<32x96xbf16>
    %cst_12 = arith.constant dense<0.000000e+00> : vector<2x96xf32>
    %28 = tpu.matmul %26, %27, %cst_12 {dimension_numbers = #tpu.dot_dimension_numbers<[1], [0], [0], [1], [0, 0, 1, 1], [], []>} : vector<2x32xbf16>, vector<32x96xbf16>, vector<2x96xf32> -> vector<2x96xf32>
    %29 = arith.truncf %28 : vector<2x96xf32> to vector<2x96xbf16>
    %30 = vector.extract_strided_slice %29 {offsets = [0, 0], sizes = [2, 8], strides = [1, 1]} : vector<2x96xbf16> to vector<2x8xbf16>
    %31 = vector.extract_strided_slice %29 {offsets = [0, 32], sizes = [2, 8], strides = [1, 1]} : vector<2x96xbf16> to vector<2x8xbf16>
    %32 = vector.extract_strided_slice %29 {offsets = [0, 64], sizes = [2, 8], strides = [1, 1]} : vector<2x96xbf16> to vector<2x8xbf16>
    %cst_13 = arith.constant dense<0.000000e+00> : vector<2x2xf32>
    %33 = tpu.matmul %30, %31, %cst_13 {dimension_numbers = #tpu.dot_dimension_numbers<[1], [1], [0], [0], [0, 0, 1, 0], [], []>} : vector<2x8xbf16>, vector<2x8xbf16>, vector<2x2xf32> -> vector<2x2xf32>
    %cst_14 = arith.constant dense<0xFF800000> : vector<2xf32>
    %34 = vector.multi_reduction <maximumf>, %33, %cst_14 [1] : vector<2x2xf32> to vector<2xf32>
    %35 = vector.shape_cast %34 : vector<2xf32> to vector<2x1xf32>
    %36 = vector.broadcast %35 : vector<2x1xf32> to vector<2x2xf32>
    %37 = arith.subf %33, %36 : vector<2x2xf32>
    %38 = math.exp %37 : vector<2x2xf32>
    %cst_15 = arith.constant dense<0.000000e+00> : vector<2xf32>
    %39 = vector.multi_reduction <add>, %38, %cst_15 [1] : vector<2x2xf32> to vector<2xf32>
    %40 = vector.shape_cast %39 : vector<2xf32> to vector<2x1xf32>
    %41 = tpu.reciprocal %40 {approx = true} : vector<2x1xf32> -> vector<2x1xf32>
    %42 = vector.broadcast %41 : vector<2x1xf32> to vector<2x2xf32>
    %43 = arith.mulf %38, %42 : vector<2x2xf32>
    %44 = arith.truncf %43 : vector<2x2xf32> to vector<2x2xbf16>
    %cst_16 = arith.constant dense<0.000000e+00> : vector<2x8xf32>
    %45 = tpu.matmul %44, %32, %cst_16 {dimension_numbers = #tpu.dot_dimension_numbers<[1], [0], [0], [1], [0, 0, 1, 1], [], []>} : vector<2x2xbf16>, vector<2x8xbf16>, vector<2x8xf32> -> vector<2x8xf32>
    %c0_17 = arith.constant 0 : index
    %c0_18 = arith.constant 0 : index
    %46 = vector.load %arg8[%c0_17, %c0_18] : memref<2x32xf32, #tpu.memory_space<vmem>>, vector<2x8xf32>
    tpu.vector_store %arg8[%c0_17, %c0_18], %45 {strides = array<i32>} : memref<2x32xf32, #tpu.memory_space<vmem>>, vector<2x8xf32>,
    %47 = vector.extract_strided_slice %29 {offsets = [0, 8], sizes = [2, 8], strides = [1, 1]} : vector<2x96xbf16> to vector<2x8xbf16>
    %48 = vector.extract_strided_slice %29 {offsets = [0, 40], sizes = [2, 8], strides = [1, 1]} : vector<2x96xbf16> to vector<2x8xbf16>
    %49 = vector.extract_strided_slice %29 {offsets = [0, 72], sizes = [2, 8], strides = [1, 1]} : vector<2x96xbf16> to vector<2x8xbf16>
    %cst_19 = arith.constant dense<0.000000e+00> : vector<2x2xf32>
    %50 = tpu.matmul %47, %48, %cst_19 {dimension_numbers = #tpu.dot_dimension_numbers<[1], [1], [0], [0], [0, 0, 1, 0], [], []>} : vector<2x8xbf16>, vector<2x8xbf16>, vector<2x2xf32> -> vector<2x2xf32>
    %cst_20 = arith.constant dense<0xFF800000> : vector<2xf32>
    %51 = vector.multi_reduction <maximumf>, %50, %cst_20 [1] : vector<2x2xf32> to vector<2xf32>
    %52 = vector.shape_cast %51 : vector<2xf32> to vector<2x1xf32>
    %53 = vector.broadcast %52 : vector<2x1xf32> to vector<2x2xf32>
    %54 = arith.subf %50, %53 : vector<2x2xf32>
    %55 = math.exp %54 : vector<2x2xf32>
    %cst_21 = arith.constant dense<0.000000e+00> : vector<2xf32>
    %56 = vector.multi_reduction <add>, %55, %cst_21 [1] : vector<2x2xf32> to vector<2xf32>
    %57 = vector.shape_cast %56 : vector<2xf32> to vector<2x1xf32>
    %58 = tpu.reciprocal %57 {approx = true} : vector<2x1xf32> -> vector<2x1xf32>
    %59 = vector.broadcast %58 : vector<2x1xf32> to vector<2x2xf32>
    %60 = arith.mulf %55, %59 : vector<2x2xf32>
    %61 = arith.truncf %60 : vector<2x2xf32> to vector<2x2xbf16>
    %cst_22 = arith.constant dense<0.000000e+00> : vector<2x8xf32>
    %62 = tpu.matmul %61, %49, %cst_22 {dimension_numbers = #tpu.dot_dimension_numbers<[1], [0], [0], [1], [0, 0, 1, 1], [], []>} : vector<2x2xbf16>, vector<2x8xbf16>, vector<2x8xf32> -> vector<2x8xf32>
    %c0_23 = arith.constant 0 : index
    %c8 = arith.constant 8 : index
    %63 = vector.load %arg8[%c0_23, %c8] : memref<2x32xf32, #tpu.memory_space<vmem>>, vector<2x8xf32>
    tpu.vector_store %arg8[%c0_23, %c8], %62 {strides = array<i32>} : memref<2x32xf32, #tpu.memory_space<vmem>>, vector<2x8xf32>,
    %64 = vector.extract_strided_slice %29 {offsets = [0, 16], sizes = [2, 8], strides = [1, 1]} : vector<2x96xbf16> to vector<2x8xbf16>
    %65 = vector.extract_strided_slice %29 {offsets = [0, 48], sizes = [2, 8], strides = [1, 1]} : vector<2x96xbf16> to vector<2x8xbf16>
    %66 = vector.extract_strided_slice %29 {offsets = [0, 80], sizes = [2, 8], strides = [1, 1]} : vector<2x96xbf16> to vector<2x8xbf16>
    %cst_24 = arith.constant dense<0.000000e+00> : vector<2x2xf32>
    %67 = tpu.matmul %64, %65, %cst_24 {dimension_numbers = #tpu.dot_dimension_numbers<[1], [1], [0], [0], [0, 0, 1, 0], [], []>} : vector<2x8xbf16>, vector<2x8xbf16>, vector<2x2xf32> -> vector<2x2xf32>
    %cst_25 = arith.constant dense<0xFF800000> : vector<2xf32>
    %68 = vector.multi_reduction <maximumf>, %67, %cst_25 [1] : vector<2x2xf32> to vector<2xf32>
    %69 = vector.shape_cast %68 : vector<2xf32> to vector<2x1xf32>
    %70 = vector.broadcast %69 : vector<2x1xf32> to vector<2x2xf32>
    %71 = arith.subf %67, %70 : vector<2x2xf32>
    %72 = math.exp %71 : vector<2x2xf32>
    %cst_26 = arith.constant dense<0.000000e+00> : vector<2xf32>
    %73 = vector.multi_reduction <add>, %72, %cst_26 [1] : vector<2x2xf32> to vector<2xf32>
    %74 = vector.shape_cast %73 : vector<2xf32> to vector<2x1xf32>
    %75 = tpu.reciprocal %74 {approx = true} : vector<2x1xf32> -> vector<2x1xf32>
    %76 = vector.broadcast %75 : vector<2x1xf32> to vector<2x2xf32>
    %77 = arith.mulf %72, %76 : vector<2x2xf32>
    %78 = arith.truncf %77 : vector<2x2xf32> to vector<2x2xbf16>
    %cst_27 = arith.constant dense<0.000000e+00> : vector<2x8xf32>
    %79 = tpu.matmul %78, %66, %cst_27 {dimension_numbers = #tpu.dot_dimension_numbers<[1], [0], [0], [1], [0, 0, 1, 1], [], []>} : vector<2x2xbf16>, vector<2x8xbf16>, vector<2x8xf32> -> vector<2x8xf32>
    %c0_28 = arith.constant 0 : index
    %c16 = arith.constant 16 : index
    %80 = vector.load %arg8[%c0_28, %c16] : memref<2x32xf32, #tpu.memory_space<vmem>>, vector<2x8xf32>
    tpu.vector_store %arg8[%c0_28, %c16], %79 {strides = array<i32>} : memref<2x32xf32, #tpu.memory_space<vmem>>, vector<2x8xf32>,
    %81 = vector.extract_strided_slice %29 {offsets = [0, 24], sizes = [2, 8], strides = [1, 1]} : vector<2x96xbf16> to vector<2x8xbf16>
    %82 = vector.extract_strided_slice %29 {offsets = [0, 56], sizes = [2, 8], strides = [1, 1]} : vector<2x96xbf16> to vector<2x8xbf16>
    %83 = vector.extract_strided_slice %29 {offsets = [0, 88], sizes = [2, 8], strides = [1, 1]} : vector<2x96xbf16> to vector<2x8xbf16>
    %cst_29 = arith.constant dense<0.000000e+00> : vector<2x2xf32>
    %84 = tpu.matmul %81, %82, %cst_29 {dimension_numbers = #tpu.dot_dimension_numbers<[1], [1], [0], [0], [0, 0, 1, 0], [], []>} : vector<2x8xbf16>, vector<2x8xbf16>, vector<2x2xf32> -> vector<2x2xf32>
    %cst_30 = arith.constant dense<0xFF800000> : vector<2xf32>
    %85 = vector.multi_reduction <maximumf>, %84, %cst_30 [1] : vector<2x2xf32> to vector<2xf32>
    %86 = vector.shape_cast %85 : vector<2xf32> to vector<2x1xf32>
    %87 = vector.broadcast %86 : vector<2x1xf32> to vector<2x2xf32>
    %88 = arith.subf %84, %87 : vector<2x2xf32>
    %89 = math.exp %88 : vector<2x2xf32>
    %cst_31 = arith.constant dense<0.000000e+00> : vector<2xf32>
    %90 = vector.multi_reduction <add>, %89, %cst_31 [1] : vector<2x2xf32> to vector<2xf32>
    %91 = vector.shape_cast %90 : vector<2xf32> to vector<2x1xf32>
    %92 = tpu.reciprocal %91 {approx = true} : vector<2x1xf32> -> vector<2x1xf32>
    %93 = vector.broadcast %92 : vector<2x1xf32> to vector<2x2xf32>
    %94 = arith.mulf %89, %93 : vector<2x2xf32>
    %95 = arith.truncf %94 : vector<2x2xf32> to vector<2x2xbf16>
    %cst_32 = arith.constant dense<0.000000e+00> : vector<2x8xf32>
    %96 = tpu.matmul %95, %83, %cst_32 {dimension_numbers = #tpu.dot_dimension_numbers<[1], [0], [0], [1], [0, 0, 1, 1], [], []>} : vector<2x2xbf16>, vector<2x8xbf16>, vector<2x8xf32> -> vector<2x8xf32>
    %c0_33 = arith.constant 0 : index
    %c24 = arith.constant 24 : index
    %97 = vector.load %arg8[%c0_33, %c24] : memref<2x32xf32, #tpu.memory_space<vmem>>, vector<2x8xf32>
    tpu.vector_store %arg8[%c0_33, %c24], %96 {strides = array<i32>} : memref<2x32xf32, #tpu.memory_space<vmem>>, vector<2x8xf32>,
    %c0_34 = arith.constant 0 : index
    %c0_35 = arith.constant 0 : index
    %98 = vector.load %arg8[%c0_34, %c0_35] : memref<2x32xf32, #tpu.memory_space<vmem>>, vector<2x32xf32>
    %99 = arith.truncf %98 : vector<2x32xf32> to vector<2x32xbf16>
    %c0_36 = arith.constant 0 : index
    %c0_37 = arith.constant 0 : index
    %100 = vector.load %arg5[%c0_36, %c0_37] : memref<32x32xbf16, #tpu.memory_space<vmem>>, vector<32x32xbf16>
    %cst_38 = arith.constant dense<0.000000e+00> : vector<2x32xf32>
    %101 = tpu.matmul %99, %100, %cst_38 {dimension_numbers = #tpu.dot_dimension_numbers<[1], [0], [0], [1], [0, 0, 1, 1], [], []>} : vector<2x32xbf16>, vector<32x32xbf16>, vector<2x32xf32> -> vector<2x32xf32>
    %c0_39 = arith.constant 0 : index
    %c0_40 = arith.constant 0 : index
    %102 = vector.load %arg6[%c0_39, %c0_40] : memref<1x32xf32, #tpu.memory_space<vmem>>, vector<1x32xf32>
    %103 = vector.broadcast %102 : vector<1x32xf32> to vector<2x32xf32>
    %104 = arith.addf %101, %103 : vector<2x32xf32>
    %105 = arith.addf %1, %104 : vector<2x32xf32>
    %c0_41 = arith.constant 0 : index
    %c0_42 = arith.constant 0 : index
    %c0_43 = arith.constant 0 : index
    %106 = vector.load %arg7[%c0_41, %c0_42, %c0_43] : memref<1x2x32xf32, #tpu.memory_space<vmem>>, vector<1x2x32xf32>
    %107 = vector.shape_cast %106 : vector<1x2x32xf32> to vector<2x32xf32>
    %108 = vector.shape_cast %105 : vector<2x32xf32> to vector<1x2x32xf32>
    tpu.vector_store %arg7[%c0_41, %c0_42, %c0_43], %108 {strides = array<i32>} : memref<1x2x32xf32, #tpu.memory_space<vmem>>, vector<1x2x32xf32>,
    return
  }
  func.func @transform_0(%arg0: i32) -> (i32, i32, i32) {
    %c0_i32 = arith.constant 0 : i32
    %c0_i32_0 = arith.constant 0 : i32
    %c0_i32_1 = arith.constant 0 : i32
    return %arg0, %c0_i32, %c0_i32_0 : i32, i32, i32
  }
  func.func @transform_1(%arg0: i32) -> (i32, i32) {
    %c0_i32 = arith.constant 0 : i32
    %c0_i32_0 = arith.constant 0 : i32
    %c0_i32_1 = arith.constant 0 : i32
    return %c0_i32, %c0_i32_0 : i32, i32
  }
  func.func @transform_2(%arg0: i32) -> (i32, i32) {
    %c0_i32 = arith.constant 0 : i32
    %c0_i32_0 = arith.constant 0 : i32
    %c0_i32_1 = arith.constant 0 : i32
    return %c0_i32, %c0_i32_0 : i32, i32
  }
  func.func @transform_3(%arg0: i32) -> (i32, i32) {
    %c0_i32 = arith.constant 0 : i32
    %c0_i32_0 = arith.constant 0 : i32
    %c0_i32_1 = arith.constant 0 : i32
    return %c0_i32, %c0_i32_0 : i32, i32
  }
  func.func @transform_4(%arg0: i32) -> (i32, i32) {
    %c0_i32 = arith.constant 0 : i32
    %c0_i32_0 = arith.constant 0 : i32
    %c0_i32_1 = arith.constant 0 : i32
    return %c0_i32, %c0_i32_0 : i32, i32
  }
  func.func @transform_5(%arg0: i32) -> (i32, i32) {
    %c0_i32 = arith.constant 0 : i32
    %c0_i32_0 = arith.constant 0 : i32
    %c0_i32_1 = arith.constant 0 : i32
    return %c0_i32, %c0_i32_0 : i32, i32
  }
  func.func @transform_6(%arg0: i32) -> (i32, i32, i32) {
    %c0_i32 = arith.constant 0 : i32
    %c0_i32_0 = arith.constant 0 : i32
    %c0_i32_1 = arith.constant 0 : i32
    return %arg0, %c0_i32, %c0_i32_0 : i32, i32, i32
  }
}

module attributes {stable_mosaic.version = 11 : i64} {
  func.func @_prenorm_ffn_kernel(%arg0: i32, %arg1: memref<8x32xf32, #tpu.memory_space<vmem>>, %arg2: memref<1x32xf32, #tpu.memory_space<vmem>>, %arg3: memref<1x32xf32, #tpu.memory_space<vmem>>, %arg4: memref<32x64xbf16, #tpu.memory_space<vmem>>, %arg5: memref<1x64xf32, #tpu.memory_space<vmem>>, %arg6: memref<64x32xbf16, #tpu.memory_space<vmem>>, %arg7: memref<1x32xf32, #tpu.memory_space<vmem>>, %arg8: memref<8x32xf32, #tpu.memory_space<vmem>>) attributes {dimension_semantics = [#tpu.dimension_semantics<parallel>], iteration_bounds = array<i64: 2>, scalar_prefetch = 0 : i64, scratch_operands = 0 : i64, tpu.core_type = #tpu.core_type<tc>, window_params = [{transform_indices = @transform_0, window_bounds = array<i64: 8, 32>}, {pipeline_mode = #tpu.pipeline_mode<synchronous>, transform_indices = @transform_1, window_bounds = array<i64: 1, 32>}, {pipeline_mode = #tpu.pipeline_mode<synchronous>, transform_indices = @transform_2, window_bounds = array<i64: 1, 32>}, {pipeline_mode = #tpu.pipeline_mode<synchronous>, transform_indices = @transform_3, window_bounds = array<i64: 32, 64>}, {pipeline_mode = #tpu.pipeline_mode<synchronous>, transform_indices = @transform_4, window_bounds = array<i64: 1, 64>}, {pipeline_mode = #tpu.pipeline_mode<synchronous>, transform_indices = @transform_5, window_bounds = array<i64: 64, 32>}, {pipeline_mode = #tpu.pipeline_mode<synchronous>, transform_indices = @transform_6, window_bounds = array<i64: 1, 32>}, {transform_indices = @transform_7, window_bounds = array<i64: 8, 32>}]} {
    %c0 = arith.constant 0 : index
    %c0_0 = arith.constant 0 : index
    %0 = vector.load %arg1[%c0, %c0_0] : memref<8x32xf32, #tpu.memory_space<vmem>>, vector<8x32xf32>
    %c0_1 = arith.constant 0 : index
    %c0_2 = arith.constant 0 : index
    %1 = vector.load %arg2[%c0_1, %c0_2] : memref<1x32xf32, #tpu.memory_space<vmem>>, vector<1x32xf32>
    %c0_3 = arith.constant 0 : index
    %c0_4 = arith.constant 0 : index
    %2 = vector.load %arg3[%c0_3, %c0_4] : memref<1x32xf32, #tpu.memory_space<vmem>>, vector<1x32xf32>
    %cst = arith.constant dense<0.000000e+00> : vector<8xf32>
    %3 = vector.multi_reduction <add>, %0, %cst [1] : vector<8x32xf32> to vector<8xf32>
    %4 = vector.shape_cast %3 : vector<8xf32> to vector<8x1xf32>
    %cst_5 = arith.constant 3.200000e+01 : f32
    %5 = vector.broadcast %cst_5 : f32 to vector<8x1xf32>
    %6 = arith.divf %4, %5 : vector<8x1xf32>
    %7 = vector.broadcast %6 : vector<8x1xf32> to vector<8x32xf32>
    %8 = arith.subf %0, %7 : vector<8x32xf32>
    %9 = arith.mulf %8, %8 : vector<8x32xf32>
    %cst_6 = arith.constant dense<0.000000e+00> : vector<8xf32>
    %10 = vector.multi_reduction <add>, %9, %cst_6 [1] : vector<8x32xf32> to vector<8xf32>
    %11 = vector.shape_cast %10 : vector<8xf32> to vector<8x1xf32>
    %cst_7 = arith.constant 3.200000e+01 : f32
    %12 = vector.broadcast %cst_7 : f32 to vector<8x1xf32>
    %13 = arith.divf %11, %12 : vector<8x1xf32>
    %14 = vector.broadcast %6 : vector<8x1xf32> to vector<8x32xf32>
    %15 = arith.subf %0, %14 : vector<8x32xf32>
    %cst_8 = arith.constant 9.99999974E-6 : f32
    %16 = vector.broadcast %cst_8 : f32 to vector<8x1xf32>
    %17 = arith.addf %13, %16 : vector<8x1xf32>
    %18 = math.rsqrt %17 : vector<8x1xf32>
    %19 = vector.broadcast %18 : vector<8x1xf32> to vector<8x32xf32>
    %20 = arith.mulf %15, %19 : vector<8x32xf32>
    %21 = vector.broadcast %1 : vector<1x32xf32> to vector<8x32xf32>
    %22 = arith.mulf %20, %21 : vector<8x32xf32>
    %23 = vector.broadcast %2 : vector<1x32xf32> to vector<8x32xf32>
    %24 = arith.addf %22, %23 : vector<8x32xf32>
    %25 = arith.truncf %24 : vector<8x32xf32> to vector<8x32xbf16>
    %c0_9 = arith.constant 0 : index
    %c0_10 = arith.constant 0 : index
    %26 = vector.load %arg4[%c0_9, %c0_10] : memref<32x64xbf16, #tpu.memory_space<vmem>>, vector<32x64xbf16>
    %cst_11 = arith.constant dense<0.000000e+00> : vector<8x64xf32>
    %27 = tpu.matmul %25, %26, %cst_11 {dimension_numbers = #tpu.dot_dimension_numbers<[1], [0], [0], [1], [0, 0, 1, 1], [], []>} : vector<8x32xbf16>, vector<32x64xbf16>, vector<8x64xf32> -> vector<8x64xf32>
    %c0_12 = arith.constant 0 : index
    %c0_13 = arith.constant 0 : index
    %28 = vector.load %arg5[%c0_12, %c0_13] : memref<1x64xf32, #tpu.memory_space<vmem>>, vector<1x64xf32>
    %29 = vector.broadcast %28 : vector<1x64xf32> to vector<8x64xf32>
    %30 = arith.addf %27, %29 : vector<8x64xf32>
    %cst_14 = arith.constant 5.000000e-01 : f32
    %31 = vector.broadcast %cst_14 : f32 to vector<8x64xf32>
    %32 = arith.mulf %31, %30 : vector<8x64xf32>
    %cst_15 = arith.constant 0.707106769 : f32
    %33 = vector.broadcast %cst_15 : f32 to vector<8x64xf32>
    %34 = arith.mulf %30, %33 : vector<8x64xf32>
    %35 = math.erf %34 : vector<8x64xf32>
    %cst_16 = arith.constant 1.000000e+00 : f32
    %36 = vector.broadcast %cst_16 : f32 to vector<8x64xf32>
    %37 = arith.addf %36, %35 : vector<8x64xf32>
    %38 = arith.mulf %32, %37 : vector<8x64xf32>
    %39 = arith.truncf %38 : vector<8x64xf32> to vector<8x64xbf16>
    %c0_17 = arith.constant 0 : index
    %c0_18 = arith.constant 0 : index
    %40 = vector.load %arg6[%c0_17, %c0_18] : memref<64x32xbf16, #tpu.memory_space<vmem>>, vector<64x32xbf16>
    %cst_19 = arith.constant dense<0.000000e+00> : vector<8x32xf32>
    %41 = tpu.matmul %39, %40, %cst_19 {dimension_numbers = #tpu.dot_dimension_numbers<[1], [0], [0], [1], [0, 0, 1, 1], [], []>} : vector<8x64xbf16>, vector<64x32xbf16>, vector<8x32xf32> -> vector<8x32xf32>
    %c0_20 = arith.constant 0 : index
    %c0_21 = arith.constant 0 : index
    %42 = vector.load %arg7[%c0_20, %c0_21] : memref<1x32xf32, #tpu.memory_space<vmem>>, vector<1x32xf32>
    %43 = vector.broadcast %42 : vector<1x32xf32> to vector<8x32xf32>
    %44 = arith.addf %41, %43 : vector<8x32xf32>
    %45 = arith.addf %0, %44 : vector<8x32xf32>
    %c0_22 = arith.constant 0 : index
    %c0_23 = arith.constant 0 : index
    %46 = vector.load %arg8[%c0_22, %c0_23] : memref<8x32xf32, #tpu.memory_space<vmem>>, vector<8x32xf32>
    tpu.vector_store %arg8[%c0_22, %c0_23], %45 {strides = array<i32>} : memref<8x32xf32, #tpu.memory_space<vmem>>, vector<8x32xf32>,
    return
  }
  func.func @transform_0(%arg0: i32) -> (i32, i32) {
    %c0_i32 = arith.constant 0 : i32
    %c0_i32_0 = arith.constant 0 : i32
    return %arg0, %c0_i32 : i32, i32
  }
  func.func @transform_1(%arg0: i32) -> (i32, i32) {
    %c0_i32 = arith.constant 0 : i32
    %c0_i32_0 = arith.constant 0 : i32
    %c0_i32_1 = arith.constant 0 : i32
    return %c0_i32, %c0_i32_0 : i32, i32
  }
  func.func @transform_2(%arg0: i32) -> (i32, i32) {
    %c0_i32 = arith.constant 0 : i32
    %c0_i32_0 = arith.constant 0 : i32
    %c0_i32_1 = arith.constant 0 : i32
    return %c0_i32, %c0_i32_0 : i32, i32
  }
  func.func @transform_3(%arg0: i32) -> (i32, i32) {
    %c0_i32 = arith.constant 0 : i32
    %c0_i32_0 = arith.constant 0 : i32
    %c0_i32_1 = arith.constant 0 : i32
    return %c0_i32, %c0_i32_0 : i32, i32
  }
  func.func @transform_4(%arg0: i32) -> (i32, i32) {
    %c0_i32 = arith.constant 0 : i32
    %c0_i32_0 = arith.constant 0 : i32
    %c0_i32_1 = arith.constant 0 : i32
    return %c0_i32, %c0_i32_0 : i32, i32
  }
  func.func @transform_5(%arg0: i32) -> (i32, i32) {
    %c0_i32 = arith.constant 0 : i32
    %c0_i32_0 = arith.constant 0 : i32
    %c0_i32_1 = arith.constant 0 : i32
    return %c0_i32, %c0_i32_0 : i32, i32
  }
  func.func @transform_6(%arg0: i32) -> (i32, i32) {
    %c0_i32 = arith.constant 0 : i32
    %c0_i32_0 = arith.constant 0 : i32
    %c0_i32_1 = arith.constant 0 : i32
    return %c0_i32, %c0_i32_0 : i32, i32
  }
  func.func @transform_7(%arg0: i32) -> (i32, i32) {
    %c0_i32 = arith.constant 0 : i32
    %c0_i32_0 = arith.constant 0 : i32
    return %arg0, %c0_i32 : i32, i32
  }
}

module attributes {stable_mosaic.version = 11 : i64} {
  func.func @_cross_attn_kernel(%arg0: i32, %arg1: memref<1x4x32xf32, #tpu.memory_space<vmem>>, %arg2: memref<1x4x32xf32, #tpu.memory_space<vmem>>, %arg3: memref<32x32xbf16, #tpu.memory_space<vmem>>, %arg4: memref<1x32xf32, #tpu.memory_space<vmem>>, %arg5: memref<32x64xbf16, #tpu.memory_space<vmem>>, %arg6: memref<1x64xf32, #tpu.memory_space<vmem>>, %arg7: memref<32x32xbf16, #tpu.memory_space<vmem>>, %arg8: memref<1x32xf32, #tpu.memory_space<vmem>>, %arg9: memref<1x32xf32, #tpu.memory_space<vmem>>, %arg10: memref<1x32xf32, #tpu.memory_space<vmem>>, %arg11: memref<1x4x32xf32, #tpu.memory_space<vmem>>, %arg12: memref<4x32xf32, #tpu.memory_space<vmem>>) attributes {dimension_semantics = [#tpu.dimension_semantics<parallel>], iteration_bounds = array<i64: 4>, scalar_prefetch = 0 : i64, scratch_operands = 1 : i64, tpu.core_type = #tpu.core_type<tc>, window_params = [{transform_indices = @transform_0, window_bounds = array<i64: 1, 4, 32>}, {transform_indices = @transform_1, window_bounds = array<i64: 1, 4, 32>}, {pipeline_mode = #tpu.pipeline_mode<synchronous>, transform_indices = @transform_2, window_bounds = array<i64: 32, 32>}, {pipeline_mode = #tpu.pipeline_mode<synchronous>, transform_indices = @transform_3, window_bounds = array<i64: 1, 32>}, {pipeline_mode = #tpu.pipeline_mode<synchronous>, transform_indices = @transform_4, window_bounds = array<i64: 32, 64>}, {pipeline_mode = #tpu.pipeline_mode<synchronous>, transform_indices = @transform_5, window_bounds = array<i64: 1, 64>}, {pipeline_mode = #tpu.pipeline_mode<synchronous>, transform_indices = @transform_6, window_bounds = array<i64: 32, 32>}, {pipeline_mode = #tpu.pipeline_mode<synchronous>, transform_indices = @transform_7, window_bounds = array<i64: 1, 32>}, {pipeline_mode = #tpu.pipeline_mode<synchronous>, transform_indices = @transform_8, window_bounds = array<i64: 1, 32>}, {pipeline_mode = #tpu.pipeline_mode<synchronous>, transform_indices = @transform_9, window_bounds = array<i64: 1, 32>}, {transform_indices = @transform_10, window_bounds = array<i64: 1, 4, 32>}]} {
    %c0 = arith.constant 0 : index
    %c0_0 = arith.constant 0 : index
    %c0_1 = arith.constant 0 : index
    %0 = vector.load %arg1[%c0, %c0_0, %c0_1] : memref<1x4x32xf32, #tpu.memory_space<vmem>>, vector<1x4x32xf32>
    %1 = vector.shape_cast %0 : vector<1x4x32xf32> to vector<4x32xf32>
    %c0_2 = arith.constant 0 : index
    %c0_3 = arith.constant 0 : index
    %c0_4 = arith.constant 0 : index
    %2 = vector.load %arg2[%c0_2, %c0_3, %c0_4] : memref<1x4x32xf32, #tpu.memory_space<vmem>>, vector<1x4x32xf32>
    %3 = vector.shape_cast %2 : vector<1x4x32xf32> to vector<4x32xf32>
    %4 = arith.truncf %1 : vector<4x32xf32> to vector<4x32xbf16>
    %c0_5 = arith.constant 0 : index
    %c0_6 = arith.constant 0 : index
    %5 = vector.load %arg3[%c0_5, %c0_6] : memref<32x32xbf16, #tpu.memory_space<vmem>>, vector<32x32xbf16>
    %cst = arith.constant dense<0.000000e+00> : vector<4x32xf32>
    %6 = tpu.matmul %4, %5, %cst {dimension_numbers = #tpu.dot_dimension_numbers<[1], [0], [0], [1], [0, 0, 1, 1], [], []>} : vector<4x32xbf16>, vector<32x32xbf16>, vector<4x32xf32> -> vector<4x32xf32>
    %c0_7 = arith.constant 0 : index
    %c0_8 = arith.constant 0 : index
    %7 = vector.load %arg4[%c0_7, %c0_8] : memref<1x32xf32, #tpu.memory_space<vmem>>, vector<1x32xf32>
    %8 = vector.broadcast %7 : vector<1x32xf32> to vector<4x32xf32>
    %9 = arith.addf %6, %8 : vector<4x32xf32>
    %10 = arith.truncf %3 : vector<4x32xf32> to vector<4x32xbf16>
    %c0_9 = arith.constant 0 : index
    %c0_10 = arith.constant 0 : index
    %11 = vector.load %arg5[%c0_9, %c0_10] : memref<32x64xbf16, #tpu.memory_space<vmem>>, vector<32x64xbf16>
    %cst_11 = arith.constant dense<0.000000e+00> : vector<4x64xf32>
    %12 = tpu.matmul %10, %11, %cst_11 {dimension_numbers = #tpu.dot_dimension_numbers<[1], [0], [0], [1], [0, 0, 1, 1], [], []>} : vector<4x32xbf16>, vector<32x64xbf16>, vector<4x64xf32> -> vector<4x64xf32>
    %c0_12 = arith.constant 0 : index
    %c0_13 = arith.constant 0 : index
    %13 = vector.load %arg6[%c0_12, %c0_13] : memref<1x64xf32, #tpu.memory_space<vmem>>, vector<1x64xf32>
    %14 = vector.broadcast %13 : vector<1x64xf32> to vector<4x64xf32>
    %15 = arith.addf %12, %14 : vector<4x64xf32>
    %16 = arith.truncf %9 : vector<4x32xf32> to vector<4x32xbf16>
    %17 = arith.truncf %15 : vector<4x64xf32> to vector<4x64xbf16>
    %18 = vector.extract_strided_slice %16 {offsets = [0, 0], sizes = [4, 8], strides = [1, 1]} : vector<4x32xbf16> to vector<4x8xbf16>
    %19 = vector.extract_strided_slice %17 {offsets = [0, 0], sizes = [4, 8], strides = [1, 1]} : vector<4x64xbf16> to vector<4x8xbf16>
    %20 = vector.extract_strided_slice %17 {offsets = [0, 32], sizes = [4, 8], strides = [1, 1]} : vector<4x64xbf16> to vector<4x8xbf16>
    %cst_14 = arith.constant dense<0.000000e+00> : vector<4x4xf32>
    %21 = tpu.matmul %18, %19, %cst_14 {dimension_numbers = #tpu.dot_dimension_numbers<[1], [1], [0], [0], [0, 0, 1, 0], [], []>} : vector<4x8xbf16>, vector<4x8xbf16>, vector<4x4xf32> -> vector<4x4xf32>
    %cst_15 = arith.constant dense<0xFF800000> : vector<4xf32>
    %22 = vector.multi_reduction <maximumf>, %21, %cst_15 [1] : vector<4x4xf32> to vector<4xf32>
    %23 = vector.shape_cast %22 : vector<4xf32> to vector<4x1xf32>
    %24 = vector.broadcast %23 : vector<4x1xf32> to vector<4x4xf32>
    %25 = arith.subf %21, %24 : vector<4x4xf32>
    %26 = math.exp %25 : vector<4x4xf32>
    %cst_16 = arith.constant dense<0.000000e+00> : vector<4xf32>
    %27 = vector.multi_reduction <add>, %26, %cst_16 [1] : vector<4x4xf32> to vector<4xf32>
    %28 = vector.shape_cast %27 : vector<4xf32> to vector<4x1xf32>
    %29 = tpu.reciprocal %28 {approx = true} : vector<4x1xf32> -> vector<4x1xf32>
    %30 = vector.broadcast %29 : vector<4x1xf32> to vector<4x4xf32>
    %31 = arith.mulf %26, %30 : vector<4x4xf32>
    %32 = arith.truncf %31 : vector<4x4xf32> to vector<4x4xbf16>
    %cst_17 = arith.constant dense<0.000000e+00> : vector<4x8xf32>
    %33 = tpu.matmul %32, %20, %cst_17 {dimension_numbers = #tpu.dot_dimension_numbers<[1], [0], [0], [1], [0, 0, 1, 1], [], []>} : vector<4x4xbf16>, vector<4x8xbf16>, vector<4x8xf32> -> vector<4x8xf32>
    %c0_18 = arith.constant 0 : index
    %c0_19 = arith.constant 0 : index
    %34 = vector.load %arg12[%c0_18, %c0_19] : memref<4x32xf32, #tpu.memory_space<vmem>>, vector<4x8xf32>
    tpu.vector_store %arg12[%c0_18, %c0_19], %33 {strides = array<i32>} : memref<4x32xf32, #tpu.memory_space<vmem>>, vector<4x8xf32>,
    %35 = vector.extract_strided_slice %16 {offsets = [0, 8], sizes = [4, 8], strides = [1, 1]} : vector<4x32xbf16> to vector<4x8xbf16>
    %36 = vector.extract_strided_slice %17 {offsets = [0, 8], sizes = [4, 8], strides = [1, 1]} : vector<4x64xbf16> to vector<4x8xbf16>
    %37 = vector.extract_strided_slice %17 {offsets = [0, 40], sizes = [4, 8], strides = [1, 1]} : vector<4x64xbf16> to vector<4x8xbf16>
    %cst_20 = arith.constant dense<0.000000e+00> : vector<4x4xf32>
    %38 = tpu.matmul %35, %36, %cst_20 {dimension_numbers = #tpu.dot_dimension_numbers<[1], [1], [0], [0], [0, 0, 1, 0], [], []>} : vector<4x8xbf16>, vector<4x8xbf16>, vector<4x4xf32> -> vector<4x4xf32>
    %cst_21 = arith.constant dense<0xFF800000> : vector<4xf32>
    %39 = vector.multi_reduction <maximumf>, %38, %cst_21 [1] : vector<4x4xf32> to vector<4xf32>
    %40 = vector.shape_cast %39 : vector<4xf32> to vector<4x1xf32>
    %41 = vector.broadcast %40 : vector<4x1xf32> to vector<4x4xf32>
    %42 = arith.subf %38, %41 : vector<4x4xf32>
    %43 = math.exp %42 : vector<4x4xf32>
    %cst_22 = arith.constant dense<0.000000e+00> : vector<4xf32>
    %44 = vector.multi_reduction <add>, %43, %cst_22 [1] : vector<4x4xf32> to vector<4xf32>
    %45 = vector.shape_cast %44 : vector<4xf32> to vector<4x1xf32>
    %46 = tpu.reciprocal %45 {approx = true} : vector<4x1xf32> -> vector<4x1xf32>
    %47 = vector.broadcast %46 : vector<4x1xf32> to vector<4x4xf32>
    %48 = arith.mulf %43, %47 : vector<4x4xf32>
    %49 = arith.truncf %48 : vector<4x4xf32> to vector<4x4xbf16>
    %cst_23 = arith.constant dense<0.000000e+00> : vector<4x8xf32>
    %50 = tpu.matmul %49, %37, %cst_23 {dimension_numbers = #tpu.dot_dimension_numbers<[1], [0], [0], [1], [0, 0, 1, 1], [], []>} : vector<4x4xbf16>, vector<4x8xbf16>, vector<4x8xf32> -> vector<4x8xf32>
    %c0_24 = arith.constant 0 : index
    %c8 = arith.constant 8 : index
    %51 = vector.load %arg12[%c0_24, %c8] : memref<4x32xf32, #tpu.memory_space<vmem>>, vector<4x8xf32>
    tpu.vector_store %arg12[%c0_24, %c8], %50 {strides = array<i32>} : memref<4x32xf32, #tpu.memory_space<vmem>>, vector<4x8xf32>,
    %52 = vector.extract_strided_slice %16 {offsets = [0, 16], sizes = [4, 8], strides = [1, 1]} : vector<4x32xbf16> to vector<4x8xbf16>
    %53 = vector.extract_strided_slice %17 {offsets = [0, 16], sizes = [4, 8], strides = [1, 1]} : vector<4x64xbf16> to vector<4x8xbf16>
    %54 = vector.extract_strided_slice %17 {offsets = [0, 48], sizes = [4, 8], strides = [1, 1]} : vector<4x64xbf16> to vector<4x8xbf16>
    %cst_25 = arith.constant dense<0.000000e+00> : vector<4x4xf32>
    %55 = tpu.matmul %52, %53, %cst_25 {dimension_numbers = #tpu.dot_dimension_numbers<[1], [1], [0], [0], [0, 0, 1, 0], [], []>} : vector<4x8xbf16>, vector<4x8xbf16>, vector<4x4xf32> -> vector<4x4xf32>
    %cst_26 = arith.constant dense<0xFF800000> : vector<4xf32>
    %56 = vector.multi_reduction <maximumf>, %55, %cst_26 [1] : vector<4x4xf32> to vector<4xf32>
    %57 = vector.shape_cast %56 : vector<4xf32> to vector<4x1xf32>
    %58 = vector.broadcast %57 : vector<4x1xf32> to vector<4x4xf32>
    %59 = arith.subf %55, %58 : vector<4x4xf32>
    %60 = math.exp %59 : vector<4x4xf32>
    %cst_27 = arith.constant dense<0.000000e+00> : vector<4xf32>
    %61 = vector.multi_reduction <add>, %60, %cst_27 [1] : vector<4x4xf32> to vector<4xf32>
    %62 = vector.shape_cast %61 : vector<4xf32> to vector<4x1xf32>
    %63 = tpu.reciprocal %62 {approx = true} : vector<4x1xf32> -> vector<4x1xf32>
    %64 = vector.broadcast %63 : vector<4x1xf32> to vector<4x4xf32>
    %65 = arith.mulf %60, %64 : vector<4x4xf32>
    %66 = arith.truncf %65 : vector<4x4xf32> to vector<4x4xbf16>
    %cst_28 = arith.constant dense<0.000000e+00> : vector<4x8xf32>
    %67 = tpu.matmul %66, %54, %cst_28 {dimension_numbers = #tpu.dot_dimension_numbers<[1], [0], [0], [1], [0, 0, 1, 1], [], []>} : vector<4x4xbf16>, vector<4x8xbf16>, vector<4x8xf32> -> vector<4x8xf32>
    %c0_29 = arith.constant 0 : index
    %c16 = arith.constant 16 : index
    %68 = vector.load %arg12[%c0_29, %c16] : memref<4x32xf32, #tpu.memory_space<vmem>>, vector<4x8xf32>
    tpu.vector_store %arg12[%c0_29, %c16], %67 {strides = array<i32>} : memref<4x32xf32, #tpu.memory_space<vmem>>, vector<4x8xf32>,
    %69 = vector.extract_strided_slice %16 {offsets = [0, 24], sizes = [4, 8], strides = [1, 1]} : vector<4x32xbf16> to vector<4x8xbf16>
    %70 = vector.extract_strided_slice %17 {offsets = [0, 24], sizes = [4, 8], strides = [1, 1]} : vector<4x64xbf16> to vector<4x8xbf16>
    %71 = vector.extract_strided_slice %17 {offsets = [0, 56], sizes = [4, 8], strides = [1, 1]} : vector<4x64xbf16> to vector<4x8xbf16>
    %cst_30 = arith.constant dense<0.000000e+00> : vector<4x4xf32>
    %72 = tpu.matmul %69, %70, %cst_30 {dimension_numbers = #tpu.dot_dimension_numbers<[1], [1], [0], [0], [0, 0, 1, 0], [], []>} : vector<4x8xbf16>, vector<4x8xbf16>, vector<4x4xf32> -> vector<4x4xf32>
    %cst_31 = arith.constant dense<0xFF800000> : vector<4xf32>
    %73 = vector.multi_reduction <maximumf>, %72, %cst_31 [1] : vector<4x4xf32> to vector<4xf32>
    %74 = vector.shape_cast %73 : vector<4xf32> to vector<4x1xf32>
    %75 = vector.broadcast %74 : vector<4x1xf32> to vector<4x4xf32>
    %76 = arith.subf %72, %75 : vector<4x4xf32>
    %77 = math.exp %76 : vector<4x4xf32>
    %cst_32 = arith.constant dense<0.000000e+00> : vector<4xf32>
    %78 = vector.multi_reduction <add>, %77, %cst_32 [1] : vector<4x4xf32> to vector<4xf32>
    %79 = vector.shape_cast %78 : vector<4xf32> to vector<4x1xf32>
    %80 = tpu.reciprocal %79 {approx = true} : vector<4x1xf32> -> vector<4x1xf32>
    %81 = vector.broadcast %80 : vector<4x1xf32> to vector<4x4xf32>
    %82 = arith.mulf %77, %81 : vector<4x4xf32>
    %83 = arith.truncf %82 : vector<4x4xf32> to vector<4x4xbf16>
    %cst_33 = arith.constant dense<0.000000e+00> : vector<4x8xf32>
    %84 = tpu.matmul %83, %71, %cst_33 {dimension_numbers = #tpu.dot_dimension_numbers<[1], [0], [0], [1], [0, 0, 1, 1], [], []>} : vector<4x4xbf16>, vector<4x8xbf16>, vector<4x8xf32> -> vector<4x8xf32>
    %c0_34 = arith.constant 0 : index
    %c24 = arith.constant 24 : index
    %85 = vector.load %arg12[%c0_34, %c24] : memref<4x32xf32, #tpu.memory_space<vmem>>, vector<4x8xf32>
    tpu.vector_store %arg12[%c0_34, %c24], %84 {strides = array<i32>} : memref<4x32xf32, #tpu.memory_space<vmem>>, vector<4x8xf32>,
    %c0_35 = arith.constant 0 : index
    %c0_36 = arith.constant 0 : index
    %86 = vector.load %arg12[%c0_35, %c0_36] : memref<4x32xf32, #tpu.memory_space<vmem>>, vector<4x32xf32>
    %87 = arith.truncf %86 : vector<4x32xf32> to vector<4x32xbf16>
    %c0_37 = arith.constant 0 : index
    %c0_38 = arith.constant 0 : index
    %88 = vector.load %arg7[%c0_37, %c0_38] : memref<32x32xbf16, #tpu.memory_space<vmem>>, vector<32x32xbf16>
    %cst_39 = arith.constant dense<0.000000e+00> : vector<4x32xf32>
    %89 = tpu.matmul %87, %88, %cst_39 {dimension_numbers = #tpu.dot_dimension_numbers<[1], [0], [0], [1], [0, 0, 1, 1], [], []>} : vector<4x32xbf16>, vector<32x32xbf16>, vector<4x32xf32> -> vector<4x32xf32>
    %c0_40 = arith.constant 0 : index
    %c0_41 = arith.constant 0 : index
    %90 = vector.load %arg8[%c0_40, %c0_41] : memref<1x32xf32, #tpu.memory_space<vmem>>, vector<1x32xf32>
    %91 = vector.broadcast %90 : vector<1x32xf32> to vector<4x32xf32>
    %92 = arith.addf %89, %91 : vector<4x32xf32>
    %93 = arith.addf %1, %92 : vector<4x32xf32>
    %c0_42 = arith.constant 0 : index
    %c0_43 = arith.constant 0 : index
    %94 = vector.load %arg9[%c0_42, %c0_43] : memref<1x32xf32, #tpu.memory_space<vmem>>, vector<1x32xf32>
    %c0_44 = arith.constant 0 : index
    %c0_45 = arith.constant 0 : index
    %95 = vector.load %arg10[%c0_44, %c0_45] : memref<1x32xf32, #tpu.memory_space<vmem>>, vector<1x32xf32>
    %cst_46 = arith.constant dense<0.000000e+00> : vector<4xf32>
    %96 = vector.multi_reduction <add>, %93, %cst_46 [1] : vector<4x32xf32> to vector<4xf32>
    %97 = vector.shape_cast %96 : vector<4xf32> to vector<4x1xf32>
    %cst_47 = arith.constant 3.200000e+01 : f32
    %98 = vector.broadcast %cst_47 : f32 to vector<4x1xf32>
    %99 = arith.divf %97, %98 : vector<4x1xf32>
    %100 = vector.broadcast %99 : vector<4x1xf32> to vector<4x32xf32>
    %101 = arith.subf %93, %100 : vector<4x32xf32>
    %102 = arith.mulf %101, %101 : vector<4x32xf32>
    %cst_48 = arith.constant dense<0.000000e+00> : vector<4xf32>
    %103 = vector.multi_reduction <add>, %102, %cst_48 [1] : vector<4x32xf32> to vector<4xf32>
    %104 = vector.shape_cast %103 : vector<4xf32> to vector<4x1xf32>
    %cst_49 = arith.constant 3.200000e+01 : f32
    %105 = vector.broadcast %cst_49 : f32 to vector<4x1xf32>
    %106 = arith.divf %104, %105 : vector<4x1xf32>
    %107 = vector.broadcast %99 : vector<4x1xf32> to vector<4x32xf32>
    %108 = arith.subf %93, %107 : vector<4x32xf32>
    %cst_50 = arith.constant 9.99999974E-6 : f32
    %109 = vector.broadcast %cst_50 : f32 to vector<4x1xf32>
    %110 = arith.addf %106, %109 : vector<4x1xf32>
    %111 = math.rsqrt %110 : vector<4x1xf32>
    %112 = vector.broadcast %111 : vector<4x1xf32> to vector<4x32xf32>
    %113 = arith.mulf %108, %112 : vector<4x32xf32>
    %114 = vector.broadcast %94 : vector<1x32xf32> to vector<4x32xf32>
    %115 = arith.mulf %113, %114 : vector<4x32xf32>
    %116 = vector.broadcast %95 : vector<1x32xf32> to vector<4x32xf32>
    %117 = arith.addf %115, %116 : vector<4x32xf32>
    %c0_51 = arith.constant 0 : index
    %c0_52 = arith.constant 0 : index
    %c0_53 = arith.constant 0 : index
    %118 = vector.load %arg11[%c0_51, %c0_52, %c0_53] : memref<1x4x32xf32, #tpu.memory_space<vmem>>, vector<1x4x32xf32>
    %119 = vector.shape_cast %118 : vector<1x4x32xf32> to vector<4x32xf32>
    %120 = vector.shape_cast %117 : vector<4x32xf32> to vector<1x4x32xf32>
    tpu.vector_store %arg11[%c0_51, %c0_52, %c0_53], %120 {strides = array<i32>} : memref<1x4x32xf32, #tpu.memory_space<vmem>>, vector<1x4x32xf32>,
    return
  }
  func.func @transform_0(%arg0: i32) -> (i32, i32, i32) {
    %c0_i32 = arith.constant 0 : i32
    %c0_i32_0 = arith.constant 0 : i32
    %c0_i32_1 = arith.constant 0 : i32
    return %arg0, %c0_i32, %c0_i32_0 : i32, i32, i32
  }
  func.func @transform_1(%arg0: i32) -> (i32, i32, i32) {
    %c0_i32 = arith.constant 0 : i32
    %c0_i32_0 = arith.constant 0 : i32
    %c0_i32_1 = arith.constant 0 : i32
    return %arg0, %c0_i32, %c0_i32_0 : i32, i32, i32
  }
  func.func @transform_2(%arg0: i32) -> (i32, i32) {
    %c0_i32 = arith.constant 0 : i32
    %c0_i32_0 = arith.constant 0 : i32
    %c0_i32_1 = arith.constant 0 : i32
    return %c0_i32, %c0_i32_0 : i32, i32
  }
  func.func @transform_3(%arg0: i32) -> (i32, i32) {
    %c0_i32 = arith.constant 0 : i32
    %c0_i32_0 = arith.constant 0 : i32
    %c0_i32_1 = arith.constant 0 : i32
    return %c0_i32, %c0_i32_0 : i32, i32
  }
  func.func @transform_4(%arg0: i32) -> (i32, i32) {
    %c0_i32 = arith.constant 0 : i32
    %c0_i32_0 = arith.constant 0 : i32
    %c0_i32_1 = arith.constant 0 : i32
    return %c0_i32, %c0_i32_0 : i32, i32
  }
  func.func @transform_5(%arg0: i32) -> (i32, i32) {
    %c0_i32 = arith.constant 0 : i32
    %c0_i32_0 = arith.constant 0 : i32
    %c0_i32_1 = arith.constant 0 : i32
    return %c0_i32, %c0_i32_0 : i32, i32
  }
  func.func @transform_6(%arg0: i32) -> (i32, i32) {
    %c0_i32 = arith.constant 0 : i32
    %c0_i32_0 = arith.constant 0 : i32
    %c0_i32_1 = arith.constant 0 : i32
    return %c0_i32, %c0_i32_0 : i32, i32
  }
  func.func @transform_7(%arg0: i32) -> (i32, i32) {
    %c0_i32 = arith.constant 0 : i32
    %c0_i32_0 = arith.constant 0 : i32
    %c0_i32_1 = arith.constant 0 : i32
    return %c0_i32, %c0_i32_0 : i32, i32
  }
  func.func @transform_8(%arg0: i32) -> (i32, i32) {
    %c0_i32 = arith.constant 0 : i32
    %c0_i32_0 = arith.constant 0 : i32
    %c0_i32_1 = arith.constant 0 : i32
    return %c0_i32, %c0_i32_0 : i32, i32
  }
  func.func @transform_9(%arg0: i32) -> (i32, i32) {
    %c0_i32 = arith.constant 0 : i32
    %c0_i32_0 = arith.constant 0 : i32
    %c0_i32_1 = arith.constant 0 : i32
    return %c0_i32, %c0_i32_0 : i32, i32
  }
  func.func @transform_10(%arg0: i32) -> (i32, i32, i32) {
    %c0_i32 = arith.constant 0 : i32
    %c0_i32_0 = arith.constant 0 : i32
    %c0_i32_1 = arith.constant 0 : i32
    return %arg0, %c0_i32, %c0_i32_0 : i32, i32, i32
  }
}

module attributes {stable_mosaic.version = 11 : i64} {
  func.func @_postnorm_ffn_kernel(%arg0: i32, %arg1: memref<8x32xf32, #tpu.memory_space<vmem>>, %arg2: memref<32x64xbf16, #tpu.memory_space<vmem>>, %arg3: memref<1x64xf32, #tpu.memory_space<vmem>>, %arg4: memref<64x32xbf16, #tpu.memory_space<vmem>>, %arg5: memref<1x32xf32, #tpu.memory_space<vmem>>, %arg6: memref<1x32xf32, #tpu.memory_space<vmem>>, %arg7: memref<1x32xf32, #tpu.memory_space<vmem>>, %arg8: memref<8x32xf32, #tpu.memory_space<vmem>>) attributes {dimension_semantics = [#tpu.dimension_semantics<parallel>], iteration_bounds = array<i64: 2>, scalar_prefetch = 0 : i64, scratch_operands = 0 : i64, tpu.core_type = #tpu.core_type<tc>, window_params = [{transform_indices = @transform_0, window_bounds = array<i64: 8, 32>}, {pipeline_mode = #tpu.pipeline_mode<synchronous>, transform_indices = @transform_1, window_bounds = array<i64: 32, 64>}, {pipeline_mode = #tpu.pipeline_mode<synchronous>, transform_indices = @transform_2, window_bounds = array<i64: 1, 64>}, {pipeline_mode = #tpu.pipeline_mode<synchronous>, transform_indices = @transform_3, window_bounds = array<i64: 64, 32>}, {pipeline_mode = #tpu.pipeline_mode<synchronous>, transform_indices = @transform_4, window_bounds = array<i64: 1, 32>}, {pipeline_mode = #tpu.pipeline_mode<synchronous>, transform_indices = @transform_5, window_bounds = array<i64: 1, 32>}, {pipeline_mode = #tpu.pipeline_mode<synchronous>, transform_indices = @transform_6, window_bounds = array<i64: 1, 32>}, {transform_indices = @transform_7, window_bounds = array<i64: 8, 32>}]} {
    %c0 = arith.constant 0 : index
    %c0_0 = arith.constant 0 : index
    %0 = vector.load %arg1[%c0, %c0_0] : memref<8x32xf32, #tpu.memory_space<vmem>>, vector<8x32xf32>
    %1 = arith.truncf %0 : vector<8x32xf32> to vector<8x32xbf16>
    %c0_1 = arith.constant 0 : index
    %c0_2 = arith.constant 0 : index
    %2 = vector.load %arg2[%c0_1, %c0_2] : memref<32x64xbf16, #tpu.memory_space<vmem>>, vector<32x64xbf16>
    %cst = arith.constant dense<0.000000e+00> : vector<8x64xf32>
    %3 = tpu.matmul %1, %2, %cst {dimension_numbers = #tpu.dot_dimension_numbers<[1], [0], [0], [1], [0, 0, 1, 1], [], []>} : vector<8x32xbf16>, vector<32x64xbf16>, vector<8x64xf32> -> vector<8x64xf32>
    %c0_3 = arith.constant 0 : index
    %c0_4 = arith.constant 0 : index
    %4 = vector.load %arg3[%c0_3, %c0_4] : memref<1x64xf32, #tpu.memory_space<vmem>>, vector<1x64xf32>
    %5 = vector.broadcast %4 : vector<1x64xf32> to vector<8x64xf32>
    %6 = arith.addf %3, %5 : vector<8x64xf32>
    %cst_5 = arith.constant 0.000000e+00 : f32
    %7 = vector.broadcast %cst_5 : f32 to vector<8x64xf32>
    %8 = arith.maximumf %6, %7 : vector<8x64xf32>
    %9 = arith.truncf %8 : vector<8x64xf32> to vector<8x64xbf16>
    %c0_6 = arith.constant 0 : index
    %c0_7 = arith.constant 0 : index
    %10 = vector.load %arg4[%c0_6, %c0_7] : memref<64x32xbf16, #tpu.memory_space<vmem>>, vector<64x32xbf16>
    %cst_8 = arith.constant dense<0.000000e+00> : vector<8x32xf32>
    %11 = tpu.matmul %9, %10, %cst_8 {dimension_numbers = #tpu.dot_dimension_numbers<[1], [0], [0], [1], [0, 0, 1, 1], [], []>} : vector<8x64xbf16>, vector<64x32xbf16>, vector<8x32xf32> -> vector<8x32xf32>
    %c0_9 = arith.constant 0 : index
    %c0_10 = arith.constant 0 : index
    %12 = vector.load %arg5[%c0_9, %c0_10] : memref<1x32xf32, #tpu.memory_space<vmem>>, vector<1x32xf32>
    %13 = vector.broadcast %12 : vector<1x32xf32> to vector<8x32xf32>
    %14 = arith.addf %11, %13 : vector<8x32xf32>
    %15 = arith.addf %0, %14 : vector<8x32xf32>
    %c0_11 = arith.constant 0 : index
    %c0_12 = arith.constant 0 : index
    %16 = vector.load %arg6[%c0_11, %c0_12] : memref<1x32xf32, #tpu.memory_space<vmem>>, vector<1x32xf32>
    %c0_13 = arith.constant 0 : index
    %c0_14 = arith.constant 0 : index
    %17 = vector.load %arg7[%c0_13, %c0_14] : memref<1x32xf32, #tpu.memory_space<vmem>>, vector<1x32xf32>
    %cst_15 = arith.constant dense<0.000000e+00> : vector<8xf32>
    %18 = vector.multi_reduction <add>, %15, %cst_15 [1] : vector<8x32xf32> to vector<8xf32>
    %19 = vector.shape_cast %18 : vector<8xf32> to vector<8x1xf32>
    %cst_16 = arith.constant 3.200000e+01 : f32
    %20 = vector.broadcast %cst_16 : f32 to vector<8x1xf32>
    %21 = arith.divf %19, %20 : vector<8x1xf32>
    %22 = vector.broadcast %21 : vector<8x1xf32> to vector<8x32xf32>
    %23 = arith.subf %15, %22 : vector<8x32xf32>
    %24 = arith.mulf %23, %23 : vector<8x32xf32>
    %cst_17 = arith.constant dense<0.000000e+00> : vector<8xf32>
    %25 = vector.multi_reduction <add>, %24, %cst_17 [1] : vector<8x32xf32> to vector<8xf32>
    %26 = vector.shape_cast %25 : vector<8xf32> to vector<8x1xf32>
    %cst_18 = arith.constant 3.200000e+01 : f32
    %27 = vector.broadcast %cst_18 : f32 to vector<8x1xf32>
    %28 = arith.divf %26, %27 : vector<8x1xf32>
    %29 = vector.broadcast %21 : vector<8x1xf32> to vector<8x32xf32>
    %30 = arith.subf %15, %29 : vector<8x32xf32>
    %cst_19 = arith.constant 9.99999974E-6 : f32
    %31 = vector.broadcast %cst_19 : f32 to vector<8x1xf32>
    %32 = arith.addf %28, %31 : vector<8x1xf32>
    %33 = math.rsqrt %32 : vector<8x1xf32>
    %34 = vector.broadcast %33 : vector<8x1xf32> to vector<8x32xf32>
    %35 = arith.mulf %30, %34 : vector<8x32xf32>
    %36 = vector.broadcast %16 : vector<1x32xf32> to vector<8x32xf32>
    %37 = arith.mulf %35, %36 : vector<8x32xf32>
    %38 = vector.broadcast %17 : vector<1x32xf32> to vector<8x32xf32>
    %39 = arith.addf %37, %38 : vector<8x32xf32>
    %c0_20 = arith.constant 0 : index
    %c0_21 = arith.constant 0 : index
    %40 = vector.load %arg8[%c0_20, %c0_21] : memref<8x32xf32, #tpu.memory_space<vmem>>, vector<8x32xf32>
    tpu.vector_store %arg8[%c0_20, %c0_21], %39 {strides = array<i32>} : memref<8x32xf32, #tpu.memory_space<vmem>>, vector<8x32xf32>,
    return
  }
  func.func @transform_0(%arg0: i32) -> (i32, i32) {
    %c0_i32 = arith.constant 0 : i32
    %c0_i32_0 = arith.constant 0 : i32
    return %arg0, %c0_i32 : i32, i32
  }
  func.func @transform_1(%arg0: i32) -> (i32, i32) {
    %c0_i32 = arith.constant 0 : i32
    %c0_i32_0 = arith.constant 0 : i32
    %c0_i32_1 = arith.constant 0 : i32
    return %c0_i32, %c0_i32_0 : i32, i32
  }
  func.func @transform_2(%arg0: i32) -> (i32, i32) {
    %c0_i32 = arith.constant 0 : i32
    %c0_i32_0 = arith.constant 0 : i32
    %c0_i32_1 = arith.constant 0 : i32
    return %c0_i32, %c0_i32_0 : i32, i32
  }
  func.func @transform_3(%arg0: i32) -> (i32, i32) {
    %c0_i32 = arith.constant 0 : i32
    %c0_i32_0 = arith.constant 0 : i32
    %c0_i32_1 = arith.constant 0 : i32
    return %c0_i32, %c0_i32_0 : i32, i32
  }
  func.func @transform_4(%arg0: i32) -> (i32, i32) {
    %c0_i32 = arith.constant 0 : i32
    %c0_i32_0 = arith.constant 0 : i32
    %c0_i32_1 = arith.constant 0 : i32
    return %c0_i32, %c0_i32_0 : i32, i32
  }
  func.func @transform_5(%arg0: i32) -> (i32, i32) {
    %c0_i32 = arith.constant 0 : i32
    %c0_i32_0 = arith.constant 0 : i32
    %c0_i32_1 = arith.constant 0 : i32
    return %c0_i32, %c0_i32_0 : i32, i32
  }
  func.func @transform_6(%arg0: i32) -> (i32, i32) {
    %c0_i32 = arith.constant 0 : i32
    %c0_i32_0 = arith.constant 0 : i32
    %c0_i32_1 = arith.constant 0 : i32
    return %c0_i32, %c0_i32_0 : i32, i32
  }
  func.func @transform_7(%arg0: i32) -> (i32, i32) {
    %c0_i32 = arith.constant 0 : i32
    %c0_i32_0 = arith.constant 0 : i32
    return %arg0, %c0_i32 : i32, i32
  }
}

</mosaic_0001>

<bundles_post_ra>
// kernel: fsa_transformer_encoder.10
= control target key start
LH: loop header
LB: loop body
LE: loop exit
PB: predicated region body
PF: predicated region fallthrough
CT: control target
= control target key end

     0   :  { %s637_s24 = smov 0   ;;  %s700_s0 = inlined_call_operand.vmem [shape: f32[16,32], index: 0, kind: input, shape index: {}]   ;;  %s701_s1 = inlined_call_operand.vmem [shape: f32[1,32], index: 1, kind: input, shape index: {}]   ;;  %s702_s2 = inlined_call_operand.vmem [shape: f32[1,32], index: 2, kind: input, shape index: {}]   ;;  %s703_s3 = inlined_call_operand.vmem [shape: bf16[32,64], index: 3, kind: input, shape index: {}]   ;;  %s704_s4 = inlined_call_operand.vmem [shape: f32[1,64], index: 4, kind: input, shape index: {}]   ;;  %s705_s5 = inlined_call_operand.vmem [shape: bf16[64,32], index: 5, kind: input, shape index: {}]   ;;  %s706_s6 = inlined_call_operand.vmem [shape: f32[1,32], index: 6, kind: input, shape index: {}]   ;;  %s707_s7 = inlined_call_operand.vmem [shape: f32[16,32], index: 7, kind: output, shape index: {}]  }
   0x1 LB: > { %s518_s25 = sadd.s32 4294967295, %s593_s24   ;;  %p522_p0 = scmp.ge.s32.totalorder %s593_s24, 1  ;;  %s593_s24 = sphi %s637_s24, %s17_s24  }
   0x2   : > { %p236_p1 = scmp.lt.s32.totalorder %s593_s24, 3 }
   0x4   : > { %p237_p2 = pnand %p522_p0, %p236_p1 }
   0x5   : > { %p266_p3 = scmp.lt.s32.totalorder (!%p237_p2), %s518_s25, 1 }
   0x6   : > { %240 = sbr.rel (%p237_p2) target bundleno = 741 (0x2e5), region = 48 }
   0xb   : > { %s709_s25 = smov (!%p266_p3, %s518_s25), 1  ;;  %vm278_vm0 = vcmask 261120   ;;  %v577_v7 = vld [vmem:[%s703_s3 + $0x8] sm:$0xff]   ;;  %v595_v8 = vmov 0.0   ;;  %vm596_vm1 = vmmov 0   ;;  %v578_v9 = vld [vmem:[%s703_s3] sm:$0xff]  }
   0xc   : > { %s523_s26 = sshll.u32 %s709_s25, 3  ;;  %547 = vmatprep.subr.bf16.mxu0 %v595_v8  ;;  %551 = vmatprep.mubr.msk.bf16.mxu0 %vm596_vm1, %v595_v8  ;;  %v525_v14 = vld [vmem:[%s701_s1] ss:$0 sm:$0xff]  ;;  %v579_v20 = vld [vmem:[%s705_s5 + $0x18] sm:$0xff]   ;;  %v580_v21 = vld [vmem:[%s705_s5 + $0x10] sm:$0xff]   ;;  %vm419_vm2 = vcmask 523264  }
   0xd   : > { %s269_s29 = scalar_lea.vmem %s700_s0, %s523_s26  ;;  %548 = vmatpush3.bf16.msra.mxu0 %v577_v7  ;;  %555 = vmatprep.subr.bf16.mxu1 %v595_v8  ;;  %v526_v16 = vld [vmem:[%s702_s2] ss:$0 sm:$0xff]  ;;  %v581_v22 = vld [vmem:[%s705_s5 + $0x8] sm:$0xff]   ;;  %s273_s9 = scalar_lea.vmem %s707_s7, %s523_s26 }
   0xe   : > { %v653_v0 = vld [vmem:[%s269_s29] sm:$0xff]  ;;  %549 = vmatprep.subr.bf16.mxu0 %v595_v8  ;;  %563 = vmatprep.mubr.msk.bf16.mxu1 %vm596_vm1, %v595_v8 }
   0xf   : > { %v279_v1 = vsel %vm278_vm0, %v653_v0, 0.0  ;;  %556 = vmatpush3.bf16.msra.mxu1 %v579_v20  ;;  %v582_v23 = vld [vmem:[%s705_s5] sm:$0xff]  }
  0x10   : > { %280 = vadd.xlane.f32.xlu0 %v279_v1  ;;  %557 = vmatprep.subr.bf16.mxu1 %v595_v8  ;;  %v527_v24 = vld [vmem:[%s704_s4] ss:$0 sm:$0xff] }
  0x11   : > { %550 = vmatpush3.bf16.msra.mxu0 %v578_v9  ;;  %v531_v36 = vld [vmem:[%s706_s6] ss:$0 sm:$0xff] }
  0x13   : > { %558 = vmatpush3.bf16.msra.mxu1 %v580_v21 }
  0x14   : > { %559 = vmatprep.subr.bf16.mxu1 %v595_v8 }
  0x17   : > { %560 = vmatpush3.bf16.msra.mxu1 %v581_v22 }
  0x18   : > { %561 = vmatprep.subr.bf16.mxu1 %v595_v8 }
  0x1b   : > { %562 = vmatpush3.bf16.msra.mxu1 %v582_v23 }
  0x99   : > { %v281_v2 = vpop.xlane.xlu0 %280 }
  0x9a   : > { %v283_v3 = vmul.f32 0.03125, %v281_v2 }
  0x9c   : > { %v284_v4 = vsub.f32 %v653_v0, %v283_v3 }
  0x9e   : > { %v285_v5 = vmul.f32 %v284_v4, %v284_v4 }
  0xa0   : > { %v286_v6 = vsel %vm278_vm0, %v285_v5, 0.0 }
  0xa1   : > { %287 = vadd.xlane.f32.xlu0 %v286_v6 }
 0x12a   : > { %v288_v10 = vpop.xlane.xlu0 %287 }
 0x12b   : > { %v289_v11 = vmul.f32 0.03125, %v288_v10 }
 0x12d   : > { %v290_v12 = vadd.f32 1e-05, %v289_v11 }
 0x12f   : > { %583 = vrsqrt.f32 %v290_v12 }
 0x13c   : > { %v584_v13 = vpop.eup %583 }
 0x13d   : > { %v292_v15 = vmul.f32 %v584_v13, %v284_v4 }
 0x13f   : > { %v299_v17 = vmul.f32 %v525_v14, %v292_v15 }
 0x141   : > { %v306_v18 = vadd.f32 %v526_v16, %v299_v17 }
 0x143   : > { %v307_v19 = vpack.c.bf16 %v306_v18, %v306_v18 }
 0x145   : > { %552 = vmatmul.mubr.msk.bf16.vlgmr.msra.gmra.mxu0 %vm278_vm0, %v307_v19 }
 0x205   : > { %v368_v25 = vpop.f32.mrf.mxu0 }
 0x206   : > { %v369_v26 = vadd.f32 %v527_v24, %v368_v25 }
 0x207   : > { %v553_v27 = vpop.f32.mrf.mxu0 }
 0x208   : > { %v375_v28 = vmul.f32 0.70710677, %v369_v26  ;;  %v374_v32 = vmul.f32 0.5, %v369_v26 }
 0x209   : > { %v371_v29 = vpop.f32.mrf.mxu0 }
 0x20a   : > { %585 = verf.f32 %v375_v28 }
 0x20b   : > { %v554_v30 = vpop.f32.mrf.mxu0 }
 0x217   : > { %v586_v31 = vpop.eup %585 }
 0x218   : > { %v377_v33 = vadd.f32 1.0, %v586_v31 }
 0x21a   : > { %v378_v34 = vmul.f32 %v377_v33, %v374_v32 }
 0x21c   : > { %v379_v35 = vpack.c.bf16 %v378_v34, %v378_v34 }
 0x21e   : > { %564 = vmatmul.mubr.msk.bf16.vlgmr.msra.gmra.mxu1 %vm419_vm2, %v379_v35 }
 0x2de   : > { %v457_v37 = vpop.f32.mrf.mxu1 }
 0x2df   : > { %v458_v38 = vadd.f32 %v531_v36, %v457_v37 }
 0x2e0   : > { %v565_v39 = vpop.f32.mrf.mxu1 }
 0x2e1   : > { %v463_v40 = vadd.f32 %v458_v38, %v653_v0 }
 0x2e2   : > { %v460_v41 = vpop.f32.mrf.mxu1 }
 0x2e3   : > { %464 = vst.msk [vmem:[%s273_s9] sm:$0xff] %vm278_vm0, %v463_v40 }
 0x2e4   : > { %v566_v42 = vpop.f32.mrf.mxu1 }
 0x2e5 PF: > { %s17_s24 = sadd.s32 1, %s593_s24  }
 0x2e6   : > { %p14_p4 = scmp.ge.s32.totalorder %s17_s24, 4  }
 0x2e8   :  { %16 = sbr.rel (!%p14_p4) target bundleno = 1 (0x1), region = 78 }

// kernel: fsa_transformer_encoder.9
= control target key start
LH: loop header
LB: loop body
LE: loop exit
PB: predicated region body
PF: predicated region fallthrough
CT: control target
= control target key end

     0   :  { %s1145_s21 = smov 0   ;;  %s1270_s0 = inlined_call_operand.vmem [shape: f32[8,2,32], index: 0, kind: input, shape index: {}]   ;;  %s1271_s1 = inlined_call_operand.vmem [shape: f32[1,32], index: 1, kind: input, shape index: {}]   ;;  %s1272_s2 = inlined_call_operand.vmem [shape: f32[1,32], index: 2, kind: input, shape index: {}]   ;;  %s1273_s3 = inlined_call_operand.vmem [shape: bf16[32,96], index: 3, kind: input, shape index: {}]   ;;  %s1274_s4 = inlined_call_operand.vmem [shape: bf16[32,32], index: 4, kind: input, shape index: {}]   ;;  %s1275_s5 = inlined_call_operand.vmem [shape: f32[1,32], index: 5, kind: input, shape index: {}]   ;;  %s1276_s6 = inlined_call_operand.vmem [shape: f32[8,2,32], index: 6, kind: output, shape index: {}]  }
   0x1 LB: > { %s928_s22 = sadd.s32 4294967295, %s1092_s21   ;;  %p932_p0 = scmp.ge.s32.totalorder %s1092_s21, 1  ;;  %s1092_s21 = sphi %s1145_s21, %s16_s21  }
   0x2   : > { %p211_p1 = scmp.lt.s32.totalorder %s1092_s21, 9 }
   0x4   : > { %p212_p2 = pnand %p932_p0, %p211_p1 }
   0x5   : > { %p239_p3 = scmp.lt.s32.totalorder (!%p212_p2), %s928_s22, 7  ;;  %s1096_s11 = smov (!%p212_p2), 120  }
   0x6   : > { %215 = sbr.rel (%p212_p2) target bundleno = 1728 (0x6c0), region = 44  ;;  %s1097_s12 = smov (!%p212_p2), 96  }
   0x7   : > { %s1098_s13 = smov (!%p212_p2), 88   ;;  %s1099_s14 = smov (!%p212_p2), 80  }
   0x8   : > { %s1100_s15 = smov (!%p212_p2), 112   ;;  %s1101_s16 = smov (!%p212_p2), 72  }
   0x9   : > { %s1102_s17 = smov (!%p212_p2), 104   ;;  %s1103_s18 = smov (!%p212_p2), 64  }
   0xa   : > { %s1104_s19 = smov (!%p212_p2), 56   ;;  %s1105_s20 = smov (!%p212_p2), 48  }
   0xb   : > { %s1278_s22 = smov (!%p239_p3, %s928_s22), 7  ;;  %vm251_vm0 = vcmask 254976   ;;  %v1064_v7 = vld [vmem:[%s1273_s3 + $0x8] sm:$0xff]   ;;  %v1094_v8 = vmov 0.0   ;;  %vm1095_vm1 = vmmov 0   ;;  %v1065_v9 = vld [vmem:[%s1273_s3] sm:$0xff]  }
   0xc   : > { %s933_s23 = sshll.u32 %s1278_s22, 1  ;;  %976 = vmatprep.subr.bf16.mxu0 %v1094_v8  ;;  %980 = vmatprep.mubr.msk.bf16.mxu0 %vm1095_vm1, %v1094_v8  ;;  %v935_v14 = vld [vmem:[%s1271_s1] ss:$0 sm:$0xff]  ;;  %vm297_vm2 = vcmask 261120   ;;  %vm345_vm3 = vcmask 64512   ;;  %vm392_vm4 = vcmask 9216  }
   0xd   : > { %s242_s26 = scalar_lea.vmem %s1270_s0, %s933_s23  ;;  %977 = vmatpush3.bf16.msra.mxu0 %v1064_v7  ;;  %984 = vmatprep.subr.bf16.mxu1 %v1094_v8  ;;  %v936_v16 = vld [vmem:[%s1272_s2] ss:$0 sm:$0xff]  ;;  %s1106_s24 = smov 40   ;;  %vm411_vm5 = vcmask 1040384   ;;  %vm407_vm6 = vcmask 15360   ;;  %vm455_vm7 = vcmask 58368  }
   0xe   : > { %v1161_v0 = vld [vmem:[%s242_s26] sm:$0x3]  ;;  %978 = vmatprep.subr.bf16.mxu0 %v1094_v8  ;;  %986 = vmatprep.mubr.msk.bf16.mxu1 %vm1095_vm1, %v1094_v8  ;;  %s1107_s25 = smov 8   ;;  %s1108_s30 = smov 16   ;;  %vm571_vm8 = vcmask 123968   ;;  %vm687_vm9 = vcmask 189568  }
   0xf   : > { %v252_v1 = vsel %vm251_vm0, %v1161_v0, 0.0  ;;  %s1109_s7 = smov 24   ;;  %vm803_vm10 = vcmask 255168  }
  0x10   : > { %253 = vadd.xlane.f32.xlu0 %v252_v1 }
  0x11   : > { %979 = vmatpush3.bf16.msra.mxu0 %v1065_v9 }
  0x12   : > { %990 = vmatprep.subr.bf16.mxu0 %v1094_v8 }
  0x99   : > { %v254_v2 = vpop.xlane.xlu0 %253 }
  0x9a   : > { %v256_v3 = vmul.f32 0.03125, %v254_v2 }
  0x9c   : > { %v257_v4 = vsub.f32 %v1161_v0, %v256_v3 }
  0x9e   : > { %v258_v5 = vmul.f32 %v257_v4, %v257_v4 }
  0xa0   : > { %v259_v6 = vsel %vm251_vm0, %v258_v5, 0.0 }
  0xa1   : > { %260 = vadd.xlane.f32.xlu0 %v259_v6 }
 0x12a   : > { %v261_v10 = vpop.xlane.xlu0 %260 }
 0x12b   : > { %v262_v11 = vmul.f32 0.03125, %v261_v10 }
 0x12d   : > { %v263_v12 = vadd.f32 1e-05, %v262_v11 }
 0x12f   : > { %1068 = vrsqrt.f32 %v263_v12 }
 0x13c   : > { %v1069_v13 = vpop.eup %1068 }
 0x13d   : > { %v265_v15 = vmul.f32 %v1069_v13, %v257_v4 }
 0x13f   : > { %v272_v17 = vmul.f32 %v935_v14, %v265_v15 }
 0x141   : > { %v279_v18 = vadd.f32 %v936_v16, %v272_v17 }
 0x143   : > { %v280_v19 = vpack.c.bf16 %v279_v18, %v279_v18 }
 0x145   : > { %981 = vmatmul.mubr.msk.bf16.vlgmr.msra.gmra.mxu0 %vm297_vm2, %v280_v19 }
 0x146   : > { %992 = vmatprep.mubr.msk.bf16.mxu0 %vm1095_vm1, %v1094_v8 }
 0x205   : > { %v335_v20 = vpop.f32.mrf.mxu0 }
 0x206   : > { %v1190_v21 = vpack.c.bf16 %v335_v20, %v335_v20 }
 0x207   : > { %v982_v22 = vpop.f32.mrf.mxu0 }
 0x208   : > { %457 = vrot.lane.b32.xlu0 %v1190_v21, %s1096_s11  ;;  %343 = vrot.lane.b32.xlu1 %v1190_v21, %s1097_s12  ;;  %s246_s12 = scalar_lea.vmem %s1276_s6, %s933_s23 }
 0x209   : > { %v338_v23 = vpop.f32.mrf.mxu0 }
 0x20b   : > { %v983_v24 = vpop.f32.mrf.mxu0 }
 0x20c   : > { %459 = vrot.lane.b32.xlu1 %v1190_v21, %s1098_s13 }
 0x210   : > { %575 = vrot.lane.b32.xlu1 %v1190_v21, %s1099_s14 }
 0x214   : > { %573 = vrot.lane.b32.xlu1 %v1190_v21, %s1100_s15 }
 0x218   : > { %691 = vrot.lane.b32.xlu1 %v1190_v21, %s1101_s16 }
 0x21c   : > { %689 = vrot.lane.b32.xlu1 %v1190_v21, %s1102_s17 }
 0x27a   : > { %v344_v25 = vpop.permute.xlu1 %343  ;;  %v458_v30 = vpop.permute.xlu0 %457 }
 0x27b   : > { %v350_v26 = vsel %vm345_vm3, %v344_v25, 0 }
 0x27c   : > { %985 = vmatpush3.bf16.xpose.msra.mxu1 %v350_v26 }
 0x27d   : > { %996 = vmatprep.subr.bf16.mxu1 %v1094_v8 }
 0x27e   : > { %v460_v27 = vpop.permute.xlu1 %459 }
 0x27f   : > { %v465_v28 = vsel %vm345_vm3, %v460_v27, 0 }
 0x282   : > { %v576_v29 = vpop.permute.xlu1 %575 }
 0x283   : > { %987 = vmatmul.mubr.msk.bf16.vlgmr.msra.gmra.mxu1 %vm345_vm3, %v1190_v21  ;;  %v581_v32 = vsel %vm345_vm3, %v576_v29, 0 }
 0x284   : > { %997 = vmatpush3.bf16.xpose.msra.mxu1 %v465_v28  ;;  %998 = vmatprep.mubr.msk.bf16.mxu1 %vm1095_vm1, %v1094_v8 }
 0x285   : > { %1008 = vmatprep.subr.bf16.mxu1 %v1094_v8 }
 0x286   : > { %v574_v31 = vpop.permute.xlu1 %573 }
 0x28a   : > { %v692_v33 = vpop.permute.xlu1 %691 }
 0x28b   : > { %999 = vmatmul.mubr.msk.bf16.vlgmr.msra.gmra.mxu1 %vm345_vm3, %v458_v30  ;;  %v697_v34 = vsel %vm345_vm3, %v692_v33, 0 }
 0x28c   : > { %1009 = vmatpush3.bf16.xpose.msra.mxu1 %v581_v32  ;;  %1010 = vmatprep.mubr.msk.bf16.mxu1 %vm1095_vm1, %v1094_v8 }
 0x28d   : > { %1020 = vmatprep.subr.bf16.mxu1 %v1094_v8 }
 0x28e   : > { %v690_v35 = vpop.permute.xlu1 %689 }
 0x293   : > { %1011 = vmatmul.mubr.msk.bf16.vlgmr.msra.gmra.mxu1 %vm345_vm3, %v574_v31 }
 0x294   : > { %1021 = vmatpush3.bf16.xpose.msra.mxu1 %v697_v34  ;;  %1022 = vmatprep.mubr.msk.bf16.mxu1 %vm1095_vm1, %v1094_v8 }
 0x295   : > { %1032 = vmatprep.subr.bf16.mxu1 %v1094_v8 }
 0x29b   : > { %1023 = vmatmul.mubr.msk.bf16.vlgmr.msra.gmra.mxu1 %vm345_vm3, %v690_v35 }
 0x29c   : > { %1036 = vmatprep.mubr.msk.bf16.mxu1 %vm1095_vm1, %v1094_v8 }
 0x343   : > { %v386_v36 = vpop.f32.mrf.mxu1 }
 0x344   : > { %v393_v37 = vsel %vm392_vm4, %v386_v36, -inf }
 0x345   : > { %394 = vmax.xlane.f32.xlu1 %v393_v37  ;;  %v988_v38 = vpop.f32.mrf.mxu1 }
 0x347   : > { %v389_v39 = vpop.f32.mrf.mxu1 }
 0x349   : > { %v989_v40 = vpop.f32.mrf.mxu1 }
 0x34b   : > { %v501_v41 = vpop.f32.mrf.mxu1 }
 0x34c   : > { %v507_v42 = vsel %vm392_vm4, %v501_v41, -inf }
 0x34d   : > { %508 = vmax.xlane.f32.xlu0 %v507_v42  ;;  %v1000_v43 = vpop.f32.mrf.mxu1 }
 0x34f   : > { %v504_v44 = vpop.f32.mrf.mxu1 }
 0x351   : > { %v1001_v45 = vpop.f32.mrf.mxu1 }
 0x353   : > { %v617_v46 = vpop.f32.mrf.mxu1 }
 0x354   : > { %v623_v47 = vsel %vm392_vm4, %v617_v46, -inf }
 0x355   : > { %624 = vmax.xlane.f32.xlu1 %v623_v47  ;;  %v1012_v48 = vpop.f32.mrf.mxu1  ;;  %v1067_v47 = vld [vmem:[%s1274_s4] sm:$0xff]  }
 0x357   : > { %v620_v49 = vpop.f32.mrf.mxu1 }
 0x359   : > { %v1013_v50 = vpop.f32.mrf.mxu1 }
 0x35b   : > { %v733_v51 = vpop.f32.mrf.mxu1 }
 0x35c   : > { %v739_v52 = vsel %vm392_vm4, %v733_v51, -inf }
 0x35d   : > { %740 = vmax.xlane.f32.xlu0 %v739_v52  ;;  %v1024_v53 = vpop.f32.mrf.mxu1 }
 0x35f   : > { %v736_v54 = vpop.f32.mrf.mxu1 }
 0x361   : > { %v1025_v55 = vpop.f32.mrf.mxu1 }
 0x3ce   : > { %v395_v56 = vpop.xlane.xlu1 %394 }
 0x3cf   : > { %v396_v57 = vsub.f32 %v386_v36, %v395_v56 }
 0x3d1   : > { %v397_v58 = vmul.f32 1.442695, %v396_v57 }
 0x3d3   : > { %1070 = vpow2.f32 %v397_v58 }
 0x3d6   : > { %v509_v59 = vpop.xlane.xlu0 %508 }
 0x3d7   : > { %v510_v60 = vsub.f32 %v501_v41, %v509_v59 }
 0x3d9   : > { %v511_v61 = vmul.f32 1.442695, %v510_v60  ;;  %v948_v60 = vld [vmem:[%s1275_s5] ss:$0 sm:$0xff] }
 0x3db   : > { %1072 = vpow2.f32 %v511_v61 }
 0x3de   : > { %v625_v9 = vpop.xlane.xlu1 %624 }
 0x3df   : > { %v626_v10 = vsub.f32 %v617_v46, %v625_v9  ;;  %v1066_v46 = vld [vmem:[%s1274_s4 + $0x8] sm:$0xff]  }
 0x3e0   : > { %v1071_v62 = vpop.eup %1070  ;;  %1033 = vmatpush3.bf16.msra.mxu1 %v1066_v46 }
 0x3e1   : > { %v399_v63 = vsel %vm392_vm4, %v1071_v62, 0.0  ;;  %v627_v11 = vmul.f32 1.442695, %v626_v10  ;;  %1034 = vmatprep.subr.bf16.mxu1 %v1094_v8 }
 0x3e2   : > { %400 = vadd.xlane.f32.xlu1 %v399_v63 }
 0x3e4   : > { %1035 = vmatpush3.bf16.msra.mxu1 %v1067_v47 }
 0x3e6   : > { %v741_v1 = vpop.xlane.xlu0 %740 }
 0x3e7   : > { %v742_v2 = vsub.f32 %v733_v51, %v741_v1 }
 0x3e8   : > { %v1073_v3 = vpop.eup %1072 }
 0x3e9   : > { %v743_v4 = vmul.f32 1.442695, %v742_v2  ;;  %v513_v5 = vsel %vm392_vm4, %v1073_v3, 0.0 }
 0x3ea   : > { %514 = vadd.xlane.f32.xlu0 %v513_v5 }
 0x3eb   : > { %1074 = vpow2.f32 %v743_v4 }
 0x3ec   : > { %1076 = vpow2.f32 %v627_v11 }
 0x3f3   : > { %405 = vrot.lane.b32.xlu1 %v1190_v21, %s1103_s18 }
 0x3f8   : > { %v1075_v6 = vpop.eup %1074 }
 0x3f9   : > { %v745_v7 = vsel %vm392_vm4, %v1075_v6, 0.0  ;;  %v1077_v12 = vpop.eup %1076 }
 0x3fa   : > { %746 = vadd.xlane.f32.xlu0 %v745_v7  ;;  %v629_v13 = vsel %vm392_vm4, %v1077_v12, 0.0 }
 0x410   : > { %519 = vrot.lane.b32.xlu0 %v1190_v21, %s1104_s19 }
 0x417   : > { %630 = vadd.xlane.f32.xlu1 %v629_v13 }
 0x428   : > { %635 = vrot.lane.b32.xlu1 %v1190_v21, %s1105_s20 }
 0x42c   : > { %751 = vrot.lane.b32.xlu1 %v1190_v21, %s1106_s24 }
 0x46b   : > { %v401_v14 = vpop.xlane.xlu1 %400 }
 0x46c   : > { %1078 = vrcp.f32 %v401_v14 }
 0x46f   : > { %v406_v15 = vpop.permute.xlu1 %405 }
 0x470   : > { %v413_v16 = vsel %vm411_vm5, %v406_v15, 0 }
 0x471   : > { %991 = vmatpush3.bf16.msra.mxu0 %v413_v16 }
 0x472   : > { %1002 = vmatprep.subr.bf16.mxu0 %v1094_v8 }
 0x473   : > { %v515_v17 = vpop.xlane.xlu0 %514 }
 0x474   : > { %1080 = vrcp.f32 %v515_v17 }
 0x479   : > { %v1079_v18 = vpop.eup %1078 }
 0x47a   : > { %v403_v19 = vmul.f32 %v1079_v18, %v1071_v62 }
 0x47c   : > { %v404_v20 = vpack.c.bf16 %v403_v19, %v403_v19 }
 0x47e   : > { %993 = vmatmul.mubr.msk.bf16.vlgmr.msra.gmra.mxu0 %vm407_vm6, %v404_v20 }
 0x47f   : > { %1004 = vmatprep.mubr.msk.bf16.mxu0 %vm1095_vm1, %v1094_v8 }
 0x481   : > { %v1081_v21 = vpop.eup %1080 }
 0x482   : > { %v517_v23 = vmul.f32 %v1081_v21, %v1073_v3 }
 0x483   : > { %v747_v22 = vpop.xlane.xlu0 %746 }
 0x484   : > { %v518_v26 = vpack.c.bf16 %v517_v23, %v517_v23 }
 0x487   : > { %v520_v24 = vpop.permute.xlu0 %519 }
 0x488   : > { %v525_v25 = vsel %vm411_vm5, %v520_v24, 0 }
 0x489   : > { %1003 = vmatpush3.bf16.msra.mxu0 %v525_v25 }
 0x48a   : > { %1014 = vmatprep.subr.bf16.mxu0 %v1094_v8 }
 0x48c   : > { %1005 = vmatmul.mubr.msk.bf16.vlgmr.msra.gmra.mxu0 %vm407_vm6, %v518_v26 }
 0x48d   : > { %1016 = vmatprep.mubr.msk.bf16.mxu0 %vm1095_vm1, %v1094_v8 }
 0x4a0   : > { %v631_v27 = vpop.xlane.xlu1 %630 }
 0x4a1   : > { %1082 = vrcp.f32 %v631_v27 }
 0x4a2   : > { %1084 = vrcp.f32 %v747_v22 }
 0x4a4   : > { %v636_v28 = vpop.permute.xlu1 %635 }
 0x4a5   : > { %v641_v29 = vsel %vm411_vm5, %v636_v28, 0 }
 0x4a6   : > { %1015 = vmatpush3.bf16.msra.mxu0 %v641_v29 }
 0x4a7   : > { %1026 = vmatprep.subr.bf16.mxu0 %v1094_v8 }
 0x4a8   : > { %v752_v32 = vpop.permute.xlu1 %751 }
 0x4a9   : > { %v757_v35 = vsel %vm411_vm5, %v752_v32, 0 }
 0x4ae   : > { %v1083_v30 = vpop.eup %1082 }
 0x4af   : > { %v633_v31 = vmul.f32 %v1083_v30, %v1077_v12  ;;  %v1085_v34 = vpop.eup %1084 }
 0x4b0   : > { %v749_v36 = vmul.f32 %v1085_v34, %v1075_v6 }
 0x4b1   : > { %v634_v33 = vpack.c.bf16 %v633_v31, %v633_v31 }
 0x4b2   : > { %v750_v37 = vpack.c.bf16 %v749_v36, %v749_v36 }
 0x4b3   : > { %1017 = vmatmul.mubr.msk.bf16.vlgmr.msra.gmra.mxu0 %vm407_vm6, %v634_v33 }
 0x4b4   : > { %1027 = vmatpush3.bf16.msra.mxu0 %v757_v35  ;;  %1028 = vmatprep.mubr.msk.bf16.mxu0 %vm1095_vm1, %v1094_v8 }
 0x4bb   : > { %1029 = vmatmul.mubr.msk.bf16.vlgmr.msra.gmra.mxu0 %vm407_vm6, %v750_v37 }
 0x53e   : > { %v449_v38 = vpop.f32.mrf.mxu0 }
 0x53f   : > { %456 = vst.msk [vmem:[#allocation2] sm:$0x3] %vm455_vm7, %v449_v38 }
 0x540   : > { %v994_v39 = vpop.f32.mrf.mxu0 }
 0x542   : > { %v452_v40 = vpop.f32.mrf.mxu0 }
 0x544   : > { %v995_v41 = vpop.f32.mrf.mxu0 }
 0x54c   : > { %v561_v42 = vpop.f32.mrf.mxu0 }
 0x54d   : > { %568 = vrot.lane.b32.xlu0 %v561_v42, %s1107_s25 }
 0x54e   : > { %v1006_v43 = vpop.f32.mrf.mxu0 }
 0x550   : > { %v564_v44 = vpop.f32.mrf.mxu0 }
 0x552   : > { %v1007_v45 = vpop.f32.mrf.mxu0 }
 0x573   : > { %v677_v48 = vpop.f32.mrf.mxu0 }
 0x574   : > { %684 = vrot.lane.b32.xlu1 %v677_v48, %s1108_s30 }
 0x575   : > { %v1018_v49 = vpop.f32.mrf.mxu0 }
 0x577   : > { %v680_v50 = vpop.f32.mrf.mxu0 }
 0x579   : > { %v1019_v51 = vpop.f32.mrf.mxu0 }
 0x57b   : > { %v793_v52 = vpop.f32.mrf.mxu0 }
 0x57c   : > { %800 = vrot.lane.b32.xlu0 %v793_v52, %s1109_s7 }
 0x57d   : > { %v1030_v53 = vpop.f32.mrf.mxu0 }
 0x57f   : > { %v796_v54 = vpop.f32.mrf.mxu0 }
 0x581   : > { %v1031_v55 = vpop.f32.mrf.mxu0 }
 0x5bf   : > { %v569_v56 = vpop.permute.xlu0 %568 }
 0x5c0   : > { %572 = vst.msk [vmem:[#allocation2] sm:$0x3] %vm571_vm8, %v569_v56 }
 0x5e6   : > { %v685_v57 = vpop.permute.xlu1 %684 }
 0x5e7   : > { %688 = vst.msk [vmem:[#allocation2] sm:$0x3] %vm687_vm9, %v685_v57 }
 0x5ee   : > { %v801_v8 = vpop.permute.xlu0 %800 }
 0x5ef   : > { %804 = vst.msk [vmem:[#allocation2] sm:$0x3] %vm803_vm10, %v801_v8 }
 0x5f6   : > { %v805_v58 = vld [vmem:[#allocation2] sm:$0x3] }
 0x5f7   : > { %v806_v59 = vpack.c.bf16 %v805_v58, %v805_v58 }
 0x5f9   : > { %1037 = vmatmul.mubr.msk.bf16.vlgmr.msra.gmra.mxu1 %vm297_vm2, %v806_v59 }
 0x6b9   : > { %v867_v61 = vpop.f32.mrf.mxu1 }
 0x6ba   : > { %v868_v62 = vadd.f32 %v948_v60, %v867_v61 }
 0x6bb   : > { %v1038_v63 = vpop.f32.mrf.mxu1 }
 0x6bc   : > { %v873_v1 = vadd.f32 %v868_v62, %v1161_v0 }
 0x6bd   : > { %v870_v2 = vpop.f32.mrf.mxu1 }
 0x6be   : > { %874 = vst.msk [vmem:[%s246_s12] sm:$0x3] %vm251_vm0, %v873_v1 }
 0x6bf   : > { %v1039_v3 = vpop.f32.mrf.mxu1 }
 0x6c0 PF: > { %s16_s21 = sadd.s32 1, %s1092_s21  }
 0x6c1   : > { %p13_p4 = scmp.ge.s32.totalorder %s16_s21, 10  }
 0x6c3   :  { %15 = sbr.rel (!%p13_p4) target bundleno = 1 (0x1), region = 74 }

// kernel: fsa_transformer_encoder.8
= control target key start
LH: loop header
LB: loop body
LE: loop exit
PB: predicated region body
PF: predicated region fallthrough
CT: control target
= control target key end

     0   :  { %s1145_s21 = smov 0   ;;  %s1270_s0 = inlined_call_operand.vmem [shape: f32[4,4,32], index: 0, kind: input, shape index: {}]   ;;  %s1271_s1 = inlined_call_operand.vmem [shape: f32[1,32], index: 1, kind: input, shape index: {}]   ;;  %s1272_s2 = inlined_call_operand.vmem [shape: f32[1,32], index: 2, kind: input, shape index: {}]   ;;  %s1273_s3 = inlined_call_operand.vmem [shape: bf16[32,96], index: 3, kind: input, shape index: {}]   ;;  %s1274_s4 = inlined_call_operand.vmem [shape: bf16[32,32], index: 4, kind: input, shape index: {}]   ;;  %s1275_s5 = inlined_call_operand.vmem [shape: f32[1,32], index: 5, kind: input, shape index: {}]   ;;  %s1276_s6 = inlined_call_operand.vmem [shape: f32[4,4,32], index: 6, kind: output, shape index: {}]  }
   0x1 LB: > { %s928_s22 = sadd.s32 4294967295, %s1092_s21   ;;  %p932_p0 = scmp.ge.s32.totalorder %s1092_s21, 1  ;;  %s1092_s21 = sphi %s1145_s21, %s16_s21  }
   0x2   : > { %p211_p1 = scmp.lt.s32.totalorder %s1092_s21, 5 }
   0x4   : > { %p212_p2 = pnand %p932_p0, %p211_p1 }
   0x5   : > { %p239_p3 = scmp.lt.s32.totalorder (!%p212_p2), %s928_s22, 3  ;;  %s1096_s11 = smov (!%p212_p2), 120  }
   0x6   : > { %215 = sbr.rel (%p212_p2) target bundleno = 1728 (0x6c0), region = 44  ;;  %s1097_s12 = smov (!%p212_p2), 96  }
   0x7   : > { %s1098_s13 = smov (!%p212_p2), 88   ;;  %s1099_s14 = smov (!%p212_p2), 80  }
   0x8   : > { %s1100_s15 = smov (!%p212_p2), 112   ;;  %s1101_s16 = smov (!%p212_p2), 72  }
   0x9   : > { %s1102_s17 = smov (!%p212_p2), 104   ;;  %s1103_s18 = smov (!%p212_p2), 64  }
   0xa   : > { %s1104_s19 = smov (!%p212_p2), 56   ;;  %s1105_s20 = smov (!%p212_p2), 48  }
   0xb   : > { %s1278_s22 = smov (!%p239_p3, %s928_s22), 3  ;;  %vm251_vm0 = vcmask 257024   ;;  %v1064_v7 = vld [vmem:[%s1273_s3 + $0x8] sm:$0xff]   ;;  %v1094_v8 = vmov 0.0   ;;  %vm1095_vm1 = vmmov 0   ;;  %v1065_v9 = vld [vmem:[%s1273_s3] sm:$0xff]  }
   0xc   : > { %s933_s23 = sshll.u32 %s1278_s22, 2  ;;  %976 = vmatprep.subr.bf16.mxu0 %v1094_v8  ;;  %980 = vmatprep.mubr.msk.bf16.mxu0 %vm1095_vm1, %v1094_v8  ;;  %v935_v14 = vld [vmem:[%s1271_s1] ss:$0 sm:$0xff]  ;;  %vm297_vm2 = vcmask 261120   ;;  %vm345_vm3 = vcmask 64512   ;;  %vm392_vm4 = vcmask 27648  }
   0xd   : > { %s242_s26 = scalar_lea.vmem %s1270_s0, %s933_s23  ;;  %977 = vmatpush3.bf16.msra.mxu0 %v1064_v7  ;;  %984 = vmatprep.subr.bf16.mxu1 %v1094_v8  ;;  %v936_v16 = vld [vmem:[%s1272_s2] ss:$0 sm:$0xff]  ;;  %s1106_s24 = smov 40   ;;  %vm411_vm5 = vcmask 1041408   ;;  %vm407_vm6 = vcmask 31744   ;;  %vm455_vm7 = vcmask 60416  }
   0xe   : > { %v1161_v0 = vld [vmem:[%s242_s26] sm:$0xf]  ;;  %978 = vmatprep.subr.bf16.mxu0 %v1094_v8  ;;  %986 = vmatprep.mubr.msk.bf16.mxu1 %vm1095_vm1, %v1094_v8  ;;  %s1107_s25 = smov 8   ;;  %s1108_s30 = smov 16   ;;  %vm571_vm8 = vcmask 126016   ;;  %vm687_vm9 = vcmask 191616  }
   0xf   : > { %v252_v1 = vsel %vm251_vm0, %v1161_v0, 0.0  ;;  %s1109_s7 = smov 24   ;;  %vm803_vm10 = vcmask 257216  }
  0x10   : > { %253 = vadd.xlane.f32.xlu0 %v252_v1 }
  0x11   : > { %979 = vmatpush3.bf16.msra.mxu0 %v1065_v9 }
  0x12   : > { %990 = vmatprep.subr.bf16.mxu0 %v1094_v8 }
  0x99   : > { %v254_v2 = vpop.xlane.xlu0 %253 }
  0x9a   : > { %v256_v3 = vmul.f32 0.03125, %v254_v2 }
  0x9c   : > { %v257_v4 = vsub.f32 %v1161_v0, %v256_v3 }
  0x9e   : > { %v258_v5 = vmul.f32 %v257_v4, %v257_v4 }
  0xa0   : > { %v259_v6 = vsel %vm251_vm0, %v258_v5, 0.0 }
  0xa1   : > { %260 = vadd.xlane.f32.xlu0 %v259_v6 }
 0x12a   : > { %v261_v10 = vpop.xlane.xlu0 %260 }
 0x12b   : > { %v262_v11 = vmul.f32 0.03125, %v261_v10 }
 0x12d   : > { %v263_v12 = vadd.f32 1e-05, %v262_v11 }
 0x12f   : > { %1068 = vrsqrt.f32 %v263_v12 }
 0x13c   : > { %v1069_v13 = vpop.eup %1068 }
 0x13d   : > { %v265_v15 = vmul.f32 %v1069_v13, %v257_v4 }
 0x13f   : > { %v272_v17 = vmul.f32 %v935_v14, %v265_v15 }
 0x141   : > { %v279_v18 = vadd.f32 %v936_v16, %v272_v17 }
 0x143   : > { %v280_v19 = vpack.c.bf16 %v279_v18, %v279_v18 }
 0x145   : > { %981 = vmatmul.mubr.msk.bf16.vlgmr.msra.gmra.mxu0 %vm297_vm2, %v280_v19 }
 0x146   : > { %992 = vmatprep.mubr.msk.bf16.mxu0 %vm1095_vm1, %v1094_v8 }
 0x205   : > { %v335_v20 = vpop.f32.mrf.mxu0 }
 0x206   : > { %v1190_v21 = vpack.c.bf16 %v335_v20, %v335_v20 }
 0x207   : > { %v982_v22 = vpop.f32.mrf.mxu0 }
 0x208   : > { %457 = vrot.lane.b32.xlu0 %v1190_v21, %s1096_s11  ;;  %343 = vrot.lane.b32.xlu1 %v1190_v21, %s1097_s12  ;;  %s246_s12 = scalar_lea.vmem %s1276_s6, %s933_s23 }
 0x209   : > { %v338_v23 = vpop.f32.mrf.mxu0 }
 0x20b   : > { %v983_v24 = vpop.f32.mrf.mxu0 }
 0x20c   : > { %459 = vrot.lane.b32.xlu1 %v1190_v21, %s1098_s13 }
 0x210   : > { %575 = vrot.lane.b32.xlu1 %v1190_v21, %s1099_s14 }
 0x214   : > { %573 = vrot.lane.b32.xlu1 %v1190_v21, %s1100_s15 }
 0x218   : > { %691 = vrot.lane.b32.xlu1 %v1190_v21, %s1101_s16 }
 0x21c   : > { %689 = vrot.lane.b32.xlu1 %v1190_v21, %s1102_s17 }
 0x27a   : > { %v344_v25 = vpop.permute.xlu1 %343  ;;  %v458_v30 = vpop.permute.xlu0 %457 }
 0x27b   : > { %v350_v26 = vsel %vm345_vm3, %v344_v25, 0 }
 0x27c   : > { %985 = vmatpush3.bf16.xpose.msra.mxu1 %v350_v26 }
 0x27d   : > { %996 = vmatprep.subr.bf16.mxu1 %v1094_v8 }
 0x27e   : > { %v460_v27 = vpop.permute.xlu1 %459 }
 0x27f   : > { %v465_v28 = vsel %vm345_vm3, %v460_v27, 0 }
 0x282   : > { %v576_v29 = vpop.permute.xlu1 %575 }
 0x283   : > { %987 = vmatmul.mubr.msk.bf16.vlgmr.msra.gmra.mxu1 %vm345_vm3, %v1190_v21  ;;  %v581_v32 = vsel %vm345_vm3, %v576_v29, 0 }
 0x284   : > { %997 = vmatpush3.bf16.xpose.msra.mxu1 %v465_v28  ;;  %998 = vmatprep.mubr.msk.bf16.mxu1 %vm1095_vm1, %v1094_v8 }
 0x285   : > { %1008 = vmatprep.subr.bf16.mxu1 %v1094_v8 }
 0x286   : > { %v574_v31 = vpop.permute.xlu1 %573 }
 0x28a   : > { %v692_v33 = vpop.permute.xlu1 %691 }
 0x28b   : > { %999 = vmatmul.mubr.msk.bf16.vlgmr.msra.gmra.mxu1 %vm345_vm3, %v458_v30  ;;  %v697_v34 = vsel %vm345_vm3, %v692_v33, 0 }
 0x28c   : > { %1009 = vmatpush3.bf16.xpose.msra.mxu1 %v581_v32  ;;  %1010 = vmatprep.mubr.msk.bf16.mxu1 %vm1095_vm1, %v1094_v8 }
 0x28d   : > { %1020 = vmatprep.subr.bf16.mxu1 %v1094_v8 }
 0x28e   : > { %v690_v35 = vpop.permute.xlu1 %689 }
 0x293   : > { %1011 = vmatmul.mubr.msk.bf16.vlgmr.msra.gmra.mxu1 %vm345_vm3, %v574_v31 }
 0x294   : > { %1021 = vmatpush3.bf16.xpose.msra.mxu1 %v697_v34  ;;  %1022 = vmatprep.mubr.msk.bf16.mxu1 %vm1095_vm1, %v1094_v8 }
 0x295   : > { %1032 = vmatprep.subr.bf16.mxu1 %v1094_v8 }
 0x29b   : > { %1023 = vmatmul.mubr.msk.bf16.vlgmr.msra.gmra.mxu1 %vm345_vm3, %v690_v35 }
 0x29c   : > { %1036 = vmatprep.mubr.msk.bf16.mxu1 %vm1095_vm1, %v1094_v8 }
 0x343   : > { %v386_v36 = vpop.f32.mrf.mxu1 }
 0x344   : > { %v393_v37 = vsel %vm392_vm4, %v386_v36, -inf }
 0x345   : > { %394 = vmax.xlane.f32.xlu1 %v393_v37  ;;  %v988_v38 = vpop.f32.mrf.mxu1 }
 0x347   : > { %v389_v39 = vpop.f32.mrf.mxu1 }
 0x349   : > { %v989_v40 = vpop.f32.mrf.mxu1 }
 0x34b   : > { %v501_v41 = vpop.f32.mrf.mxu1 }
 0x34c   : > { %v507_v42 = vsel %vm392_vm4, %v501_v41, -inf }
 0x34d   : > { %508 = vmax.xlane.f32.xlu0 %v507_v42  ;;  %v1000_v43 = vpop.f32.mrf.mxu1 }
 0x34f   : > { %v504_v44 = vpop.f32.mrf.mxu1 }
 0x351   : > { %v1001_v45 = vpop.f32.mrf.mxu1 }
 0x353   : > { %v617_v46 = vpop.f32.mrf.mxu1 }
 0x354   : > { %v623_v47 = vsel %vm392_vm4, %v617_v46, -inf }
 0x355   : > { %624 = vmax.xlane.f32.xlu1 %v623_v47  ;;  %v1012_v48 = vpop.f32.mrf.mxu1  ;;  %v1067_v47 = vld [vmem:[%s1274_s4] sm:$0xff]  }
 0x357   : > { %v620_v49 = vpop.f32.mrf.mxu1 }
 0x359   : > { %v1013_v50 = vpop.f32.mrf.mxu1 }
 0x35b   : > { %v733_v51 = vpop.f32.mrf.mxu1 }
 0x35c   : > { %v739_v52 = vsel %vm392_vm4, %v733_v51, -inf }
 0x35d   : > { %740 = vmax.xlane.f32.xlu0 %v739_v52  ;;  %v1024_v53 = vpop.f32.mrf.mxu1 }
 0x35f   : > { %v736_v54 = vpop.f32.mrf.mxu1 }
 0x361   : > { %v1025_v55 = vpop.f32.mrf.mxu1 }
 0x3ce   : > { %v395_v56 = vpop.xlane.xlu1 %394 }
 0x3cf   : > { %v396_v57 = vsub.f32 %v386_v36, %v395_v56 }
 0x3d1   : > { %v397_v58 = vmul.f32 1.442695, %v396_v57 }
 0x3d3   : > { %1070 = vpow2.f32 %v397_v58 }
 0x3d6   : > { %v509_v59 = vpop.xlane.xlu0 %508 }
 0x3d7   : > { %v510_v60 = vsub.f32 %v501_v41, %v509_v59 }
 0x3d9   : > { %v511_v61 = vmul.f32 1.442695, %v510_v60  ;;  %v948_v60 = vld [vmem:[%s1275_s5] ss:$0 sm:$0xff] }
 0x3db   : > { %1072 = vpow2.f32 %v511_v61 }
 0x3de   : > { %v625_v9 = vpop.xlane.xlu1 %624 }
 0x3df   : > { %v626_v10 = vsub.f32 %v617_v46, %v625_v9  ;;  %v1066_v46 = vld [vmem:[%s1274_s4 + $0x8] sm:$0xff]  }
 0x3e0   : > { %v1071_v62 = vpop.eup %1070  ;;  %1033 = vmatpush3.bf16.msra.mxu1 %v1066_v46 }
 0x3e1   : > { %v399_v63 = vsel %vm392_vm4, %v1071_v62, 0.0  ;;  %v627_v11 = vmul.f32 1.442695, %v626_v10  ;;  %1034 = vmatprep.subr.bf16.mxu1 %v1094_v8 }
 0x3e2   : > { %400 = vadd.xlane.f32.xlu1 %v399_v63 }
 0x3e4   : > { %1035 = vmatpush3.bf16.msra.mxu1 %v1067_v47 }
 0x3e6   : > { %v741_v1 = vpop.xlane.xlu0 %740 }
 0x3e7   : > { %v742_v2 = vsub.f32 %v733_v51, %v741_v1 }
 0x3e8   : > { %v1073_v3 = vpop.eup %1072 }
 0x3e9   : > { %v743_v4 = vmul.f32 1.442695, %v742_v2  ;;  %v513_v5 = vsel %vm392_vm4, %v1073_v3, 0.0 }
 0x3ea   : > { %514 = vadd.xlane.f32.xlu0 %v513_v5 }
 0x3eb   : > { %1074 = vpow2.f32 %v743_v4 }
 0x3ec   : > { %1076 = vpow2.f32 %v627_v11 }
 0x3f3   : > { %405 = vrot.lane.b32.xlu1 %v1190_v21, %s1103_s18 }
 0x3f8   : > { %v1075_v6 = vpop.eup %1074 }
 0x3f9   : > { %v745_v7 = vsel %vm392_vm4, %v1075_v6, 0.0  ;;  %v1077_v12 = vpop.eup %1076 }
 0x3fa   : > { %746 = vadd.xlane.f32.xlu0 %v745_v7  ;;  %v629_v13 = vsel %vm392_vm4, %v1077_v12, 0.0 }
 0x410   : > { %519 = vrot.lane.b32.xlu0 %v1190_v21, %s1104_s19 }
 0x417   : > { %630 = vadd.xlane.f32.xlu1 %v629_v13 }
 0x428   : > { %635 = vrot.lane.b32.xlu1 %v1190_v21, %s1105_s20 }
 0x42c   : > { %751 = vrot.lane.b32.xlu1 %v1190_v21, %s1106_s24 }
 0x46b   : > { %v401_v14 = vpop.xlane.xlu1 %400 }
 0x46c   : > { %1078 = vrcp.f32 %v401_v14 }
 0x46f   : > { %v406_v15 = vpop.permute.xlu1 %405 }
 0x470   : > { %v413_v16 = vsel %vm411_vm5, %v406_v15, 0 }
 0x471   : > { %991 = vmatpush3.bf16.msra.mxu0 %v413_v16 }
 0x472   : > { %1002 = vmatprep.subr.bf16.mxu0 %v1094_v8 }
 0x473   : > { %v515_v17 = vpop.xlane.xlu0 %514 }
 0x474   : > { %1080 = vrcp.f32 %v515_v17 }
 0x479   : > { %v1079_v18 = vpop.eup %1078 }
 0x47a   : > { %v403_v19 = vmul.f32 %v1079_v18, %v1071_v62 }
 0x47c   : > { %v404_v20 = vpack.c.bf16 %v403_v19, %v403_v19 }
 0x47e   : > { %993 = vmatmul.mubr.msk.bf16.vlgmr.msra.gmra.mxu0 %vm407_vm6, %v404_v20 }
 0x47f   : > { %1004 = vmatprep.mubr.msk.bf16.mxu0 %vm1095_vm1, %v1094_v8 }
 0x481   : > { %v1081_v21 = vpop.eup %1080 }
 0x482   : > { %v517_v23 = vmul.f32 %v1081_v21, %v1073_v3 }
 0x483   : > { %v747_v22 = vpop.xlane.xlu0 %746 }
 0x484   : > { %v518_v26 = vpack.c.bf16 %v517_v23, %v517_v23 }
 0x487   : > { %v520_v24 = vpop.permute.xlu0 %519 }
 0x488   : > { %v525_v25 = vsel %vm411_vm5, %v520_v24, 0 }
 0x489   : > { %1003 = vmatpush3.bf16.msra.mxu0 %v525_v25 }
 0x48a   : > { %1014 = vmatprep.subr.bf16.mxu0 %v1094_v8 }
 0x48c   : > { %1005 = vmatmul.mubr.msk.bf16.vlgmr.msra.gmra.mxu0 %vm407_vm6, %v518_v26 }
 0x48d   : > { %1016 = vmatprep.mubr.msk.bf16.mxu0 %vm1095_vm1, %v1094_v8 }
 0x4a0   : > { %v631_v27 = vpop.xlane.xlu1 %630 }
 0x4a1   : > { %1082 = vrcp.f32 %v631_v27 }
 0x4a2   : > { %1084 = vrcp.f32 %v747_v22 }
 0x4a4   : > { %v636_v28 = vpop.permute.xlu1 %635 }
 0x4a5   : > { %v641_v29 = vsel %vm411_vm5, %v636_v28, 0 }
 0x4a6   : > { %1015 = vmatpush3.bf16.msra.mxu0 %v641_v29 }
 0x4a7   : > { %1026 = vmatprep.subr.bf16.mxu0 %v1094_v8 }
 0x4a8   : > { %v752_v32 = vpop.permute.xlu1 %751 }
 0x4a9   : > { %v757_v35 = vsel %vm411_vm5, %v752_v32, 0 }
 0x4ae   : > { %v1083_v30 = vpop.eup %1082 }
 0x4af   : > { %v633_v31 = vmul.f32 %v1083_v30, %v1077_v12  ;;  %v1085_v34 = vpop.eup %1084 }
 0x4b0   : > { %v749_v36 = vmul.f32 %v1085_v34, %v1075_v6 }
 0x4b1   : > { %v634_v33 = vpack.c.bf16 %v633_v31, %v633_v31 }
 0x4b2   : > { %v750_v37 = vpack.c.bf16 %v749_v36, %v749_v36 }
 0x4b3   : > { %1017 = vmatmul.mubr.msk.bf16.vlgmr.msra.gmra.mxu0 %vm407_vm6, %v634_v33 }
 0x4b4   : > { %1027 = vmatpush3.bf16.msra.mxu0 %v757_v35  ;;  %1028 = vmatprep.mubr.msk.bf16.mxu0 %vm1095_vm1, %v1094_v8 }
 0x4bb   : > { %1029 = vmatmul.mubr.msk.bf16.vlgmr.msra.gmra.mxu0 %vm407_vm6, %v750_v37 }
 0x53e   : > { %v449_v38 = vpop.f32.mrf.mxu0 }
 0x53f   : > { %456 = vst.msk [vmem:[#allocation2] sm:$0xf] %vm455_vm7, %v449_v38 }
 0x540   : > { %v994_v39 = vpop.f32.mrf.mxu0 }
 0x542   : > { %v452_v40 = vpop.f32.mrf.mxu0 }
 0x544   : > { %v995_v41 = vpop.f32.mrf.mxu0 }
 0x54c   : > { %v561_v42 = vpop.f32.mrf.mxu0 }
 0x54d   : > { %568 = vrot.lane.b32.xlu0 %v561_v42, %s1107_s25 }
 0x54e   : > { %v1006_v43 = vpop.f32.mrf.mxu0 }
 0x550   : > { %v564_v44 = vpop.f32.mrf.mxu0 }
 0x552   : > { %v1007_v45 = vpop.f32.mrf.mxu0 }
 0x573   : > { %v677_v48 = vpop.f32.mrf.mxu0 }
 0x574   : > { %684 = vrot.lane.b32.xlu1 %v677_v48, %s1108_s30 }
 0x575   : > { %v1018_v49 = vpop.f32.mrf.mxu0 }
 0x577   : > { %v680_v50 = vpop.f32.mrf.mxu0 }
 0x579   : > { %v1019_v51 = vpop.f32.mrf.mxu0 }
 0x57b   : > { %v793_v52 = vpop.f32.mrf.mxu0 }
 0x57c   : > { %800 = vrot.lane.b32.xlu0 %v793_v52, %s1109_s7 }
 0x57d   : > { %v1030_v53 = vpop.f32.mrf.mxu0 }
 0x57f   : > { %v796_v54 = vpop.f32.mrf.mxu0 }
 0x581   : > { %v1031_v55 = vpop.f32.mrf.mxu0 }
 0x5bf   : > { %v569_v56 = vpop.permute.xlu0 %568 }
 0x5c0   : > { %572 = vst.msk [vmem:[#allocation2] sm:$0xf] %vm571_vm8, %v569_v56 }
 0x5e6   : > { %v685_v57 = vpop.permute.xlu1 %684 }
 0x5e7   : > { %688 = vst.msk [vmem:[#allocation2] sm:$0xf] %vm687_vm9, %v685_v57 }
 0x5ee   : > { %v801_v8 = vpop.permute.xlu0 %800 }
 0x5ef   : > { %804 = vst.msk [vmem:[#allocation2] sm:$0xf] %vm803_vm10, %v801_v8 }
 0x5f6   : > { %v805_v58 = vld [vmem:[#allocation2] sm:$0xf] }
 0x5f7   : > { %v806_v59 = vpack.c.bf16 %v805_v58, %v805_v58 }
 0x5f9   : > { %1037 = vmatmul.mubr.msk.bf16.vlgmr.msra.gmra.mxu1 %vm297_vm2, %v806_v59 }
 0x6b9   : > { %v867_v61 = vpop.f32.mrf.mxu1 }
 0x6ba   : > { %v868_v62 = vadd.f32 %v948_v60, %v867_v61 }
 0x6bb   : > { %v1038_v63 = vpop.f32.mrf.mxu1 }
 0x6bc   : > { %v873_v1 = vadd.f32 %v868_v62, %v1161_v0 }
 0x6bd   : > { %v870_v2 = vpop.f32.mrf.mxu1 }
 0x6be   : > { %874 = vst.msk [vmem:[%s246_s12] sm:$0xf] %vm251_vm0, %v873_v1 }
 0x6bf   : > { %v1039_v3 = vpop.f32.mrf.mxu1 }
 0x6c0 PF: > { %s16_s21 = sadd.s32 1, %s1092_s21  }
 0x6c1   : > { %p13_p4 = scmp.ge.s32.totalorder %s16_s21, 6  }
 0x6c3   :  { %15 = sbr.rel (!%p13_p4) target bundleno = 1 (0x1), region = 74 }

// kernel: fsa_transformer_encoder.11
= control target key start
LH: loop header
LB: loop body
LE: loop exit
PB: predicated region body
PF: predicated region fallthrough
CT: control target
= control target key end

     0   :  { %s1388_s13 = smov 0   ;;  %s1527_s0 = inlined_call_operand.vmem [shape: f32[4,4,32], index: 0, kind: input, shape index: {}]   ;;  %s1528_s1 = inlined_call_operand.vmem [shape: f32[4,4,32], index: 1, kind: input, shape index: {}]   ;;  %s1529_s2 = inlined_call_operand.vmem [shape: bf16[32,32], index: 2, kind: input, shape index: {}]   ;;  %s1530_s3 = inlined_call_operand.vmem [shape: f32[1,32], index: 3, kind: input, shape index: {}]   ;;  %s1531_s4 = inlined_call_operand.vmem [shape: bf16[32,64], index: 4, kind: input, shape index: {}]   ;;  %s1532_s5 = inlined_call_operand.vmem [shape: f32[1,64], index: 5, kind: input, shape index: {}]   ;;  %s1533_s6 = inlined_call_operand.vmem [shape: bf16[32,32], index: 6, kind: input, shape index: {}]   ;;  %s1534_s7 = inlined_call_operand.vmem [shape: f32[1,32], index: 7, kind: input, shape index: {}]   ;;  %s1535_s8 = inlined_call_operand.vmem [shape: f32[1,32], index: 8, kind: input, shape index: {}]   ;;  %s1536_s9 = inlined_call_operand.vmem [shape: f32[1,32], index: 9, kind: input, shape index: {}]   ;;  %s1537_s10 = inlined_call_operand.vmem [shape: f32[4,4,32], index: 10, kind: output, shape index: {}]  }
   0x1 LB: > { %s1140_s14 = sadd.s32 4294967295, %s1319_s13   ;;  %p1144_p0 = scmp.ge.s32.totalorder %s1319_s13, 1  ;;  %s1319_s13 = sphi %s1388_s13, %s20_s13  }
   0x2   : > { %p320_p1 = scmp.lt.s32.totalorder %s1319_s13, 5 }
   0x4   : > { %p321_p2 = pnand %p1144_p0, %p320_p1 }
   0x5   : > { %p360_p3 = scmp.lt.s32.totalorder (!%p321_p2), %s1140_s14, 3  ;;  %s1323_s15 = smov (!%p321_p2), 112  }
   0x6   : > { %324 = sbr.rel (%p321_p2) target bundleno = 1693 (0x69d), region = 60  ;;  %s1324_s16 = smov (!%p321_p2), 120  }
   0x7   : > { %s1325_s17 = smov (!%p321_p2), 104   ;;  %s1326_s18 = smov (!%p321_p2), 96  }
   0x8   : > { %s1327_s19 = smov (!%p321_p2), 80   ;;  %s1328_s20 = smov (!%p321_p2), 72  }
   0x9   : > { %s1329_s21 = smov (!%p321_p2), 88   ;;  %s1330_s22 = smov (!%p321_p2), 8  }
   0xa   : > { %s1331_s28 = smov (!%p321_p2), 16  }
   0xb   : > { %v1289_v0 = vld [vmem:[%s1531_s4 + $0x8] sm:$0xff]   ;;  %v1321_v1 = vmov 0.0   ;;  %v1291_v3 = vld [vmem:[%s1531_s4] sm:$0xff]   ;;  %vm1322_vm0 = vmmov 0   ;;  %s1539_s14 = smov (!%p360_p3, %s1140_s14), 3  ;;  %vm399_vm1 = vcmask 261120  }
   0xc   : > { %1205 = vmatprep.subr.bf16.mxu1 %v1321_v1  ;;  %1197 = vmatprep.subr.bf16.mxu0 %v1321_v1  ;;  %v1290_v2 = vld [vmem:[%s1529_s2 + $0x8] sm:$0xff]   ;;  %v1292_v4 = vld [vmem:[%s1529_s2] sm:$0xff]   ;;  %s1416_s23 = sshll.u32 %s1539_s14, 2  ;;  %vm512_vm2 = vcmask 64512   ;;  %vm559_vm3 = vcmask 27648   ;;  %vm579_vm4 = vcmask 1041408  }
   0xd   : > { %1206 = vmatpush3.bf16.msra.mxu1 %v1289_v0  ;;  %1209 = vmatprep.mubr.msk.bf16.mxu1 %vm1322_vm0, %v1321_v1  ;;  %s367_s26 = scalar_lea.vmem %s1528_s1, %s1416_s23  ;;  %s363_s29 = scalar_lea.vmem %s1527_s0, %s1416_s23  ;;  %v1152_v9 = vld [vmem:[%s1532_s5] ss:$0 sm:$0xff]  ;;  %vm575_vm5 = vcmask 31744   ;;  %vm623_vm6 = vcmask 60416   ;;  %vm740_vm7 = vcmask 126016   ;;  %vm856_vm8 = vcmask 191616  }
   0xe   : > { %1198 = vmatpush3.bf16.msra.mxu0 %v1290_v2  ;;  %1207 = vmatprep.subr.bf16.mxu1 %v1321_v1  ;;  %v374_v5 = vld [vmem:[%s367_s26] sm:$0xf]  ;;  %vm972_vm9 = vcmask 257216   ;;  %vm1045_vm10 = vcmask 257024  }
   0xf   : > { %1199 = vmatprep.subr.bf16.mxu0 %v1321_v1  ;;  %1201 = vmatprep.mubr.msk.bf16.mxu0 %vm1322_vm0, %v1321_v1  ;;  %v443_v6 = vpack.c.bf16 %v374_v5, %v374_v5  ;;  %v1428_v7 = vld [vmem:[%s363_s29] sm:$0xf]  ;;  %s1332_s29 = smov 24  }
  0x10   : > { %v375_v8 = vpack.c.bf16 %v1428_v7, %v1428_v7  ;;  %v1148_v10 = vld [vmem:[%s1530_s3] ss:$0 sm:$0xff] }
  0x11   : > { %1208 = vmatpush3.bf16.msra.mxu1 %v1291_v3 }
  0x12   : > { %1200 = vmatpush3.bf16.msra.mxu0 %v1292_v4  ;;  %1219 = vmatprep.subr.bf16.mxu1 %v1321_v1 }
  0x13   : > { %1213 = vmatprep.subr.bf16.mxu0 %v1321_v1 }
  0x14   : > { %1210 = vmatmul.mubr.msk.bf16.vlgmr.msra.gmra.mxu1 %vm399_vm1, %v443_v6 }
  0x15   : > { %1202 = vmatmul.mubr.msk.bf16.vlgmr.msra.gmra.mxu0 %vm399_vm1, %v375_v8  ;;  %1221 = vmatprep.mubr.msk.bf16.mxu1 %vm1322_vm0, %v1321_v1 }
  0x16   : > { %1215 = vmatprep.mubr.msk.bf16.mxu0 %vm1322_vm0, %v1321_v1 }
  0xd4   : > { %v504_v11 = vpop.f32.mrf.mxu1 }
  0xd5   : > { %v505_v12 = vadd.f32 %v1152_v9, %v504_v11  ;;  %v437_v13 = vpop.f32.mrf.mxu0 }
  0xd6   : > { %v438_v14 = vadd.f32 %v1148_v10, %v437_v13  ;;  %v1211_v15 = vpop.f32.mrf.mxu1 }
  0xd7   : > { %v1444_v16 = vpack.c.bf16 %v505_v12, %v505_v12  ;;  %v1203_v17 = vpop.f32.mrf.mxu0 }
  0xd8   : > { %v507_v18 = vpop.f32.mrf.mxu1  ;;  %v510_v19 = vpack.c.bf16 %v438_v14, %v438_v14 }
  0xd9   : > { %744 = vrot.lane.b32.xlu1 %v1444_v16, %s1323_s15  ;;  %628 = vrot.lane.b32.xlu0 %v1444_v16, %s1324_s16  ;;  %v440_v20 = vpop.f32.mrf.mxu0  ;;  %v517_v21 = vsel %vm512_vm2, %v1444_v16, 0 }
  0xda   : > { %v1212_v22 = vpop.f32.mrf.mxu1  ;;  %1214 = vmatpush3.bf16.xpose.msra.mxu0 %v517_v21 }
  0xdb   : > { %v1204_v23 = vpop.f32.mrf.mxu0  ;;  %1225 = vmatprep.subr.bf16.mxu0 %v1321_v1 }
  0xdd   : > { %742 = vrot.lane.b32.xlu1 %v510_v19, %s1323_s15  ;;  %626 = vrot.lane.b32.xlu0 %v510_v19, %s1324_s16 }
  0xe1   : > { %858 = vrot.lane.b32.xlu1 %v510_v19, %s1325_s17  ;;  %860 = vrot.lane.b32.xlu0 %v1444_v16, %s1325_s17 }
  0xe2   : > { %1216 = vmatmul.mubr.msk.bf16.vlgmr.msra.gmra.mxu0 %vm512_vm2, %v510_v19 }
  0xe3   : > { %1227 = vmatprep.mubr.msk.bf16.mxu0 %vm1322_vm0, %v1321_v1 }
 0x14b   : > { %v629_v24 = vpop.permute.xlu0 %628  ;;  %v745_v26 = vpop.permute.xlu1 %744 }
 0x14c   : > { %v634_v25 = vsel %vm512_vm2, %v629_v24, 0  ;;  %v750_v28 = vsel %vm512_vm2, %v745_v26, 0 }
 0x14d   : > { %1226 = vmatpush3.bf16.xpose.msra.mxu0 %v634_v25 }
 0x14e   : > { %1237 = vmatprep.subr.bf16.mxu0 %v1321_v1 }
 0x14f   : > { %v627_v27 = vpop.permute.xlu0 %626  ;;  %v743_v30 = vpop.permute.xlu1 %742 }
 0x153   : > { %v861_v29 = vpop.permute.xlu0 %860  ;;  %v859_v32 = vpop.permute.xlu1 %858 }
 0x154   : > { %1228 = vmatmul.mubr.msk.bf16.vlgmr.msra.gmra.mxu0 %vm512_vm2, %v627_v27  ;;  %v866_v31 = vsel %vm512_vm2, %v861_v29, 0 }
 0x155   : > { %1238 = vmatpush3.bf16.xpose.msra.mxu0 %v750_v28  ;;  %1239 = vmatprep.mubr.msk.bf16.mxu0 %vm1322_vm0, %v1321_v1 }
 0x156   : > { %1249 = vmatprep.subr.bf16.mxu0 %v1321_v1 }
 0x15c   : > { %1240 = vmatmul.mubr.msk.bf16.vlgmr.msra.gmra.mxu0 %vm512_vm2, %v743_v30 }
 0x15d   : > { %1250 = vmatpush3.bf16.xpose.msra.mxu0 %v866_v31  ;;  %1251 = vmatprep.mubr.msk.bf16.mxu0 %vm1322_vm0, %v1321_v1 }
 0x15e   : > { %1261 = vmatprep.subr.bf16.mxu0 %v1321_v1 }
 0x164   : > { %1252 = vmatmul.mubr.msk.bf16.vlgmr.msra.gmra.mxu0 %vm512_vm2, %v859_v32 }
 0x165   : > { %1265 = vmatprep.mubr.msk.bf16.mxu0 %vm1322_vm0, %v1321_v1 }
 0x1a2   : > { %v553_v33 = vpop.f32.mrf.mxu0 }
 0x1a3   : > { %v560_v34 = vsel %vm559_vm3, %v553_v33, -inf }
 0x1a4   : > { %561 = vmax.xlane.f32.xlu0 %v560_v34  ;;  %v1217_v35 = vpop.f32.mrf.mxu0 }
 0x1a6   : > { %v556_v36 = vpop.f32.mrf.mxu0 }
 0x1a8   : > { %v1218_v37 = vpop.f32.mrf.mxu0 }
 0x214   : > { %v670_v38 = vpop.f32.mrf.mxu0 }
 0x215   : > { %v676_v39 = vsel %vm559_vm3, %v670_v38, -inf }
 0x216   : > { %677 = vmax.xlane.f32.xlu1 %v676_v39  ;;  %v1229_v40 = vpop.f32.mrf.mxu0 }
 0x218   : > { %v673_v41 = vpop.f32.mrf.mxu0 }
 0x21a   : > { %v1230_v42 = vpop.f32.mrf.mxu0 }
 0x21b   : > { %v1293_v42 = vld [vmem:[%s1533_s6 + $0x8] sm:$0xff]  }
 0x21c   : > { %v786_v43 = vpop.f32.mrf.mxu0  ;;  %1262 = vmatpush3.bf16.msra.mxu0 %v1293_v42 }
 0x21d   : > { %v792_v44 = vsel %vm559_vm3, %v786_v43, -inf  ;;  %1263 = vmatprep.subr.bf16.mxu0 %v1321_v1 }
 0x21e   : > { %793 = vmax.xlane.f32.xlu0 %v792_v44  ;;  %v1241_v45 = vpop.f32.mrf.mxu0  ;;  %v1294_v44 = vld [vmem:[%s1533_s6] sm:$0xff]  }
 0x220   : > { %v789_v46 = vpop.f32.mrf.mxu0  ;;  %1264 = vmatpush3.bf16.msra.mxu0 %v1294_v44 }
 0x222   : > { %v1242_v47 = vpop.f32.mrf.mxu0 }
 0x224   : > { %v902_v48 = vpop.f32.mrf.mxu0 }
 0x225   : > { %v908_v49 = vsel %vm559_vm3, %v902_v48, -inf }
 0x226   : > { %909 = vmax.xlane.f32.xlu0 %v908_v49  ;;  %v1253_v50 = vpop.f32.mrf.mxu0 }
 0x228   : > { %v905_v51 = vpop.f32.mrf.mxu0 }
 0x22a   : > { %v1254_v52 = vpop.f32.mrf.mxu0 }
 0x22d   : > { %v562_v53 = vpop.xlane.xlu0 %561 }
 0x22e   : > { %v563_v54 = vsub.f32 %v553_v33, %v562_v53 }
 0x230   : > { %v564_v55 = vmul.f32 1.442695, %v563_v54 }
 0x232   : > { %1295 = vpow2.f32 %v564_v55 }
 0x23f   : > { %v1296_v56 = vpop.eup %1295 }
 0x240   : > { %v566_v57 = vsel %vm559_vm3, %v1296_v56, 0.0 }
 0x241   : > { %567 = vadd.xlane.f32.xlu1 %v566_v57  ;;  %v1164_v57 = vld [vmem:[%s1534_s7] ss:$0 sm:$0xff] }
 0x252   : > { %573 = vrot.lane.b32.xlu1 %v1444_v16, %s1326_s18 }
 0x29f   : > { %v678_v58 = vpop.xlane.xlu1 %677 }
 0x2a0   : > { %v679_v59 = vsub.f32 %v670_v38, %v678_v58 }
 0x2a2   : > { %v680_v60 = vmul.f32 1.442695, %v679_v59 }
 0x2a4   : > { %1297 = vpow2.f32 %v680_v60 }
 0x2a7   : > { %v794_v61 = vpop.xlane.xlu0 %793 }
 0x2a8   : > { %v795_v62 = vsub.f32 %v786_v43, %v794_v61 }
 0x2aa   : > { %v796_v63 = vmul.f32 1.442695, %v795_v62 }
 0x2ac   : > { %1299 = vpow2.f32 %v796_v63 }
 0x2af   : > { %v910_v0 = vpop.xlane.xlu0 %909 }
 0x2b0   : > { %v911_v2 = vsub.f32 %v902_v48, %v910_v0 }
 0x2b1   : > { %v1298_v3 = vpop.eup %1297 }
 0x2b2   : > { %v912_v4 = vmul.f32 1.442695, %v911_v2  ;;  %v682_v5 = vsel %vm559_vm3, %v1298_v3, 0.0 }
 0x2b3   : > { %683 = vadd.xlane.f32.xlu0 %v682_v5 }
 0x2b4   : > { %1301 = vpow2.f32 %v912_v4 }
 0x2b9   : > { %v1300_v6 = vpop.eup %1299 }
 0x2ba   : > { %v798_v8 = vsel %vm559_vm3, %v1300_v6, 0.0 }
 0x2bb   : > { %799 = vadd.xlane.f32.xlu1 %v798_v8 }
 0x2c1   : > { %v1302_v9 = vpop.eup %1301 }
 0x2c2   : > { %v914_v10 = vsel %vm559_vm3, %v1302_v9, 0.0 }
 0x2c3   : > { %915 = vadd.xlane.f32.xlu0 %v914_v10 }
 0x2ca   : > { %v568_v11 = vpop.xlane.xlu1 %567 }
 0x2cb   : > { %1303 = vrcp.f32 %v568_v11 }
 0x2cc   : > { %804 = vrot.lane.b32.xlu1 %v1444_v16, %s1327_s19  ;;  %s371_s19 = scalar_lea.vmem %s1537_s10, %s1416_s23 }
 0x2ce   : > { %v574_v12 = vpop.permute.xlu1 %573 }
 0x2cf   : > { %v581_v13 = vsel %vm579_vm4, %v574_v12, 0 }
 0x2d0   : > { %1220 = vmatpush3.bf16.msra.mxu1 %v581_v13  ;;  %920 = vrot.lane.b32.xlu1 %v1444_v16, %s1328_s20  ;;  %v1169_v13 = vld [vmem:[%s1536_s9] ss:$0 sm:$0xff] }
 0x2d1   : > { %1231 = vmatprep.subr.bf16.mxu1 %v1321_v1 }
 0x2d8   : > { %v1304_v14 = vpop.eup %1303 }
 0x2d9   : > { %688 = vrot.lane.b32.xlu0 %v1444_v16, %s1329_s21  ;;  %v570_v15 = vmul.f32 %v1304_v14, %v1296_v56 }
 0x2db   : > { %v571_v17 = vpack.c.bf16 %v570_v15, %v570_v15 }
 0x2dd   : > { %1222 = vmatmul.mubr.msk.bf16.vlgmr.msra.gmra.mxu1 %vm575_vm5, %v571_v17 }
 0x2de   : > { %1233 = vmatprep.mubr.msk.bf16.mxu1 %vm1322_vm0, %v1321_v1 }
 0x33c   : > { %v684_v18 = vpop.xlane.xlu0 %683 }
 0x33d   : > { %1305 = vrcp.f32 %v684_v18 }
 0x344   : > { %v800_v19 = vpop.xlane.xlu1 %799 }
 0x345   : > { %1307 = vrcp.f32 %v800_v19 }
 0x348   : > { %v805_v16 = vpop.permute.xlu1 %804 }
 0x349   : > { %v810_v27 = vsel %vm579_vm4, %v805_v16, 0 }
 0x34a   : > { %v1306_v20 = vpop.eup %1305 }
 0x34b   : > { %v686_v22 = vmul.f32 %v1306_v20, %v1298_v3 }
 0x34c   : > { %v916_v21 = vpop.xlane.xlu0 %915  ;;  %v921_v29 = vpop.permute.xlu1 %920 }
 0x34d   : > { %1309 = vrcp.f32 %v916_v21  ;;  %v687_v25 = vpack.c.bf16 %v686_v22, %v686_v22  ;;  %v926_v32 = vsel %vm579_vm4, %v921_v29, 0 }
 0x350   : > { %v689_v23 = vpop.permute.xlu0 %688 }
 0x351   : > { %v694_v24 = vsel %vm579_vm4, %v689_v23, 0 }
 0x352   : > { %1232 = vmatpush3.bf16.msra.mxu1 %v694_v24  ;;  %v1308_v26 = vpop.eup %1307 }
 0x353   : > { %1243 = vmatprep.subr.bf16.mxu1 %v1321_v1  ;;  %v802_v28 = vmul.f32 %v1308_v26, %v1300_v6 }
 0x355   : > { %1234 = vmatmul.mubr.msk.bf16.vlgmr.msra.gmra.mxu1 %vm575_vm5, %v687_v25  ;;  %v803_v30 = vpack.c.bf16 %v802_v28, %v802_v28 }
 0x356   : > { %1244 = vmatpush3.bf16.msra.mxu1 %v810_v27  ;;  %1245 = vmatprep.mubr.msk.bf16.mxu1 %vm1322_vm0, %v1321_v1 }
 0x357   : > { %1255 = vmatprep.subr.bf16.mxu1 %v1321_v1 }
 0x35a   : > { %v1310_v31 = vpop.eup %1309 }
 0x35b   : > { %v918_v33 = vmul.f32 %v1310_v31, %v1302_v9 }
 0x35d   : > { %1246 = vmatmul.mubr.msk.bf16.vlgmr.msra.gmra.mxu1 %vm575_vm5, %v803_v30  ;;  %v919_v34 = vpack.c.bf16 %v918_v33, %v918_v33 }
 0x35e   : > { %1256 = vmatpush3.bf16.msra.mxu1 %v926_v32  ;;  %1257 = vmatprep.mubr.msk.bf16.mxu1 %vm1322_vm0, %v1321_v1 }
 0x365   : > { %1258 = vmatmul.mubr.msk.bf16.vlgmr.msra.gmra.mxu1 %vm575_vm5, %v919_v34 }
 0x39d   : > { %v617_v35 = vpop.f32.mrf.mxu1 }
 0x39e   : > { %624 = vst.msk [vmem:[#allocation2] sm:$0xf] %vm623_vm6, %v617_v35 }
 0x39f   : > { %v1223_v36 = vpop.f32.mrf.mxu1 }
 0x3a1   : > { %v620_v37 = vpop.f32.mrf.mxu1 }
 0x3a3   : > { %v1224_v38 = vpop.f32.mrf.mxu1 }
 0x415   : > { %v730_v39 = vpop.f32.mrf.mxu1 }
 0x416   : > { %737 = vrot.lane.b32.xlu0 %v730_v39, %s1330_s22 }
 0x417   : > { %v1235_v40 = vpop.f32.mrf.mxu1 }
 0x419   : > { %v733_v41 = vpop.f32.mrf.mxu1 }
 0x41b   : > { %v1236_v43 = vpop.f32.mrf.mxu1 }
 0x41d   : > { %v846_v45 = vpop.f32.mrf.mxu1 }
 0x41e   : > { %853 = vrot.lane.b32.xlu1 %v846_v45, %s1331_s28 }
 0x41f   : > { %v1247_v46 = vpop.f32.mrf.mxu1 }
 0x421   : > { %v849_v47 = vpop.f32.mrf.mxu1 }
 0x423   : > { %v1248_v48 = vpop.f32.mrf.mxu1 }
 0x425   : > { %v962_v49 = vpop.f32.mrf.mxu1 }
 0x426   : > { %969 = vrot.lane.b32.xlu0 %v962_v49, %s1332_s29 }
 0x427   : > { %v1259_v50 = vpop.f32.mrf.mxu1 }
 0x429   : > { %v965_v51 = vpop.f32.mrf.mxu1 }
 0x42b   : > { %v1260_v52 = vpop.f32.mrf.mxu1 }
 0x488   : > { %v738_v53 = vpop.permute.xlu0 %737 }
 0x489   : > { %741 = vst.msk [vmem:[#allocation2] sm:$0xf] %vm740_vm7, %v738_v53 }
 0x490   : > { %v854_v54 = vpop.permute.xlu1 %853 }
 0x491   : > { %857 = vst.msk [vmem:[#allocation2] sm:$0xf] %vm856_vm8, %v854_v54 }
 0x498   : > { %v970_v1 = vpop.permute.xlu0 %969 }
 0x499   : > { %973 = vst.msk [vmem:[#allocation2] sm:$0xf] %vm972_vm9, %v970_v1 }
 0x4a0   : > { %v974_v55 = vld [vmem:[#allocation2] sm:$0xf] }
 0x4a1   : > { %v975_v56 = vpack.c.bf16 %v974_v55, %v974_v55 }
 0x4a3   : > { %1266 = vmatmul.mubr.msk.bf16.vlgmr.msra.gmra.mxu0 %vm399_vm1, %v975_v56 }
 0x563   : > { %v1036_v58 = vpop.f32.mrf.mxu0 }
 0x564   : > { %v1037_v59 = vadd.f32 %v1164_v57, %v1036_v58 }
 0x565   : > { %v1267_v60 = vpop.f32.mrf.mxu0 }
 0x566   : > { %v1042_v61 = vadd.f32 %v1037_v59, %v1428_v7  ;;  %v1168_v7 = vld [vmem:[%s1535_s8] ss:$0 sm:$0xff] }
 0x567   : > { %v1039_v62 = vpop.f32.mrf.mxu0 }
 0x568   : > { %v1046_v63 = vsel %vm1045_vm10, %v1042_v61, 0.0 }
 0x569   : > { %1047 = vadd.xlane.f32.xlu1 %v1046_v63  ;;  %v1268_v0 = vpop.f32.mrf.mxu0 }
 0x5f2   : > { %v1048_v2 = vpop.xlane.xlu1 %1047 }
 0x5f3   : > { %v1050_v3 = vmul.f32 0.03125, %v1048_v2 }
 0x5f5   : > { %v1051_v4 = vsub.f32 %v1042_v61, %v1050_v3 }
 0x5f7   : > { %v1052_v5 = vmul.f32 %v1051_v4, %v1051_v4 }
 0x5f9   : > { %v1053_v6 = vsel %vm1045_vm10, %v1052_v5, 0.0 }
 0x5fa   : > { %1054 = vadd.xlane.f32.xlu0 %v1053_v6 }
 0x683   : > { %v1055_v8 = vpop.xlane.xlu0 %1054 }
 0x684   : > { %v1056_v9 = vmul.f32 0.03125, %v1055_v8 }
 0x686   : > { %v1057_v10 = vadd.f32 1e-05, %v1056_v9 }
 0x688   : > { %1311 = vrsqrt.f32 %v1057_v10 }
 0x695   : > { %v1312_v11 = vpop.eup %1311 }
 0x696   : > { %v1059_v12 = vmul.f32 %v1312_v11, %v1051_v4 }
 0x698   : > { %v1066_v14 = vmul.f32 %v1168_v7, %v1059_v12 }
 0x69a   : > { %v1073_v15 = vadd.f32 %v1169_v13, %v1066_v14 }
 0x69c   : > { %1074 = vst.msk [vmem:[%s371_s19] sm:$0xf] %vm1045_vm10, %v1073_v15 }
 0x69d PF: > { %s20_s13 = sadd.s32 1, %s1319_s13  }
 0x69e   : > { %p17_p4 = scmp.ge.s32.totalorder %s20_s13, 6  }
 0x6a0   :  { %19 = sbr.rel (!%p17_p4) target bundleno = 1 (0x1), region = 93 }

// kernel: fsa_transformer_encoder.12
= control target key start
LH: loop header
LB: loop body
LE: loop exit
PB: predicated region body
PF: predicated region fallthrough
CT: control target
= control target key end

     0   :  { %s631_s24 = smov 0   ;;  %s689_s0 = inlined_call_operand.vmem [shape: f32[16,32], index: 0, kind: input, shape index: {}]   ;;  %s690_s1 = inlined_call_operand.vmem [shape: bf16[32,64], index: 1, kind: input, shape index: {}]   ;;  %s691_s2 = inlined_call_operand.vmem [shape: f32[1,64], index: 2, kind: input, shape index: {}]   ;;  %s692_s3 = inlined_call_operand.vmem [shape: bf16[64,32], index: 3, kind: input, shape index: {}]   ;;  %s693_s4 = inlined_call_operand.vmem [shape: f32[1,32], index: 4, kind: input, shape index: {}]   ;;  %s694_s5 = inlined_call_operand.vmem [shape: f32[1,32], index: 5, kind: input, shape index: {}]   ;;  %s695_s6 = inlined_call_operand.vmem [shape: f32[1,32], index: 6, kind: input, shape index: {}]   ;;  %s696_s7 = inlined_call_operand.vmem [shape: f32[16,32], index: 7, kind: output, shape index: {}]  }
   0x1 LB: > { %s514_s25 = sadd.s32 4294967295, %s587_s24   ;;  %p518_p0 = scmp.ge.s32.totalorder %s587_s24, 1  ;;  %s587_s24 = sphi %s631_s24, %s17_s24  }
   0x2   : > { %p236_p1 = scmp.lt.s32.totalorder %s587_s24, 3 }
   0x4   : > { %p237_p2 = pnand %p518_p0, %p236_p1 }
   0x5   : > { %p266_p3 = scmp.lt.s32.totalorder (!%p237_p2), %s514_s25, 1 }
   0x6   : > { %240 = sbr.rel (%p237_p2) target bundleno = 725 (0x2d5), region = 48 }
   0xb   : > { %v573_v0 = vld [vmem:[%s690_s1 + $0x8] sm:$0xff]   ;;  %v589_v1 = vmov 0.0   ;;  %v574_v2 = vld [vmem:[%s690_s1] sm:$0xff]   ;;  %vm590_vm0 = vmmov 0   ;;  %v575_v3 = vld [vmem:[%s692_s3 + $0x18] sm:$0xff]   ;;  %s698_s25 = smov (!%p266_p3, %s514_s25), 1 }
   0xc   : > { %543 = vmatprep.subr.bf16.mxu0 %v589_v1  ;;  %551 = vmatprep.subr.bf16.mxu1 %v589_v1  ;;  %v576_v4 = vld [vmem:[%s692_s3 + $0x10] sm:$0xff]   ;;  %s519_s11 = sshll.u32 %s698_s25, 3  ;;  %vm300_vm1 = vcmask 261120   ;;  %v577_v7 = vld [vmem:[%s692_s3 + $0x8] sm:$0xff]   ;;  %v578_v8 = vld [vmem:[%s692_s3] sm:$0xff]   ;;  %vm385_vm2 = vcmask 523264  }
   0xd   : > { %544 = vmatpush3.bf16.msra.mxu0 %v573_v0  ;;  %547 = vmatprep.mubr.msk.bf16.mxu0 %vm590_vm0, %v589_v1  ;;  %s269_s14 = scalar_lea.vmem %s689_s0, %s519_s11  ;;  %v521_v9 = vld [vmem:[%s691_s2] ss:$0 sm:$0xff]  ;;  %s273_s8 = scalar_lea.vmem %s696_s7, %s519_s11 }
   0xe   : > { %545 = vmatprep.subr.bf16.mxu0 %v589_v1  ;;  %559 = vmatprep.mubr.msk.bf16.mxu1 %vm590_vm0, %v589_v1  ;;  %v275_v5 = vld [vmem:[%s269_s14] sm:$0xff] }
   0xf   : > { %552 = vmatpush3.bf16.msra.mxu1 %v575_v3  ;;  %v276_v6 = vpack.c.bf16 %v275_v5, %v275_v5  ;;  %v525_v17 = vld [vmem:[%s693_s4] ss:$0 sm:$0xff] }
  0x10   : > { %553 = vmatprep.subr.bf16.mxu1 %v589_v1  ;;  %v531_v34 = vld [vmem:[%s694_s5] ss:$0 sm:$0xff] }
  0x11   : > { %546 = vmatpush3.bf16.msra.mxu0 %v574_v2  ;;  %v532_v36 = vld [vmem:[%s695_s6] ss:$0 sm:$0xff] }
  0x13   : > { %554 = vmatpush3.bf16.msra.mxu1 %v576_v4 }
  0x14   : > { %555 = vmatprep.subr.bf16.mxu1 %v589_v1  ;;  %548 = vmatmul.mubr.msk.bf16.vlgmr.msra.gmra.mxu0 %vm300_vm1, %v276_v6 }
  0x17   : > { %556 = vmatpush3.bf16.msra.mxu1 %v577_v7 }
  0x18   : > { %557 = vmatprep.subr.bf16.mxu1 %v589_v1 }
  0x1b   : > { %558 = vmatpush3.bf16.msra.mxu1 %v578_v8 }
  0xd4   : > { %v338_v10 = vpop.f32.mrf.mxu0 }
  0xd5   : > { %v339_v11 = vadd.f32 %v521_v9, %v338_v10 }
  0xd6   : > { %v549_v12 = vpop.f32.mrf.mxu0 }
  0xd7   : > { %v344_v13 = vmax.f32 %v339_v11, 0.0 }
  0xd8   : > { %v341_v14 = vpop.f32.mrf.mxu0 }
  0xd9   : > { %v345_v15 = vpack.c.bf16 %v344_v13, %v344_v13 }
  0xda   : > { %v550_v16 = vpop.f32.mrf.mxu0 }
  0xdb   : > { %560 = vmatmul.mubr.msk.bf16.vlgmr.msra.gmra.mxu1 %vm385_vm2, %v345_v15 }
 0x19b   : > { %v423_v18 = vpop.f32.mrf.mxu1 }
 0x19c   : > { %v424_v19 = vadd.f32 %v525_v17, %v423_v18 }
 0x19d   : > { %v561_v20 = vpop.f32.mrf.mxu1 }
 0x19e   : > { %v429_v21 = vadd.f32 %v424_v19, %v275_v5 }
 0x19f   : > { %v426_v22 = vpop.f32.mrf.mxu1 }
 0x1a0   : > { %v432_v23 = vsel %vm300_vm1, %v429_v21, 0.0 }
 0x1a1   : > { %433 = vadd.xlane.f32.xlu0 %v432_v23  ;;  %v562_v24 = vpop.f32.mrf.mxu1 }
 0x22a   : > { %v434_v25 = vpop.xlane.xlu0 %433 }
 0x22b   : > { %v436_v26 = vmul.f32 0.03125, %v434_v25 }
 0x22d   : > { %v437_v27 = vsub.f32 %v429_v21, %v436_v26 }
 0x22f   : > { %v438_v28 = vmul.f32 %v437_v27, %v437_v27 }
 0x231   : > { %v439_v29 = vsel %vm300_vm1, %v438_v28, 0.0 }
 0x232   : > { %440 = vadd.xlane.f32.xlu0 %v439_v29 }
 0x2bb   : > { %v441_v30 = vpop.xlane.xlu0 %440 }
 0x2bc   : > { %v442_v31 = vmul.f32 0.03125, %v441_v30 }
 0x2be   : > { %v443_v32 = vadd.f32 1e-05, %v442_v31 }
 0x2c0   : > { %579 = vrsqrt.f32 %v443_v32 }
 0x2cd   : > { %v580_v33 = vpop.eup %579 }
 0x2ce   : > { %v445_v35 = vmul.f32 %v580_v33, %v437_v27 }
 0x2d0   : > { %v452_v37 = vmul.f32 %v531_v34, %v445_v35 }
 0x2d2   : > { %v459_v38 = vadd.f32 %v532_v36, %v452_v37 }
 0x2d4   : > { %460 = vst.msk [vmem:[%s273_s8] sm:$0xff] %vm300_vm1, %v459_v38 }
 0x2d5 PF: > { %s17_s24 = sadd.s32 1, %s587_s24  }
 0x2d6   : > { %p14_p4 = scmp.ge.s32.totalorder %s17_s24, 4  }
 0x2d8   :  { %16 = sbr.rel (!%p14_p4) target bundleno = 1 (0x1), region = 78 }

</bundles_post_ra>
